<compile_context>
chip_gen: v7x
topology: tpu7x:2x2x1
jax: 0.10.0
libtpu: 0.0.40
codegen_flags: <defaults>
</compile_context>

<pallas_src>
import functools

import jax
import jax.numpy as jnp
from jax.experimental import pallas as pl
from jax.experimental.pallas import tpu as pltpu

_HI = jax.lax.Precision.HIGHEST  # used only by the pure-JAX reference


def _elu(x):
    return jnp.where(x > 0, x, jnp.exp(jnp.minimum(x, 0.0)) - 1.0)


def _fold_bn(gamma, beta, mean, var, eps=1e-5):
    s = gamma / jnp.sqrt(var + eps)
    return s, beta - mean * s


def _pool_matrix(n, k):
    # (n, n//k) matrix implementing non-overlapping average pooling of width k.
    idx = jnp.arange(n) // k
    return (idx[:, None] == jnp.arange(n // k)[None, :]).astype(jnp.float32) / k


def a14_kernel(xs_ref, w2blk_ref, tband_ref, b2_ref, p4_ref, w4blk_ref, b3_ref,
               p8_ref, wfct_ref, fcmask_ref, lsel_ref, sumsel_ref, bfc_ref,
               logits_ref, feat_ref, out2_ref, *, F1, D, BBLK):
    rpf = BBLK * D  # rows that share one temporal filter: (b, d) for fixed f

    # (1) Depthwise spatial conv (conv2) with bn1/bn2 scales folded, applied
    #     BEFORE the temporal conv (both are linear, so they commute).  The
    #     batch-block-diagonal weight keeps the BBLK samples separate.
    #     (F1*BBLK*D, BBLK*nc) @ (BBLK*nc, ntp)  -> rows ordered (f, b, d).
    z = jnp.dot(w2blk_ref[...], xs_ref[...], preferred_element_type=jnp.float32)

    # (2) Temporal conv (conv1) as a banded-Toeplitz MXU matmul per filter f,
    #     written directly into a VMEM scratch (aligned 16-row slices).
    for f in range(F1):
        out2_ref[f * rpf:(f + 1) * rpf, :] = jnp.dot(
            z[f * rpf:(f + 1) * rpf, :], tband_ref[f],
            preferred_element_type=jnp.float32)

    # (3) bn2 bias (scales already folded upstream) + ELU + AvgPool(1, 4).
    h = _elu(out2_ref[...] + b2_ref[...])
    h = jnp.dot(h, p4_ref[...], preferred_element_type=jnp.float32)

    # (4) conv4 (1x1) with bn3 scale folded, batch-block-diagonal -> rows (b, o);
    #     then bn3 bias + ELU + AvgPool(1, 8).
    g = _elu(jnp.dot(w4blk_ref[...], h, preferred_element_type=jnp.float32)
             + b3_ref[...])
    pooled = jnp.dot(g, p8_ref[...], preferred_element_type=jnp.float32)

    feat_ref[...] = pooled  # (BBLK*F2, t32), rows ordered (b, o)

    # (5) Fully-connected layer as one masked contraction (no per-channel loop,
    #     no in-kernel flatten):
    #       u[(b,o), (o',c)] = sum_t pooled[(b,o), t] * wfc[c, o'*t32 + t]
    #       mask keeps o == o'; lsel sums over o per sample; sumsel collapses
    #       the per-channel partial logits.  All plain 2D MXU matmuls.
    u = jnp.dot(pooled, wfct_ref[...], preferred_element_type=jnp.float32)
    u = u * fcmask_ref[...]
    v = jnp.dot(lsel_ref[...], u, preferred_element_type=jnp.float32)
    logits_ref[...] = (jnp.dot(v, sumsel_ref[...],
                               preferred_element_type=jnp.float32)
                       + bfc_ref[...])


def a14_forward(x, params, *, F1, D, F2, nt, nc, classes, bblk=8):
    B = x.shape[0]
    assert B % bblk == 0 and nt % 32 == 0
    K1 = nt // 2
    t4, t32 = nt // 4, nt // 32
    ntp = nt + K1 - 1
    ntp_pad = ((ntp + 127) // 128) * 128  # lane-align the padded time axis

    s1, b1 = _fold_bn(*params["bn1"])
    s2, b2 = _fold_bn(*params["bn2"])
    s3, b3 = _fold_bn(*params["bn3"])

    # ZeroPad2d((K1//2-1, K1//2, 0, 0)) on time + extra zeros up to the lane
    # boundary; batch stacked along sublanes: (B*nc, ntp_pad).
    xs = jnp.pad(x[:, 0], ((0, 0), (0, 0),
                           (K1 // 2 - 1, K1 // 2 + ntp_pad - ntp)))
    xs = xs.reshape(B * nc, ntp_pad)

    eye_b = jnp.eye(bblk, dtype=jnp.float32)

    # conv2 weights with bn1 scale (columns) and bn2 scale (rows) folded,
    # batch-block-diagonal:  rows (f, b, d), cols (b', c).
    w2s = params["w2"] * s1[None, :] * s2[:, None]                  # (F1*D, nc)
    w2blk = (eye_b[None, :, None, :, None]
             * w2s.reshape(F1, D, nc)[:, None, :, None, :]
             ).reshape(F1 * bblk * D, bblk * nc)

    # bn2 bias with the bn1 bias pushed through conv2, tiled to rows (f, b, d).
    cb = params["w2"] @ b1                                          # (F1*D,)
    b2m = b2 + s2 * cb
    b2r = jnp.tile(b2m.reshape(F1, 1, D), (1, bblk, 1)).reshape(F1 * bblk * D, 1)

    # Banded Toeplitz bank implementing the temporal conv: T[f, p, t] = w1[f, p-t].
    pk = jnp.arange(ntp_pad)[:, None] - jnp.arange(nt)[None, :]
    band = (pk >= 0) & (pk < K1)
    tband = jnp.where(band[None], params["w1"][:, jnp.clip(pk, 0, K1 - 1)], 0.0)

    p4 = _pool_matrix(nt, 4)
    p8 = _pool_matrix(t4, 8)

    # conv4 (1x1) with bn3 scale folded, batch-block-diagonal:
    # rows (b, o), cols (f, b', d).
    w4s = params["w4"] * s3[:, None]                                # (F2, F1*D)
    w4blk = (eye_b[:, None, None, :, None]
             * w4s.reshape(F2, F1, D)[None, :, :, None, :]
             ).reshape(bblk * F2, F1 * bblk * D)
    b3r = jnp.tile(b3.reshape(1, F2), (bblk, 1)).reshape(bblk * F2, 1)

    # FC as a masked contraction (see kernel step 5).
    wfc3 = params["wfc"].reshape(classes, F2, t32)
    wfct = wfc3.transpose(2, 1, 0).reshape(t32, F2 * classes)       # [t, o*classes+c]
    fcmask = jnp.tile(jnp.repeat(jnp.eye(F2, dtype=jnp.float32), classes, axis=1),
                      (bblk, 1))                                    # (bblk*F2, F2*classes)
    lsel = jnp.repeat(eye_b, F2, axis=1)                            # (bblk, bblk*F2)
    sumsel = jnp.tile(jnp.eye(classes, dtype=jnp.float32), (F2, 1)) # (F2*classes, classes)
    bfc = params["bfc"].reshape(1, classes)

    kernel = functools.partial(a14_kernel, F1=F1, D=D, BBLK=bblk)

    def const(shape):
        n = len(shape)
        return pl.BlockSpec(shape, lambda i, n=n: (0,) * n)

    logits, feat = pl.pallas_call(
        kernel,
        grid=(B // bblk,),
        in_specs=[
            pl.BlockSpec((bblk * nc, ntp_pad), lambda i: (i, 0)),   # xs (batch block)
            const((F1 * bblk * D, bblk * nc)),                      # w2blk
            const((F1, ntp_pad, nt)),                               # Toeplitz bank
            const((F1 * bblk * D, 1)),                              # bn2 bias (tiled)
            const((nt, t4)),                                        # pool(1,4)
            const((bblk * F2, F1 * bblk * D)),                      # w4blk
            const((bblk * F2, 1)),                                  # bn3 bias (tiled)
            const((t4, t32)),                                       # pool(1,8)
            const((t32, F2 * classes)),                             # FC weights (expanded)
            const((bblk * F2, F2 * classes)),                       # FC mask
            const((bblk, bblk * F2)),                               # per-sample row sum
            const((F2 * classes, classes)),                         # per-channel lane sum
            const((1, classes)),                                    # FC bias
        ],
        out_specs=[
            pl.BlockSpec((bblk, classes), lambda i: (i, 0)),        # logits
            pl.BlockSpec((bblk * F2, t32), lambda i: (i, 0)),       # feature (flat rows)
        ],
        out_shape=[
            jax.ShapeDtypeStruct((B, classes), jnp.float32),
            jax.ShapeDtypeStruct((B * F2, t32), jnp.float32),
        ],
        scratch_shapes=[pltpu.VMEM((F1 * bblk * D, nt), jnp.float32)],
        compiler_params=pltpu.CompilerParams(
            dimension_semantics=("parallel",),
            vmem_limit_bytes=32 * 1024 * 1024),
    )(xs, w2blk, tband, b2r, p4, w4blk, b3r, p8, wfct, fcmask, lsel, sumsel, bfc)

    return logits, feat.reshape(B, F2, t32)


def a14_reference(x, params, *, F1, D, F2, nt, nc, classes):
    """Pure-JAX reference with identical (eval-mode) semantics, f32 precision."""
    B = x.shape[0]
    K1 = nt // 2
    s1, b1 = _fold_bn(*params["bn1"])
    s2, b2 = _fold_bn(*params["bn2"])
    s3, b3 = _fold_bn(*params["bn3"])

    xpad = jnp.pad(x[:, 0], ((0, 0), (0, 0), (K1 // 2 - 1, K1 // 2)))
    wins = jnp.stack([xpad[:, :, k:k + nt] for k in range(K1)], axis=-1)  # (B,nc,nt,K1)
    out1 = jnp.einsum("bctk,fk->bfct", wins, params["w1"], precision=_HI)
    out1 = out1 * s1[None, None, :, None] + b1[None, None, :, None]
    w2r = params["w2"].reshape(F1, D, nc)
    out2 = jnp.einsum("fdc,bfct->bfdt", w2r, out1, precision=_HI).reshape(B, F1 * D, nt)
    out2 = _elu(out2 * s2[None, :, None] + b2[None, :, None])
    out2 = out2.reshape(B, F1 * D, nt // 4, 4).mean(-1)
    out4 = jnp.einsum("of,bft->bot", params["w4"], out2, precision=_HI)
    out4 = _elu(out4 * s3[None, :, None] + b3[None, :, None])
    pooled = out4.reshape(B, F2, nt // 32, 8).mean(-1)
    logits = jnp.dot(pooled.reshape(B, F2 * (nt // 32)), params["wfc"].T,
                     precision=_HI) + params["bfc"]
    return logits, pooled


def make_params(key, *, F1, D, F2, nt, nc, classes):
    K1 = nt // 2
    ks = jax.random.split(key, 16)

    def bn(k, c):
        k0, k1, k2, k3 = jax.random.split(k, 4)
        return (1.0 + 0.1 * jax.random.normal(k0, (c,), jnp.float32),   # gamma
                0.1 * jax.random.normal(k1, (c,), jnp.float32),         # beta
                0.1 * jax.random.normal(k2, (c,), jnp.float32),         # running mean
                1.0 + 0.1 * jnp.abs(jax.random.normal(k3, (c,), jnp.float32)))  # var

    return {
        "w1": 0.1 * jax.random.normal(ks[0], (F1, K1), jnp.float32),
        "w2": 0.1 * jax.random.normal(ks[1], (F1 * D, nc), jnp.float32),
        "w4": 0.2 * jax.random.normal(ks[2], (F2, F1 * D), jnp.float32),
        "wfc": 0.1 * jax.random.normal(ks[3], (classes, F2 * (nt // 32)), jnp.float32),
        "bfc": 0.1 * jax.random.normal(ks[4], (classes,), jnp.float32),
        "bn1": bn(ks[5], nc),
        "bn2": bn(ks[6], F1 * D),
        "bn3": bn(ks[7], F2),
    }


if __name__ == "__main__":
    # nc must stay 96 (bn1 is hard-coded BatchNorm2d(96)); nt reduced for the demo
    # (multiple of 32).  B=16 so the batch can be blocked 8/step with a grid of 2
    # (keeps both v7x TensorCores busy).
    B, F1, F2, D, nt, nc, classes = 16, 8, 16, 2, 64, 96, 40

    key = jax.random.PRNGKey(0)
    kx, kp = jax.random.split(key)
    x = jax.random.normal(kx, (B, 1, nc, nt), jnp.float32)
    params = make_params(kp, F1=F1, D=D, F2=F2, nt=nt, nc=nc, classes=classes)

    logits, feature = a14_forward(x, params, F1=F1, D=D, F2=F2,
                                  nt=nt, nc=nc, classes=classes, bblk=8)
    jax.block_until_ready((logits, feature))

    ref_logits, ref_feature = a14_reference(x, params, F1=F1, D=D, F2=F2,
                                            nt=nt, nc=nc, classes=classes)
    assert logits.shape == (B, classes) and feature.shape == (B, F2, nt // 32)
    # Kernel matmuls use default MXU precision (bf16 multiply / f32 accumulate),
    # so compare against the f32 reference with a correspondingly looser tolerance.
    assert jnp.allclose(logits, ref_logits, atol=1e-2, rtol=1e-2)
    assert jnp.allclose(feature, ref_feature, atol=1e-2, rtol=1e-2)

    print("KERNEL_OK")
</pallas_src>

<mosaic_0001>
module attributes {stable_mosaic.version = 11 : i64} {
  func.func @a14_kernel(%arg0: i32, %arg1: memref<768x128xf32, #tpu.memory_space<vmem>>, %arg2: memref<128x768xf32, #tpu.memory_space<vmem>>, %arg3: memref<8x128x64xf32, #tpu.memory_space<vmem>>, %arg4: memref<128x1xf32, #tpu.memory_space<vmem>>, %arg5: memref<64x16xf32, #tpu.memory_space<vmem>>, %arg6: memref<128x128xf32, #tpu.memory_space<vmem>>, %arg7: memref<128x1xf32, #tpu.memory_space<vmem>>, %arg8: memref<16x2xf32, #tpu.memory_space<vmem>>, %arg9: memref<2x640xf32, #tpu.memory_space<vmem>>, %arg10: memref<128x640xf32, #tpu.memory_space<vmem>>, %arg11: memref<8x128xf32, #tpu.memory_space<vmem>>, %arg12: memref<640x40xf32, #tpu.memory_space<vmem>>, %arg13: memref<1x40xf32, #tpu.memory_space<vmem>>, %arg14: memref<8x40xf32, #tpu.memory_space<vmem>>, %arg15: memref<128x2xf32, #tpu.memory_space<vmem>>, %arg16: memref<128x64xf32, #tpu.memory_space<vmem>>) attributes {dimension_semantics = [#tpu.dimension_semantics<parallel>], iteration_bounds = array<i64: 2>, scalar_prefetch = 0 : i64, scratch_operands = 1 : i64, tpu.core_type = #tpu.core_type<tc>, window_params = [{transform_indices = @transform_0, window_bounds = array<i64: 768, 128>}, {pipeline_mode = #tpu.pipeline_mode<synchronous>, transform_indices = @transform_1, window_bounds = array<i64: 128, 768>}, {pipeline_mode = #tpu.pipeline_mode<synchronous>, transform_indices = @transform_2, window_bounds = array<i64: 8, 128, 64>}, {pipeline_mode = #tpu.pipeline_mode<synchronous>, transform_indices = @transform_3, window_bounds = array<i64: 128, 1>}, {pipeline_mode = #tpu.pipeline_mode<synchronous>, transform_indices = @transform_4, window_bounds = array<i64: 64, 16>}, {pipeline_mode = #tpu.pipeline_mode<synchronous>, transform_indices = @transform_5, window_bounds = array<i64: 128, 128>}, {pipeline_mode = #tpu.pipeline_mode<synchronous>, transform_indices = @transform_6, window_bounds = array<i64: 128, 1>}, {pipeline_mode = #tpu.pipeline_mode<synchronous>, transform_indices = @transform_7, window_bounds = array<i64: 16, 2>}, {pipeline_mode = #tpu.pipeline_mode<synchronous>, transform_indices = @transform_8, window_bounds = array<i64: 2, 640>}, {pipeline_mode = #tpu.pipeline_mode<synchronous>, transform_indices = @transform_9, window_bounds = array<i64: 128, 640>}, {pipeline_mode = #tpu.pipeline_mode<synchronous>, transform_indices = @transform_10, window_bounds = array<i64: 8, 128>}, {pipeline_mode = #tpu.pipeline_mode<synchronous>, transform_indices = @transform_11, window_bounds = array<i64: 640, 40>}, {pipeline_mode = #tpu.pipeline_mode<synchronous>, transform_indices = @transform_12, window_bounds = array<i64: 1, 40>}, {transform_indices = @transform_13, window_bounds = array<i64: 8, 40>}, {transform_indices = @transform_14, window_bounds = array<i64: 128, 2>}]} {
    %c0 = arith.constant 0 : index
    %c0_0 = arith.constant 0 : index
    %0 = vector.load %arg2[%c0, %c0_0] : memref<128x768xf32, #tpu.memory_space<vmem>>, vector<128x768xf32>
    %c0_1 = arith.constant 0 : index
    %c0_2 = arith.constant 0 : index
    %1 = vector.load %arg1[%c0_1, %c0_2] : memref<768x128xf32, #tpu.memory_space<vmem>>, vector<768x128xf32>
    %cst = arith.constant dense<0.000000e+00> : vector<128x128xf32>
    %2 = tpu.matmul %0, %1, %cst {dimension_numbers = #tpu.dot_dimension_numbers<[1], [0], [0], [1], [0, 0, 1, 1], [], []>} : vector<128x768xf32>, vector<768x128xf32>, vector<128x128xf32> -> vector<128x128xf32>
    %3 = vector.extract_strided_slice %2 {offsets = [0, 0], sizes = [16, 128], strides = [1, 1]} : vector<128x128xf32> to vector<16x128xf32>
    %c0_3 = arith.constant 0 : index
    %c0_4 = arith.constant 0 : index
    %c0_5 = arith.constant 0 : index
    %4 = vector.load %arg3[%c0_3, %c0_4, %c0_5] : memref<8x128x64xf32, #tpu.memory_space<vmem>>, vector<1x128x64xf32>
    %5 = vector.shape_cast %4 : vector<1x128x64xf32> to vector<128x64xf32>
    %cst_6 = arith.constant dense<0.000000e+00> : vector<16x64xf32>
    %6 = tpu.matmul %3, %5, %cst_6 {dimension_numbers = #tpu.dot_dimension_numbers<[1], [0], [0], [1], [0, 0, 1, 1], [], []>} : vector<16x128xf32>, vector<128x64xf32>, vector<16x64xf32> -> vector<16x64xf32>
    %c0_7 = arith.constant 0 : index
    %c0_8 = arith.constant 0 : index
    %7 = vector.load %arg16[%c0_7, %c0_8] : memref<128x64xf32, #tpu.memory_space<vmem>>, vector<16x64xf32>
    tpu.vector_store %arg16[%c0_7, %c0_8], %6 {strides = array<i32>} : memref<128x64xf32, #tpu.memory_space<vmem>>, vector<16x64xf32>,
    %8 = vector.extract_strided_slice %2 {offsets = [16, 0], sizes = [16, 128], strides = [1, 1]} : vector<128x128xf32> to vector<16x128xf32>
    %c1 = arith.constant 1 : index
    %c0_9 = arith.constant 0 : index
    %c0_10 = arith.constant 0 : index
    %9 = vector.load %arg3[%c1, %c0_9, %c0_10] : memref<8x128x64xf32, #tpu.memory_space<vmem>>, vector<1x128x64xf32>
    %10 = vector.shape_cast %9 : vector<1x128x64xf32> to vector<128x64xf32>
    %cst_11 = arith.constant dense<0.000000e+00> : vector<16x64xf32>
    %11 = tpu.matmul %8, %10, %cst_11 {dimension_numbers = #tpu.dot_dimension_numbers<[1], [0], [0], [1], [0, 0, 1, 1], [], []>} : vector<16x128xf32>, vector<128x64xf32>, vector<16x64xf32> -> vector<16x64xf32>
    %c16 = arith.constant 16 : index
    %c0_12 = arith.constant 0 : index
    %12 = vector.load %arg16[%c16, %c0_12] : memref<128x64xf32, #tpu.memory_space<vmem>>, vector<16x64xf32>
    tpu.vector_store %arg16[%c16, %c0_12], %11 {strides = array<i32>} : memref<128x64xf32, #tpu.memory_space<vmem>>, vector<16x64xf32>,
    %13 = vector.extract_strided_slice %2 {offsets = [32, 0], sizes = [16, 128], strides = [1, 1]} : vector<128x128xf32> to vector<16x128xf32>
    %c2 = arith.constant 2 : index
    %c0_13 = arith.constant 0 : index
    %c0_14 = arith.constant 0 : index
    %14 = vector.load %arg3[%c2, %c0_13, %c0_14] : memref<8x128x64xf32, #tpu.memory_space<vmem>>, vector<1x128x64xf32>
    %15 = vector.shape_cast %14 : vector<1x128x64xf32> to vector<128x64xf32>
    %cst_15 = arith.constant dense<0.000000e+00> : vector<16x64xf32>
    %16 = tpu.matmul %13, %15, %cst_15 {dimension_numbers = #tpu.dot_dimension_numbers<[1], [0], [0], [1], [0, 0, 1, 1], [], []>} : vector<16x128xf32>, vector<128x64xf32>, vector<16x64xf32> -> vector<16x64xf32>
    %c32 = arith.constant 32 : index
    %c0_16 = arith.constant 0 : index
    %17 = vector.load %arg16[%c32, %c0_16] : memref<128x64xf32, #tpu.memory_space<vmem>>, vector<16x64xf32>
    tpu.vector_store %arg16[%c32, %c0_16], %16 {strides = array<i32>} : memref<128x64xf32, #tpu.memory_space<vmem>>, vector<16x64xf32>,
    %18 = vector.extract_strided_slice %2 {offsets = [48, 0], sizes = [16, 128], strides = [1, 1]} : vector<128x128xf32> to vector<16x128xf32>
    %c3 = arith.constant 3 : index
    %c0_17 = arith.constant 0 : index
    %c0_18 = arith.constant 0 : index
    %19 = vector.load %arg3[%c3, %c0_17, %c0_18] : memref<8x128x64xf32, #tpu.memory_space<vmem>>, vector<1x128x64xf32>
    %20 = vector.shape_cast %19 : vector<1x128x64xf32> to vector<128x64xf32>
    %cst_19 = arith.constant dense<0.000000e+00> : vector<16x64xf32>
    %21 = tpu.matmul %18, %20, %cst_19 {dimension_numbers = #tpu.dot_dimension_numbers<[1], [0], [0], [1], [0, 0, 1, 1], [], []>} : vector<16x128xf32>, vector<128x64xf32>, vector<16x64xf32> -> vector<16x64xf32>
    %c48 = arith.constant 48 : index
    %c0_20 = arith.constant 0 : index
    %22 = vector.load %arg16[%c48, %c0_20] : memref<128x64xf32, #tpu.memory_space<vmem>>, vector<16x64xf32>
    tpu.vector_store %arg16[%c48, %c0_20], %21 {strides = array<i32>} : memref<128x64xf32, #tpu.memory_space<vmem>>, vector<16x64xf32>,
    %23 = vector.extract_strided_slice %2 {offsets = [64, 0], sizes = [16, 128], strides = [1, 1]} : vector<128x128xf32> to vector<16x128xf32>
    %c4 = arith.constant 4 : index
    %c0_21 = arith.constant 0 : index
    %c0_22 = arith.constant 0 : index
    %24 = vector.load %arg3[%c4, %c0_21, %c0_22] : memref<8x128x64xf32, #tpu.memory_space<vmem>>, vector<1x128x64xf32>
    %25 = vector.shape_cast %24 : vector<1x128x64xf32> to vector<128x64xf32>
    %cst_23 = arith.constant dense<0.000000e+00> : vector<16x64xf32>
    %26 = tpu.matmul %23, %25, %cst_23 {dimension_numbers = #tpu.dot_dimension_numbers<[1], [0], [0], [1], [0, 0, 1, 1], [], []>} : vector<16x128xf32>, vector<128x64xf32>, vector<16x64xf32> -> vector<16x64xf32>
    %c64 = arith.constant 64 : index
    %c0_24 = arith.constant 0 : index
    %27 = vector.load %arg16[%c64, %c0_24] : memref<128x64xf32, #tpu.memory_space<vmem>>, vector<16x64xf32>
    tpu.vector_store %arg16[%c64, %c0_24], %26 {strides = array<i32>} : memref<128x64xf32, #tpu.memory_space<vmem>>, vector<16x64xf32>,
    %28 = vector.extract_strided_slice %2 {offsets = [80, 0], sizes = [16, 128], strides = [1, 1]} : vector<128x128xf32> to vector<16x128xf32>
    %c5 = arith.constant 5 : index
    %c0_25 = arith.constant 0 : index
    %c0_26 = arith.constant 0 : index
    %29 = vector.load %arg3[%c5, %c0_25, %c0_26] : memref<8x128x64xf32, #tpu.memory_space<vmem>>, vector<1x128x64xf32>
    %30 = vector.shape_cast %29 : vector<1x128x64xf32> to vector<128x64xf32>
    %cst_27 = arith.constant dense<0.000000e+00> : vector<16x64xf32>
    %31 = tpu.matmul %28, %30, %cst_27 {dimension_numbers = #tpu.dot_dimension_numbers<[1], [0], [0], [1], [0, 0, 1, 1], [], []>} : vector<16x128xf32>, vector<128x64xf32>, vector<16x64xf32> -> vector<16x64xf32>
    %c80 = arith.constant 80 : index
    %c0_28 = arith.constant 0 : index
    %32 = vector.load %arg16[%c80, %c0_28] : memref<128x64xf32, #tpu.memory_space<vmem>>, vector<16x64xf32>
    tpu.vector_store %arg16[%c80, %c0_28], %31 {strides = array<i32>} : memref<128x64xf32, #tpu.memory_space<vmem>>, vector<16x64xf32>,
    %33 = vector.extract_strided_slice %2 {offsets = [96, 0], sizes = [16, 128], strides = [1, 1]} : vector<128x128xf32> to vector<16x128xf32>
    %c6 = arith.constant 6 : index
    %c0_29 = arith.constant 0 : index
    %c0_30 = arith.constant 0 : index
    %34 = vector.load %arg3[%c6, %c0_29, %c0_30] : memref<8x128x64xf32, #tpu.memory_space<vmem>>, vector<1x128x64xf32>
    %35 = vector.shape_cast %34 : vector<1x128x64xf32> to vector<128x64xf32>
    %cst_31 = arith.constant dense<0.000000e+00> : vector<16x64xf32>
    %36 = tpu.matmul %33, %35, %cst_31 {dimension_numbers = #tpu.dot_dimension_numbers<[1], [0], [0], [1], [0, 0, 1, 1], [], []>} : vector<16x128xf32>, vector<128x64xf32>, vector<16x64xf32> -> vector<16x64xf32>
    %c96 = arith.constant 96 : index
    %c0_32 = arith.constant 0 : index
    %37 = vector.load %arg16[%c96, %c0_32] : memref<128x64xf32, #tpu.memory_space<vmem>>, vector<16x64xf32>
    tpu.vector_store %arg16[%c96, %c0_32], %36 {strides = array<i32>} : memref<128x64xf32, #tpu.memory_space<vmem>>, vector<16x64xf32>,
    %38 = vector.extract_strided_slice %2 {offsets = [112, 0], sizes = [16, 128], strides = [1, 1]} : vector<128x128xf32> to vector<16x128xf32>
    %c7 = arith.constant 7 : index
    %c0_33 = arith.constant 0 : index
    %c0_34 = arith.constant 0 : index
    %39 = vector.load %arg3[%c7, %c0_33, %c0_34] : memref<8x128x64xf32, #tpu.memory_space<vmem>>, vector<1x128x64xf32>
    %40 = vector.shape_cast %39 : vector<1x128x64xf32> to vector<128x64xf32>
    %cst_35 = arith.constant dense<0.000000e+00> : vector<16x64xf32>
    %41 = tpu.matmul %38, %40, %cst_35 {dimension_numbers = #tpu.dot_dimension_numbers<[1], [0], [0], [1], [0, 0, 1, 1], [], []>} : vector<16x128xf32>, vector<128x64xf32>, vector<16x64xf32> -> vector<16x64xf32>
    %c112 = arith.constant 112 : index
    %c0_36 = arith.constant 0 : index
    %42 = vector.load %arg16[%c112, %c0_36] : memref<128x64xf32, #tpu.memory_space<vmem>>, vector<16x64xf32>
    tpu.vector_store %arg16[%c112, %c0_36], %41 {strides = array<i32>} : memref<128x64xf32, #tpu.memory_space<vmem>>, vector<16x64xf32>,
    %c0_37 = arith.constant 0 : index
    %c0_38 = arith.constant 0 : index
    %43 = vector.load %arg16[%c0_37, %c0_38] : memref<128x64xf32, #tpu.memory_space<vmem>>, vector<128x64xf32>
    %c0_39 = arith.constant 0 : index
    %c0_40 = arith.constant 0 : index
    %44 = vector.load %arg4[%c0_39, %c0_40] : memref<128x1xf32, #tpu.memory_space<vmem>>, vector<128x1xf32>
    %45 = vector.broadcast %44 : vector<128x1xf32> to vector<128x64xf32>
    %46 = arith.addf %43, %45 : vector<128x64xf32>
    %cst_41 = arith.constant 0.000000e+00 : f32
    %47 = vector.broadcast %cst_41 : f32 to vector<128x64xf32>
    %48 = arith.cmpf ogt, %46, %47 : vector<128x64xf32>
    %cst_42 = arith.constant 0.000000e+00 : f32
    %49 = vector.broadcast %cst_42 : f32 to vector<128x64xf32>
    %50 = arith.minimumf %46, %49 : vector<128x64xf32>
    %51 = math.exp %50 : vector<128x64xf32>
    %cst_43 = arith.constant 1.000000e+00 : f32
    %52 = vector.broadcast %cst_43 : f32 to vector<128x64xf32>
    %53 = arith.subf %51, %52 : vector<128x64xf32>
    %54 = arith.select %48, %46, %53 : vector<128x64xi1>, vector<128x64xf32>
    %c0_44 = arith.constant 0 : index
    %c0_45 = arith.constant 0 : index
    %55 = vector.load %arg5[%c0_44, %c0_45] : memref<64x16xf32, #tpu.memory_space<vmem>>, vector<64x16xf32>
    %cst_46 = arith.constant dense<0.000000e+00> : vector<128x16xf32>
    %56 = tpu.matmul %54, %55, %cst_46 {dimension_numbers = #tpu.dot_dimension_numbers<[1], [0], [0], [1], [0, 0, 1, 1], [], []>} : vector<128x64xf32>, vector<64x16xf32>, vector<128x16xf32> -> vector<128x16xf32>
    %c0_47 = arith.constant 0 : index
    %c0_48 = arith.constant 0 : index
    %57 = vector.load %arg6[%c0_47, %c0_48] : memref<128x128xf32, #tpu.memory_space<vmem>>, vector<128x128xf32>
    %cst_49 = arith.constant dense<0.000000e+00> : vector<128x16xf32>
    %58 = tpu.matmul %57, %56, %cst_49 {dimension_numbers = #tpu.dot_dimension_numbers<[1], [0], [0], [1], [0, 0, 1, 1], [], []>} : vector<128x128xf32>, vector<128x16xf32>, vector<128x16xf32> -> vector<128x16xf32>
    %c0_50 = arith.constant 0 : index
    %c0_51 = arith.constant 0 : index
    %59 = vector.load %arg7[%c0_50, %c0_51] : memref<128x1xf32, #tpu.memory_space<vmem>>, vector<128x1xf32>
    %60 = vector.broadcast %59 : vector<128x1xf32> to vector<128x16xf32>
    %61 = arith.addf %58, %60 : vector<128x16xf32>
    %cst_52 = arith.constant 0.000000e+00 : f32
    %62 = vector.broadcast %cst_52 : f32 to vector<128x16xf32>
    %63 = arith.cmpf ogt, %61, %62 : vector<128x16xf32>
    %cst_53 = arith.constant 0.000000e+00 : f32
    %64 = vector.broadcast %cst_53 : f32 to vector<128x16xf32>
    %65 = arith.minimumf %61, %64 : vector<128x16xf32>
    %66 = math.exp %65 : vector<128x16xf32>
    %cst_54 = arith.constant 1.000000e+00 : f32
    %67 = vector.broadcast %cst_54 : f32 to vector<128x16xf32>
    %68 = arith.subf %66, %67 : vector<128x16xf32>
    %69 = arith.select %63, %61, %68 : vector<128x16xi1>, vector<128x16xf32>
    %c0_55 = arith.constant 0 : index
    %c0_56 = arith.constant 0 : index
    %70 = vector.load %arg8[%c0_55, %c0_56] : memref<16x2xf32, #tpu.memory_space<vmem>>, vector<16x2xf32>
    %cst_57 = arith.constant dense<0.000000e+00> : vector<128x2xf32>
    %71 = tpu.matmul %69, %70, %cst_57 {dimension_numbers = #tpu.dot_dimension_numbers<[1], [0], [0], [1], [0, 0, 1, 1], [], []>} : vector<128x16xf32>, vector<16x2xf32>, vector<128x2xf32> -> vector<128x2xf32>
    %c0_58 = arith.constant 0 : index
    %c0_59 = arith.constant 0 : index
    %72 = vector.load %arg15[%c0_58, %c0_59] : memref<128x2xf32, #tpu.memory_space<vmem>>, vector<128x2xf32>
    tpu.vector_store %arg15[%c0_58, %c0_59], %71 {strides = array<i32>} : memref<128x2xf32, #tpu.memory_space<vmem>>, vector<128x2xf32>,
    %c0_60 = arith.constant 0 : index
    %c0_61 = arith.constant 0 : index
    %73 = vector.load %arg9[%c0_60, %c0_61] : memref<2x640xf32, #tpu.memory_space<vmem>>, vector<2x640xf32>
    %cst_62 = arith.constant dense<0.000000e+00> : vector<128x640xf32>
    %74 = tpu.matmul %71, %73, %cst_62 {dimension_numbers = #tpu.dot_dimension_numbers<[1], [0], [0], [1], [0, 0, 1, 1], [], []>} : vector<128x2xf32>, vector<2x640xf32>, vector<128x640xf32> -> vector<128x640xf32>
    %c0_63 = arith.constant 0 : index
    %c0_64 = arith.constant 0 : index
    %75 = vector.load %arg10[%c0_63, %c0_64] : memref<128x640xf32, #tpu.memory_space<vmem>>, vector<128x640xf32>
    %76 = arith.mulf %74, %75 : vector<128x640xf32>
    %c0_65 = arith.constant 0 : index
    %c0_66 = arith.constant 0 : index
    %77 = vector.load %arg11[%c0_65, %c0_66] : memref<8x128xf32, #tpu.memory_space<vmem>>, vector<8x128xf32>
    %cst_67 = arith.constant dense<0.000000e+00> : vector<8x640xf32>
    %78 = tpu.matmul %77, %76, %cst_67 {dimension_numbers = #tpu.dot_dimension_numbers<[1], [0], [0], [1], [0, 0, 1, 1], [], []>} : vector<8x128xf32>, vector<128x640xf32>, vector<8x640xf32> -> vector<8x640xf32>
    %c0_68 = arith.constant 0 : index
    %c0_69 = arith.constant 0 : index
    %79 = vector.load %arg12[%c0_68, %c0_69] : memref<640x40xf32, #tpu.memory_space<vmem>>, vector<640x40xf32>
    %cst_70 = arith.constant dense<0.000000e+00> : vector<8x40xf32>
    %80 = tpu.matmul %78, %79, %cst_70 {dimension_numbers = #tpu.dot_dimension_numbers<[1], [0], [0], [1], [0, 0, 1, 1], [], []>} : vector<8x640xf32>, vector<640x40xf32>, vector<8x40xf32> -> vector<8x40xf32>
    %c0_71 = arith.constant 0 : index
    %c0_72 = arith.constant 0 : index
    %81 = vector.load %arg13[%c0_71, %c0_72] : memref<1x40xf32, #tpu.memory_space<vmem>>, vector<1x40xf32>
    %82 = vector.broadcast %81 : vector<1x40xf32> to vector<8x40xf32>
    %83 = arith.addf %80, %82 : vector<8x40xf32>
    %c0_73 = arith.constant 0 : index
    %c0_74 = arith.constant 0 : index
    %84 = vector.load %arg14[%c0_73, %c0_74] : memref<8x40xf32, #tpu.memory_space<vmem>>, vector<8x40xf32>
    tpu.vector_store %arg14[%c0_73, %c0_74], %83 {strides = array<i32>} : memref<8x40xf32, #tpu.memory_space<vmem>>, vector<8x40xf32>,
    return
  }
  func.func @transform_0(%arg0: i32) -> (i32, i32) {
    %c0_i32 = arith.constant 0 : i32
    %c0_i32_0 = arith.constant 0 : i32
    return %arg0, %c0_i32 : i32, i32
  }
  func.func @transform_1(%arg0: i32) -> (i32, i32) {
    %c0_i32 = arith.constant 0 : i32
    %c0_i32_0 = arith.constant 0 : i32
    %c0_i32_1 = arith.constant 0 : i32
    return %c0_i32, %c0_i32_0 : i32, i32
  }
  func.func @transform_2(%arg0: i32) -> (i32, i32, i32) {
    %c0_i32 = arith.constant 0 : i32
    %c0_i32_0 = arith.constant 0 : i32
    %c0_i32_1 = arith.constant 0 : i32
    %c0_i32_2 = arith.constant 0 : i32
    return %c0_i32, %c0_i32_0, %c0_i32_1 : i32, i32, i32
  }
  func.func @transform_3(%arg0: i32) -> (i32, i32) {
    %c0_i32 = arith.constant 0 : i32
    %c0_i32_0 = arith.constant 0 : i32
    %c0_i32_1 = arith.constant 0 : i32
    return %c0_i32, %c0_i32_0 : i32, i32
  }
  func.func @transform_4(%arg0: i32) -> (i32, i32) {
    %c0_i32 = arith.constant 0 : i32
    %c0_i32_0 = arith.constant 0 : i32
    %c0_i32_1 = arith.constant 0 : i32
    return %c0_i32, %c0_i32_0 : i32, i32
  }
  func.func @transform_5(%arg0: i32) -> (i32, i32) {
    %c0_i32 = arith.constant 0 : i32
    %c0_i32_0 = arith.constant 0 : i32
    %c0_i32_1 = arith.constant 0 : i32
    return %c0_i32, %c0_i32_0 : i32, i32
  }
  func.func @transform_6(%arg0: i32) -> (i32, i32) {
    %c0_i32 = arith.constant 0 : i32
    %c0_i32_0 = arith.constant 0 : i32
    %c0_i32_1 = arith.constant 0 : i32
    return %c0_i32, %c0_i32_0 : i32, i32
  }
  func.func @transform_7(%arg0: i32) -> (i32, i32) {
    %c0_i32 = arith.constant 0 : i32
    %c0_i32_0 = arith.constant 0 : i32
    %c0_i32_1 = arith.constant 0 : i32
    return %c0_i32, %c0_i32_0 : i32, i32
  }
  func.func @transform_8(%arg0: i32) -> (i32, i32) {
    %c0_i32 = arith.constant 0 : i32
    %c0_i32_0 = arith.constant 0 : i32
    %c0_i32_1 = arith.constant 0 : i32
    return %c0_i32, %c0_i32_0 : i32, i32
  }
  func.func @transform_9(%arg0: i32) -> (i32, i32) {
    %c0_i32 = arith.constant 0 : i32
    %c0_i32_0 = arith.constant 0 : i32
    %c0_i32_1 = arith.constant 0 : i32
    return %c0_i32, %c0_i32_0 : i32, i32
  }
  func.func @transform_10(%arg0: i32) -> (i32, i32) {
    %c0_i32 = arith.constant 0 : i32
    %c0_i32_0 = arith.constant 0 : i32
    %c0_i32_1 = arith.constant 0 : i32
    return %c0_i32, %c0_i32_0 : i32, i32
  }
  func.func @transform_11(%arg0: i32) -> (i32, i32) {
    %c0_i32 = arith.constant 0 : i32
    %c0_i32_0 = arith.constant 0 : i32
    %c0_i32_1 = arith.constant 0 : i32
    return %c0_i32, %c0_i32_0 : i32, i32
  }
  func.func @transform_12(%arg0: i32) -> (i32, i32) {
    %c0_i32 = arith.constant 0 : i32
    %c0_i32_0 = arith.constant 0 : i32
    %c0_i32_1 = arith.constant 0 : i32
    return %c0_i32, %c0_i32_0 : i32, i32
  }
  func.func @transform_13(%arg0: i32) -> (i32, i32) {
    %c0_i32 = arith.constant 0 : i32
    %c0_i32_0 = arith.constant 0 : i32
    return %arg0, %c0_i32 : i32, i32
  }
  func.func @transform_14(%arg0: i32) -> (i32, i32) {
    %c0_i32 = arith.constant 0 : i32
    %c0_i32_0 = arith.constant 0 : i32
    return %arg0, %c0_i32 : i32, i32
  }
}

</mosaic_0001>

<bundles_post_ra>
// kernel: tpu_custom_call.1
= control target key start
LH: loop header
LB: loop body
LE: loop exit
PB: predicated region body
PF: predicated region fallthrough
CT: control target
= control target key end

     0   :  { %20 = vsyncpa [#allocation4], 0  ;;  %s8208_s0 = inlined_call_operand.vmem [shape: f32[1536,128], index: 0, kind: input, shape index: {}]   ;;  %s8209_s1 = inlined_call_operand.vmem [shape: f32[128,768], index: 1, kind: input, shape index: {}]   ;;  %s8210_s2 = inlined_call_operand.vmem [shape: f32[8,128,64], index: 2, kind: input, shape index: {}]   ;;  %s8211_s3 = inlined_call_operand.vmem [shape: f32[128,1], index: 3, kind: input, shape index: {}]   ;;  %s8212_s4 = inlined_call_operand.vmem [shape: f32[64,16], index: 4, kind: input, shape index: {}]   ;;  %s8213_s5 = inlined_call_operand.vmem [shape: f32[128,128], index: 5, kind: input, shape index: {}]   ;;  %s8214_s6 = inlined_call_operand.vmem [shape: f32[128,1], index: 6, kind: input, shape index: {}]   ;;  %s8215_s7 = inlined_call_operand.vmem [shape: f32[16,2], index: 7, kind: input, shape index: {}]   ;;  %s8216_s8 = inlined_call_operand.vmem [shape: f32[2,640], index: 8, kind: input, shape index: {}]   ;;  %s8217_s9 = inlined_call_operand.hbm [shape: f32[128,640], index: 9, kind: input, shape index: {}]   ;;  %s8218_s10 = inlined_call_operand.vmem [shape: f32[8,128], index: 10, kind: input, shape index: {}]   ;;  %s8219_s11 = inlined_call_operand.vmem [shape: f32[640,40], index: 11, kind: input, shape index: {}]   ;;  %s8220_s12 = inlined_call_operand.vmem [shape: f32[1,40], index: 12, kind: input, shape index: {}]   ;;  %s8221_s13 = inlined_call_operand.hbm [shape: f32[16,40], index: 13, kind: output, shape index: {0}]   ;;  %s8222_s14 = inlined_call_operand.vmem [shape: f32[256,2], index: 14, kind: output, shape index: {1}]  }
   0x1   :  { %21 = vsyncpa [#allocation5], 0 }
   0x2   :  { %23 = vsyncpa [#allocation5 + $0x1], 0  ;;  %s6435_s29 = smov 0   ;;  %s6437_s30 = smov 0  }
   0x3   :  { %s6439_s15 = smov 0   ;;  %s6441_s16 = smov 0  }
   0x4 LB: > { %8230 = sst [smem:[#allocation9_spill]] %s6345_s15  ;;  %s6456_s17 = sadd.s32 4294967295, %s6349_s16   ;;  %s6349_s16 = sphi %s6441_s16, %s8244_s16   ;;  %s6345_s15 = sphi %s6439_s15, %s8246_s15   ;;  %s6341_s30 = sphi %s6437_s30, %s8248_s30   ;;  %s6337_s29 = sphi %s6435_s29, %s8247_s29  }
   0x5   : > { %s4212_s18 = sadd.s32 4294967294, %s6349_s16   ;;  %s6460_s19 = sadd.s32 1, %s6349_s16  }
   0x6   : > { %8231 = sst [smem:[#allocation10_spill]] %s6460_s19  ;;  %s314_s20 = sadd.s32 1, %s6345_s15 }
   0x7   : > { %s311_s21 = ssub.s32 %s6349_s16, %s6460_s19  ;;  %p324_p0 = scmp.ne.s32.totalorder %s6345_s15, %s6341_s30 }
   0x8   : > { %p312_p1 = scmp.eq.s32.totalorder %s311_s21, 0  ;;  %p325_p2 = scmp.eq.s32.totalorder %s6456_s17, 1 }
   0x9   : > { %p330_p3 = scmp.ne.s32.totalorder %s6341_s30, %s6337_s29  ;;  %p331_p4 = scmp.eq.s32.totalorder %s4212_s18, 1 }
   0xa   : > { %s6471_s22 = scalar_select %p312_p1, %s6345_s15, %s314_s20  }
   0xb   : > { %p6473_p5 = por %p325_p2, %p324_p0  ;;  %p6477_p6 = por %p331_p4, %p330_p3 }
   0xc   : > { %8232 = sst [smem:[#allocation11_spill]] %s6471_s22  ;;  %p4213_p7 = scmp.ge.s32.totalorder %s6349_s16, 1 }
   0xd   : > { %s8233_s23 = scalar_select %p6473_p5, 1, 0 }
   0xe   : > { %s8234_s24 = scalar_select %p6477_p6, 1, 0 }
   0xf   : > { %p364_p8 = scmp.lt.s32.totalorder %s6349_s16, 3  ;;  %p8227_p9 = scmp.eq.s32.totalorder %s6456_s17, 0 }
  0x10   : > { %8235 = sst [smem:[#allocation12_spill]] %s8234_s24  ;;  %s6351_s26 = smov [#allocation3]  }
  0x11   : > { %p6484_p10 = pnand %p4213_p7, %p364_p8  ;;  %s400_s27 = sshll.u32 %s6351_s26, 4  ;;  %s401_s27 = int_to_ptr.vmem [resolvable:$true] %s400_s27 }
  0x12   : > { %s6255_s21 = scalar_lea.hbm %s8217_s9, 10240 }
  0x13   : > { %s8236_s25 = scalar_select %p6484_p10, 1, 0 }
  0x14   : > { %p6138_p11 = pneg %p6484_p10  ;;  %p6256_p13 = scmp.ne.s32.totalorder %s8217_s9, %s6255_s21 }
  0x15   : > { %p6262_p3 = scmp.lt.u32.totalorder %s6255_s21, %s8217_s9 }
  0x16   : > { %p6492_p12 = pnand %p8227_p9, %p6138_p11 }
  0x18   : > { %p6257_p0 = pneg %p6492_p12 }
  0x1a   : > { %p6258_p1 = pnand %p6257_p0, %p6256_p13 }
  0x1c   : > { %p6259_p2 = pneg %p6258_p1 }
  0x1e   : > { %p6264_p4 = pnand %p6262_p3, %p6259_p2 }
  0x20   : > { %6267 = shalt.err (!%p6264_p4)
}
  0x21   : > { %s6268_s24 = scalar_lea.vmem %s401_s27, 10240  ;;  %p6276_p9 = scmp.lt.s32.totalorder %s401_s27, %s401_s27 }
  0x22   : > { %p6269_p7 = scmp.ne.s32.totalorder %s401_s27, %s6268_s24  ;;  %p6277_p6 = scmp.lt.s32.totalorder %s6268_s24, %s6268_s24 }
  0x24   : > { %p6271_p8 = pnand %p6269_p7, %p6257_p0  ;;  %p6278_p5 = por %p6277_p6, %p6276_p9 }
  0x26   : > { %p6272_p11 = pneg %p6271_p8 }
  0x28   : > { %p6279_p10 = pnand %p6278_p5, %p6272_p11 }
  0x2a   : > { %6282 = shalt.err (!%p6279_p10)
}
  0x2b   : > { %s6352_s15 = smov 640   ;;  %s6353_s22 = smov 40  }
  0x2c   : > { %6141 = dma.hbm_to_vmem [thread:$0]  (!%p6492_p12), %s8217_s9, 10240, %s401_s27, [#allocation4], %s6352_s15, %s6352_s15, %s6353_s22  }
  0x2d   : > { %p8238_p13 = scmp.ne.s32.totalorder %s8236_s25, 0 }
  0x2e   : > { %p8239_p1 = scmp.eq.s32.totalorder (!%p8238_p13), %s6456_s17, 0 }
  0x2f   : > { %434 = sbr.rel (%p8238_p13) target bundleno = 2174 (0x87e), region = 72 }
  0x36   : > { %6328 = dma.done.wait (%p8239_p1), [#allocation4], 10240   ;;  %p8240_p0 = pmov %p8239_p1 }
  0x37   : > { %s485_s19 = smul.u32 96, %s6456_s17  ;;  %v498_v0 = vld [vmem:[%s8209_s1 + $0x8] sm:$0xff]  ;;  %v500_v1 = vld [vmem:[%s8209_s1 + $0x18] sm:$0xff]  ;;  %vm1215_vm0 = vcmask 523264   ;;  %s4220_s25 = sshll.u32 %s6456_s17, 4 }
  0x38   : > { %6330 = vsyncadd (%p8240_p0), [#allocation4], 4294957056  ;;  %753 = vmatprep.mubr.f32.mxu0 %v498_v0  ;;  %898 = vmatprep.mubr.f32.mxu1 %v500_v1  ;;  %p492_p6 = scmp.lt.s32.totalorder %s4220_s25, 31  ;;  %p8241_p10 = scmp.ne.s32.totalorder %s8233_s23, 0 }
  0x39   : > { %p486_p5 = scmp.lt.s32.totalorder %s485_s19, 191 }
  0x3a   : > { %s8252_s25 = smov (!%p492_p6, %s4220_s25), 31 }
  0x3b   : > { %s8250_s19 = smov (!%p486_p5, %s485_s19), 191  ;;  %s4221_s22 = sshll.u32 %s8252_s25, 3 }
  0x3c   : > { %s4219_s24 = sshll.u32 %s8250_s19, 3  ;;  %s7703_s19 = scalar_lea.vmem %s8222_s14, %s4221_s22 }
  0x3d   : > { %s6522_s26 = scalar_lea.vmem %s8208_s0, %s4219_s24  ;;  %s4454_s24 = sshll.u32 %s6456_s17, 7 }
  0x3e   : > { %v609_v2 = vld [vmem:[%s6522_s26 + $0x80] sm:$0xff]  ;;  %v610_v3 = vld [vmem:[%s6522_s26 + $0x88] sm:$0xff]  ;;  %v611_v13 = vld [vmem:[%s6522_s26 + $0x90] sm:$0xff]  ;;  %s8166_s25 = scalar_lea.hbm %s8221_s13, %s4454_s24  ;;  %s6359_s17 = smov [#allocation6]  }
  0x3f   : > { %v641_v4 = vld [vmem:[%s6522_s26 + $0x180] sm:$0xff]  ;;  %v5536_v5 = vpack.c.bf16 %v610_v3, %v609_v2  ;;  %v642_v6 = vld [vmem:[%s6522_s26 + $0x188] sm:$0xff]  ;;  %v612_v15 = vld [vmem:[%s6522_s26 + $0x98] sm:$0xff]  ;;  %s6287_s20 = sshll.u32 %s6359_s17, 4  ;;  %s6288_s20 = int_to_ptr.vmem [resolvable:$false] %s6287_s20 }
  0x40   : > { %v593_v7 = vld [vmem:[%s6522_s26] sm:$0xff]  ;;  %v594_v8 = vld [vmem:[%s6522_s26 + $0x8] sm:$0xff]  ;;  %v5568_v9 = vpack.c.bf16 %v642_v6, %v641_v4  ;;  %v643_v16 = vld [vmem:[%s6522_s26 + $0x190] sm:$0xff]  ;;  %v5540_v18 = vpack.c.bf16 %v612_v15, %v611_v13 }
  0x41   : > { %v5538_v10 = vpack.c.bf16 %v594_v8, %v593_v7  ;;  %v625_v11 = vld [vmem:[%s6522_s26 + $0x100] sm:$0xff]  ;;  %v626_v12 = vld [vmem:[%s6522_s26 + $0x108] sm:$0xff]  ;;  %5537 = vmatprep.subr.bf16.mxu0 %v5536_v5  ;;  %v644_v17 = vld [vmem:[%s6522_s26 + $0x198] sm:$0xff] }
  0x42   : > { %v5570_v14 = vpack.c.bf16 %v626_v12, %v625_v11  ;;  %5569 = vmatprep.subr.bf16.mxu1 %v5568_v9  ;;  %v5572_v19 = vpack.c.bf16 %v644_v17, %v643_v16  ;;  %v595_v20 = vld [vmem:[%s6522_s26 + $0x10] sm:$0xff]  ;;  %v596_v21 = vld [vmem:[%s6522_s26 + $0x18] sm:$0xff]  ;;  %v613_v25 = vld [vmem:[%s6522_s26 + $0xa0] sm:$0xff] }
  0x43   : > { %5539 = vmatpush3.bf16.msra.mxu0 %v5538_v10  ;;  %v627_v22 = vld [vmem:[%s6522_s26 + $0x110] sm:$0xff]  ;;  %v5542_v23 = vpack.c.bf16 %v596_v21, %v595_v20  ;;  %v628_v24 = vld [vmem:[%s6522_s26 + $0x118] sm:$0xff]  ;;  %v614_v26 = vld [vmem:[%s6522_s26 + $0xa8] sm:$0xff] }
  0x44   : > { %5571 = vmatpush3.bf16.msra.mxu1 %v5570_v14  ;;  %5541 = vmatprep.subr.bf16.mxu0 %v5540_v18  ;;  %v5574_v27 = vpack.c.bf16 %v628_v24, %v627_v22  ;;  %v5544_v28 = vpack.c.bf16 %v614_v26, %v613_v25  ;;  %v645_v29 = vld [vmem:[%s6522_s26 + $0x1a0] sm:$0xff]  ;;  %v646_v30 = vld [vmem:[%s6522_s26 + $0x1a8] sm:$0xff]  ;;  %v615_v37 = vld [vmem:[%s6522_s26 + $0xb0] sm:$0xff] }
  0x45   : > { %5573 = vmatprep.subr.bf16.mxu1 %v5572_v19  ;;  %v597_v31 = vld [vmem:[%s6522_s26 + $0x20] sm:$0xff]  ;;  %v5576_v32 = vpack.c.bf16 %v646_v30, %v645_v29  ;;  %v598_v33 = vld [vmem:[%s6522_s26 + $0x28] sm:$0xff]  ;;  %v616_v38 = vld [vmem:[%s6522_s26 + $0xb8] sm:$0xff] }
  0x46   : > { %v629_v34 = vld [vmem:[%s6522_s26 + $0x120] sm:$0xff]  ;;  %v630_v35 = vld [vmem:[%s6522_s26 + $0x128] sm:$0xff]  ;;  %v5546_v36 = vpack.c.bf16 %v598_v33, %v597_v31  ;;  %v647_v39 = vld [vmem:[%s6522_s26 + $0x1b0] sm:$0xff]  ;;  %v5548_v41 = vpack.c.bf16 %v616_v38, %v615_v37 }
  0x47   : > { %5543 = vmatpush3.bf16.msra.mxu0 %v5542_v23  ;;  %v5578_v40 = vpack.c.bf16 %v630_v35, %v629_v34  ;;  %v648_v42 = vld [vmem:[%s6522_s26 + $0x1b8] sm:$0xff]  ;;  %v599_v43 = vld [vmem:[%s6522_s26 + $0x30] sm:$0xff]  ;;  %v617_v48 = vld [vmem:[%s6522_s26 + $0xc0] sm:$0xff] }
  0x48   : > { %5575 = vmatpush3.bf16.msra.mxu1 %v5574_v27  ;;  %5545 = vmatprep.subr.bf16.mxu0 %v5544_v28  ;;  %v600_v44 = vld [vmem:[%s6522_s26 + $0x38] sm:$0xff]  ;;  %v5580_v45 = vpack.c.bf16 %v648_v42, %v647_v39  ;;  %v631_v46 = vld [vmem:[%s6522_s26 + $0x130] sm:$0xff]  ;;  %v618_v49 = vld [vmem:[%s6522_s26 + $0xc8] sm:$0xff] }
  0x49   : > { %5577 = vmatprep.subr.bf16.mxu1 %v5576_v32  ;;  %v632_v47 = vld [vmem:[%s6522_s26 + $0x138] sm:$0xff]  ;;  %v649_v50 = vld [vmem:[%s6522_s26 + $0x1c0] sm:$0xff]  ;;  %v650_v51 = vld [vmem:[%s6522_s26 + $0x1c8] sm:$0xff]  ;;  %v5550_v52 = vpack.c.bf16 %v600_v44, %v599_v43  ;;  %v5552_v54 = vpack.c.bf16 %v618_v49, %v617_v48 }
  0x4a   : > { %v5582_v53 = vpack.c.bf16 %v632_v47, %v631_v46  ;;  %v601_v55 = vld [vmem:[%s6522_s26 + $0x40] sm:$0xff]  ;;  %v602_v56 = vld [vmem:[%s6522_s26 + $0x48] sm:$0xff]  ;;  %v5584_v58 = vpack.c.bf16 %v650_v51, %v649_v50  ;;  %v619_v60 = vld [vmem:[%s6522_s26 + $0xd0] sm:$0xff] }
  0x4b   : > { %5547 = vmatpush3.bf16.msra.mxu0 %v5546_v36  ;;  %v633_v57 = vld [vmem:[%s6522_s26 + $0x140] sm:$0xff]  ;;  %v634_v59 = vld [vmem:[%s6522_s26 + $0x148] sm:$0xff]  ;;  %v620_v61 = vld [vmem:[%s6522_s26 + $0xd8] sm:$0xff]  ;;  %v5554_v0 = vpack.c.bf16 %v602_v56, %v601_v55 }
  0x4c   : > { %5579 = vmatpush3.bf16.msra.mxu1 %v5578_v40  ;;  %5549 = vmatprep.subr.bf16.mxu0 %v5548_v41  ;;  %v651_v62 = vld [vmem:[%s6522_s26 + $0x1d0] sm:$0xff]  ;;  %v652_v63 = vld [vmem:[%s6522_s26 + $0x1d8] sm:$0xff]  ;;  %v5586_v1 = vpack.c.bf16 %v634_v59, %v633_v57  ;;  %v5556_v2 = vpack.c.bf16 %v620_v61, %v619_v60  ;;  %v621_v8 = vld [vmem:[%s6522_s26 + $0xe0] sm:$0xff] }
  0x4d   : > { %5581 = vmatprep.subr.bf16.mxu1 %v5580_v45  ;;  %v603_v3 = vld [vmem:[%s6522_s26 + $0x50] sm:$0xff]  ;;  %v604_v4 = vld [vmem:[%s6522_s26 + $0x58] sm:$0xff]  ;;  %v5588_v6 = vpack.c.bf16 %v652_v63, %v651_v62  ;;  %v622_v9 = vld [vmem:[%s6522_s26 + $0xe8] sm:$0xff] }
  0x4e   : > { %v635_v5 = vld [vmem:[%s6522_s26 + $0x150] sm:$0xff]  ;;  %v636_v7 = vld [vmem:[%s6522_s26 + $0x158] sm:$0xff]  ;;  %v653_v10 = vld [vmem:[%s6522_s26 + $0x1e0] sm:$0xff]  ;;  %v5558_v12 = vpack.c.bf16 %v604_v4, %v603_v3  ;;  %v5560_v14 = vpack.c.bf16 %v622_v9, %v621_v8 }
  0x4f   : > { %5551 = vmatpush3.bf16.msra.mxu0 %v5550_v52  ;;  %v654_v11 = vld [vmem:[%s6522_s26 + $0x1e8] sm:$0xff]  ;;  %v5590_v13 = vpack.c.bf16 %v636_v7, %v635_v5  ;;  %v605_v15 = vld [vmem:[%s6522_s26 + $0x60] sm:$0xff]  ;;  %v623_v20 = vld [vmem:[%s6522_s26 + $0xf0] sm:$0xff] }
  0x50   : > { %5583 = vmatpush3.bf16.msra.mxu1 %v5582_v53  ;;  %5553 = vmatprep.subr.bf16.mxu0 %v5552_v54  ;;  %v606_v16 = vld [vmem:[%s6522_s26 + $0x68] sm:$0xff]  ;;  %v637_v17 = vld [vmem:[%s6522_s26 + $0x160] sm:$0xff]  ;;  %v5592_v18 = vpack.c.bf16 %v654_v11, %v653_v10  ;;  %v624_v21 = vld [vmem:[%s6522_s26 + $0xf8] sm:$0xff] }
  0x51   : > { %5585 = vmatprep.subr.bf16.mxu1 %v5584_v58  ;;  %v638_v19 = vld [vmem:[%s6522_s26 + $0x168] sm:$0xff]  ;;  %v655_v22 = vld [vmem:[%s6522_s26 + $0x1f0] sm:$0xff]  ;;  %v656_v23 = vld [vmem:[%s6522_s26 + $0x1f8] sm:$0xff]  ;;  %v5562_v24 = vpack.c.bf16 %v606_v16, %v605_v15  ;;  %v5564_v26 = vpack.c.bf16 %v624_v21, %v623_v20 }
  0x52   : > { %v5594_v25 = vpack.c.bf16 %v638_v19, %v637_v17  ;;  %v607_v27 = vld [vmem:[%s6522_s26 + $0x70] sm:$0xff]  ;;  %v608_v28 = vld [vmem:[%s6522_s26 + $0x78] sm:$0xff]  ;;  %v5596_v30 = vpack.c.bf16 %v656_v23, %v655_v22  ;;  %v673_v32 = vld [vmem:[%s6522_s26 + $0x280] sm:$0xff] }
  0x53   : > { %5555 = vmatpush3.bf16.msra.mxu0 %v5554_v0  ;;  %v639_v29 = vld [vmem:[%s6522_s26 + $0x170] sm:$0xff]  ;;  %v640_v31 = vld [vmem:[%s6522_s26 + $0x178] sm:$0xff]  ;;  %v674_v33 = vld [vmem:[%s6522_s26 + $0x288] sm:$0xff]  ;;  %v5566_v34 = vpack.c.bf16 %v608_v28, %v607_v27 }
  0x54   : > { %5587 = vmatpush3.bf16.msra.mxu1 %v5586_v1  ;;  %5557 = vmatprep.subr.bf16.mxu0 %v5556_v2  ;;  %v5598_v35 = vpack.c.bf16 %v640_v31, %v639_v29  ;;  %v5600_v36 = vpack.c.bf16 %v674_v33, %v673_v32  ;;  %v657_v37 = vld [vmem:[%s6522_s26 + $0x200] sm:$0xff]  ;;  %v658_v38 = vld [vmem:[%s6522_s26 + $0x208] sm:$0xff]  ;;  %v675_v39 = vld [vmem:[%s6522_s26 + $0x290] sm:$0xff] }
  0x55   : > { %5589 = vmatprep.subr.bf16.mxu1 %v5588_v6  ;;  %v676_v40 = vld [vmem:[%s6522_s26 + $0x298] sm:$0xff]  ;;  %v497_v41 = vld [vmem:[%s8209_s1] sm:$0xff]  ;;  %v499_v42 = vld [vmem:[%s8209_s1 + $0x10] sm:$0xff]  ;;  %v5602_v44 = vpack.c.bf16 %v658_v38, %v657_v37 }
  0x56   : > { %v504_v43 = vld [vmem:[%s8209_s1 + $0x38] sm:$0xff]  ;;  %v506_v45 = vld [vmem:[%s8209_s1 + $0x48] sm:$0xff]  ;;  %v5604_v46 = vpack.c.bf16 %v676_v40, %v675_v39  ;;  %v659_v47 = vld [vmem:[%s6522_s26 + $0x210] sm:$0xff] }
  0x57   : > { %5559 = vmatpush3.bf16.msra.mxu0 %v5558_v12  ;;  %v660_v48 = vld [vmem:[%s6522_s26 + $0x218] sm:$0xff]  ;;  %v677_v49 = vld [vmem:[%s6522_s26 + $0x2a0] sm:$0xff]  ;;  %v678_v50 = vld [vmem:[%s6522_s26 + $0x2a8] sm:$0xff] }
  0x58   : > { %5591 = vmatpush3.bf16.msra.mxu1 %v5590_v13  ;;  %5561 = vmatprep.subr.bf16.mxu0 %v5560_v14  ;;  %v503_v51 = vld [vmem:[%s8209_s1 + $0x30] sm:$0xff]  ;;  %v505_v52 = vld [vmem:[%s8209_s1 + $0x40] sm:$0xff]  ;;  %v510_v53 = vld [vmem:[%s8209_s1 + $0x68] sm:$0xff]  ;;  %v5606_v54 = vpack.c.bf16 %v660_v48, %v659_v47  ;;  %v5608_v56 = vpack.c.bf16 %v678_v50, %v677_v49 }
  0x59   : > { %5593 = vmatprep.subr.bf16.mxu1 %v5592_v18  ;;  %v512_v55 = vld [vmem:[%s8209_s1 + $0x78] sm:$0xff]  ;;  %v661_v57 = vld [vmem:[%s6522_s26 + $0x220] sm:$0xff]  ;;  %v662_v58 = vld [vmem:[%s6522_s26 + $0x228] sm:$0xff] }
  0x5a   : > { %v679_v59 = vld [vmem:[%s6522_s26 + $0x2b0] sm:$0xff]  ;;  %v680_v60 = vld [vmem:[%s6522_s26 + $0x2b8] sm:$0xff]  ;;  %v509_v61 = vld [vmem:[%s8209_s1 + $0x60] sm:$0xff]  ;;  %v5610_v0 = vpack.c.bf16 %v662_v58, %v661_v57 }
  0x5b   : > { %5563 = vmatpush3.bf16.msra.mxu0 %v5562_v24  ;;  %v511_v62 = vld [vmem:[%s8209_s1 + $0x70] sm:$0xff]  ;;  %v516_v63 = vld [vmem:[%s8209_s1 + $0x98] sm:$0xff]  ;;  %v518_v1 = vld [vmem:[%s8209_s1 + $0xa8] sm:$0xff]  ;;  %v5612_v2 = vpack.c.bf16 %v680_v60, %v679_v59 }
  0x5c   : > { %5595 = vmatpush3.bf16.msra.mxu1 %v5594_v25  ;;  %5565 = vmatprep.subr.bf16.mxu0 %v5564_v26  ;;  %v663_v3 = vld [vmem:[%s6522_s26 + $0x230] sm:$0xff]  ;;  %v664_v4 = vld [vmem:[%s6522_s26 + $0x238] sm:$0xff]  ;;  %v681_v5 = vld [vmem:[%s6522_s26 + $0x2c0] sm:$0xff] }
  0x5d   : > { %5597 = vmatprep.subr.bf16.mxu1 %v5596_v30  ;;  %v682_v6 = vld [vmem:[%s6522_s26 + $0x2c8] sm:$0xff]  ;;  %v515_v7 = vld [vmem:[%s8209_s1 + $0x90] sm:$0xff]  ;;  %v517_v8 = vld [vmem:[%s8209_s1 + $0xa0] sm:$0xff]  ;;  %v5614_v10 = vpack.c.bf16 %v664_v4, %v663_v3 }
  0x5e   : > { %v522_v9 = vld [vmem:[%s8209_s1 + $0xc8] sm:$0xff]  ;;  %v524_v11 = vld [vmem:[%s8209_s1 + $0xd8] sm:$0xff]  ;;  %v5616_v12 = vpack.c.bf16 %v682_v6, %v681_v5  ;;  %v665_v13 = vld [vmem:[%s6522_s26 + $0x240] sm:$0xff] }
  0x5f   : > { %5567 = vmatpush3.bf16.msra.mxu0 %v5566_v34  ;;  %v666_v14 = vld [vmem:[%s6522_s26 + $0x248] sm:$0xff]  ;;  %v683_v15 = vld [vmem:[%s6522_s26 + $0x2d0] sm:$0xff]  ;;  %v684_v16 = vld [vmem:[%s6522_s26 + $0x2d8] sm:$0xff] }
  0x60   : > { %5599 = vmatpush3.bf16.msra.mxu1 %v5598_v35  ;;  %5601 = vmatprep.subr.bf16.mxu0 %v5600_v36  ;;  %v521_v17 = vld [vmem:[%s8209_s1 + $0xc0] sm:$0xff]  ;;  %v523_v18 = vld [vmem:[%s8209_s1 + $0xd0] sm:$0xff]  ;;  %v528_v19 = vld [vmem:[%s8209_s1 + $0xf8] sm:$0xff]  ;;  %v5618_v20 = vpack.c.bf16 %v666_v14, %v665_v13  ;;  %v5620_v22 = vpack.c.bf16 %v684_v16, %v683_v15 }
  0x61   : > { %v530_v21 = vld [vmem:[%s8209_s1 + $0x108] sm:$0xff]  ;;  %v667_v23 = vld [vmem:[%s6522_s26 + $0x250] sm:$0xff]  ;;  %v668_v24 = vld [vmem:[%s6522_s26 + $0x258] sm:$0xff] }
  0x62   : > { %754 = vmatmul.mubr.f32.vlgmr.msra.gmra.mrb[0].mxu0 %v497_v41  ;;  %v685_v25 = vld [vmem:[%s6522_s26 + $0x2e0] sm:$0xff]  ;;  %v686_v26 = vld [vmem:[%s6522_s26 + $0x2e8] sm:$0xff]  ;;  %v527_v27 = vld [vmem:[%s8209_s1 + $0xf0] sm:$0xff]  ;;  %v5622_v30 = vpack.c.bf16 %v668_v24, %v667_v23 }
  0x63   : > { %899 = vmatmul.mubr.f32.vlgmr.msra.gmra.mrb[0].mxu1 %v499_v42  ;;  %758 = vmatprep.mubr.f32.mxu0 %v504_v43  ;;  %v529_v28 = vld [vmem:[%s8209_s1 + $0x100] sm:$0xff]  ;;  %v534_v29 = vld [vmem:[%s8209_s1 + $0x128] sm:$0xff]  ;;  %v536_v31 = vld [vmem:[%s8209_s1 + $0x138] sm:$0xff]  ;;  %v5624_v32 = vpack.c.bf16 %v686_v26, %v685_v25 }
  0x64   : > { %903 = vmatprep.mubr.f32.mxu1 %v506_v45  ;;  %5603 = vmatpush3.bf16.msra.mxu0 %v5602_v44  ;;  %v669_v33 = vld [vmem:[%s6522_s26 + $0x260] sm:$0xff]  ;;  %v670_v34 = vld [vmem:[%s6522_s26 + $0x268] sm:$0xff]  ;;  %v687_v35 = vld [vmem:[%s6522_s26 + $0x2f0] sm:$0xff] }
  0x65   : > { %5605 = vmatprep.subr.bf16.mxu0 %v5604_v46  ;;  %v688_v36 = vld [vmem:[%s6522_s26 + $0x2f8] sm:$0xff]  ;;  %v533_v37 = vld [vmem:[%s8209_s1 + $0x120] sm:$0xff]  ;;  %v535_v38 = vld [vmem:[%s8209_s1 + $0x130] sm:$0xff]  ;;  %v5626_v40 = vpack.c.bf16 %v670_v34, %v669_v33 }
  0x66   : > { %759 = vmatmul.mubr.f32.gmra.mrb[2].mxu0 %v503_v51  ;;  %v540_v39 = vld [vmem:[%s8209_s1 + $0x158] sm:$0xff]  ;;  %v542_v41 = vld [vmem:[%s8209_s1 + $0x168] sm:$0xff]  ;;  %v5628_v42 = vpack.c.bf16 %v688_v36, %v687_v35  ;;  %v671_v43 = vld [vmem:[%s6522_s26 + $0x270] sm:$0xff] }
  0x67   : > { %904 = vmatmul.mubr.f32.gmra.mrb[2].mxu1 %v505_v52  ;;  %763 = vmatprep.mubr.f32.mxu0 %v510_v53  ;;  %v672_v44 = vld [vmem:[%s6522_s26 + $0x278] sm:$0xff]  ;;  %v539_v45 = vld [vmem:[%s8209_s1 + $0x150] sm:$0xff]  ;;  %v541_v46 = vld [vmem:[%s8209_s1 + $0x160] sm:$0xff] }
  0x68   : > { %908 = vmatprep.mubr.f32.mxu1 %v512_v55  ;;  %5607 = vmatpush3.bf16.msra.mxu0 %v5606_v54  ;;  %v546_v47 = vld [vmem:[%s8209_s1 + $0x188] sm:$0xff]  ;;  %v5630_v48 = vpack.c.bf16 %v672_v44, %v671_v43  ;;  %v548_v49 = vld [vmem:[%s8209_s1 + $0x198] sm:$0xff]  ;;  %v545_v50 = vld [vmem:[%s8209_s1 + $0x180] sm:$0xff] }
  0x69   : > { %5609 = vmatprep.subr.bf16.mxu0 %v5608_v56  ;;  %v547_v51 = vld [vmem:[%s8209_s1 + $0x190] sm:$0xff]  ;;  %v552_v52 = vld [vmem:[%s8209_s1 + $0x1b8] sm:$0xff]  ;;  %v554_v53 = vld [vmem:[%s8209_s1 + $0x1c8] sm:$0xff] }
  0x6a   : > { %764 = vmatmul.mubr.f32.gmra.mrb[4].mxu0 %v509_v61  ;;  %v551_v54 = vld [vmem:[%s8209_s1 + $0x1b0] sm:$0xff]  ;;  %v553_v55 = vld [vmem:[%s8209_s1 + $0x1c0] sm:$0xff]  ;;  %v558_v56 = vld [vmem:[%s8209_s1 + $0x1e8] sm:$0xff] }
  0x6b   : > { %909 = vmatmul.mubr.f32.gmra.mrb[4].mxu1 %v511_v62  ;;  %768 = vmatprep.mubr.f32.mxu0 %v516_v63  ;;  %v560_v57 = vld [vmem:[%s8209_s1 + $0x1f8] sm:$0xff]  ;;  %v557_v58 = vld [vmem:[%s8209_s1 + $0x1e0] sm:$0xff]  ;;  %v559_v59 = vld [vmem:[%s8209_s1 + $0x1f0] sm:$0xff] }
  0x6c   : > { %913 = vmatprep.mubr.f32.mxu1 %v518_v1  ;;  %5611 = vmatpush3.bf16.msra.mxu0 %v5610_v0  ;;  %v564_v60 = vld [vmem:[%s8209_s1 + $0x218] sm:$0xff]  ;;  %v566_v61 = vld [vmem:[%s8209_s1 + $0x228] sm:$0xff]  ;;  %v563_v62 = vld [vmem:[%s8209_s1 + $0x210] sm:$0xff] }
  0x6d   : > { %5613 = vmatprep.subr.bf16.mxu0 %v5612_v2  ;;  %v565_v63 = vld [vmem:[%s8209_s1 + $0x220] sm:$0xff]  ;;  %v570_v0 = vld [vmem:[%s8209_s1 + $0x248] sm:$0xff]  ;;  %v572_v1 = vld [vmem:[%s8209_s1 + $0x258] sm:$0xff] }
  0x6e   : > { %769 = vmatmul.mubr.f32.gmra.mrb[6].mxu0 %v515_v7  ;;  %v569_v2 = vld [vmem:[%s8209_s1 + $0x240] sm:$0xff]  ;;  %v571_v3 = vld [vmem:[%s8209_s1 + $0x250] sm:$0xff]  ;;  %v576_v4 = vld [vmem:[%s8209_s1 + $0x278] sm:$0xff] }
  0x6f   : > { %914 = vmatmul.mubr.f32.gmra.mrb[6].mxu1 %v517_v8  ;;  %773 = vmatprep.mubr.f32.mxu0 %v522_v9  ;;  %v578_v5 = vld [vmem:[%s8209_s1 + $0x288] sm:$0xff]  ;;  %v575_v6 = vld [vmem:[%s8209_s1 + $0x270] sm:$0xff]  ;;  %v577_v7 = vld [vmem:[%s8209_s1 + $0x280] sm:$0xff] }
  0x70   : > { %918 = vmatprep.mubr.f32.mxu1 %v524_v11  ;;  %5615 = vmatpush3.bf16.msra.mxu0 %v5614_v10  ;;  %v582_v8 = vld [vmem:[%s8209_s1 + $0x2a8] sm:$0xff]  ;;  %v584_v9 = vld [vmem:[%s8209_s1 + $0x2b8] sm:$0xff]  ;;  %v581_v10 = vld [vmem:[%s8209_s1 + $0x2a0] sm:$0xff] }
  0x71   : > { %5617 = vmatprep.subr.bf16.mxu0 %v5616_v12  ;;  %v583_v11 = vld [vmem:[%s8209_s1 + $0x2b0] sm:$0xff]  ;;  %v588_v12 = vld [vmem:[%s8209_s1 + $0x2d8] sm:$0xff]  ;;  %v590_v13 = vld [vmem:[%s8209_s1 + $0x2e8] sm:$0xff] }
  0x72   : > { %774 = vmatmul.mubr.f32.gmra.mrb[8].mxu0 %v521_v17  ;;  %v587_v14 = vld [vmem:[%s8209_s1 + $0x2d0] sm:$0xff]  ;;  %v589_v15 = vld [vmem:[%s8209_s1 + $0x2e0] sm:$0xff]  ;;  %v502_v16 = vld [vmem:[%s8209_s1 + $0x28] sm:$0xff] }
  0x73   : > { %919 = vmatmul.mubr.f32.gmra.mrb[8].mxu1 %v523_v18  ;;  %778 = vmatprep.mubr.f32.mxu0 %v528_v19  ;;  %v501_v17 = vld [vmem:[%s8209_s1 + $0x20] sm:$0xff]  ;;  %v508_v18 = vld [vmem:[%s8209_s1 + $0x58] sm:$0xff]  ;;  %v507_v19 = vld [vmem:[%s8209_s1 + $0x50] sm:$0xff] }
  0x74   : > { %923 = vmatprep.mubr.f32.mxu1 %v530_v21  ;;  %5619 = vmatpush3.bf16.msra.mxu0 %v5618_v20  ;;  %v514_v20 = vld [vmem:[%s8209_s1 + $0x88] sm:$0xff]  ;;  %v513_v21 = vld [vmem:[%s8209_s1 + $0x80] sm:$0xff]  ;;  %v519_v23 = vld [vmem:[%s8209_s1 + $0xb0] sm:$0xff] }
  0x75   : > { %5621 = vmatprep.subr.bf16.mxu0 %v5620_v22  ;;  %v520_v22 = vld [vmem:[%s8209_s1 + $0xb8] sm:$0xff]  ;;  %v526_v24 = vld [vmem:[%s8209_s1 + $0xe8] sm:$0xff]  ;;  %v525_v25 = vld [vmem:[%s8209_s1 + $0xe0] sm:$0xff] }
  0x76   : > { %779 = vmatmul.mubr.f32.gmra.mrb[10].mxu0 %v527_v27  ;;  %v532_v26 = vld [vmem:[%s8209_s1 + $0x118] sm:$0xff]  ;;  %v531_v27 = vld [vmem:[%s8209_s1 + $0x110] sm:$0xff]  ;;  %v549_v33 = vld [vmem:[%s8209_s1 + $0x1a0] sm:$0xff] }
  0x77   : > { %924 = vmatmul.mubr.f32.gmra.mrb[10].mxu1 %v529_v28  ;;  %783 = vmatprep.mubr.f32.mxu0 %v534_v29  ;;  %v538_v28 = vld [vmem:[%s8209_s1 + $0x148] sm:$0xff]  ;;  %v537_v29 = vld [vmem:[%s8209_s1 + $0x140] sm:$0xff]  ;;  %v556_v34 = vld [vmem:[%s8209_s1 + $0x1d8] sm:$0xff] }
  0x78   : > { %928 = vmatprep.mubr.f32.mxu1 %v536_v31  ;;  %5623 = vmatpush3.bf16.msra.mxu0 %v5622_v30  ;;  %v544_v30 = vld [vmem:[%s8209_s1 + $0x178] sm:$0xff]  ;;  %v543_v31 = vld [vmem:[%s8209_s1 + $0x170] sm:$0xff]  ;;  %v562_v36 = vld [vmem:[%s8209_s1 + $0x208] sm:$0xff] }
  0x79   : > { %5625 = vmatprep.subr.bf16.mxu0 %v5624_v32  ;;  %v550_v32 = vld [vmem:[%s8209_s1 + $0x1a8] sm:$0xff]  ;;  %v555_v35 = vld [vmem:[%s8209_s1 + $0x1d0] sm:$0xff] }
  0x7a   : > { %784 = vmatmul.mubr.f32.gmra.mrb[12].mxu0 %v533_v37  ;;  %v1124_v37 = vld [vmem:[%s8210_s2] sm:$0xff]  ;;  %v574_v43 = vld [vmem:[%s8209_s1 + $0x268] sm:$0xff]  ;;  %v1126_v44 = vld [vmem:[%s8210_s2 + $0x10] sm:$0xff] }
  0x7b   : > { %929 = vmatmul.mubr.f32.gmra.mrb[12].mxu1 %v535_v38  ;;  %788 = vmatprep.mubr.f32.mxu0 %v540_v39  ;;  %v1125_v38 = vld [vmem:[%s8210_s2 + $0x8] sm:$0xff]  ;;  %v561_v39 = vld [vmem:[%s8209_s1 + $0x200] sm:$0xff] }
  0x7c   : > { %933 = vmatprep.mubr.f32.mxu1 %v542_v41  ;;  %5627 = vmatpush3.bf16.msra.mxu0 %v5626_v40  ;;  %v5632_v40 = vpack.c.bf16 %v1125_v38, %v1124_v37  ;;  %v568_v41 = vld [vmem:[%s8209_s1 + $0x238] sm:$0xff] }
  0x7d   : > { %5629 = vmatprep.subr.bf16.mxu0 %v5628_v42  ;;  %v567_v42 = vld [vmem:[%s8209_s1 + $0x230] sm:$0xff] }
  0x7e   : > { %789 = vmatmul.mubr.f32.gmra.mrb[14].mxu0 %v539_v45  ;;  %5633 = vmatprep.subr.bf16.mxu1 %v5632_v40  ;;  %v1127_v45 = vld [vmem:[%s8210_s2 + $0x18] sm:$0xff] }
  0x7f   : > { %934 = vmatmul.mubr.f32.gmra.mrb[14].mxu1 %v541_v46  ;;  %793 = vmatprep.mubr.f32.mxu0 %v546_v47  ;;  %v573_v46 = vld [vmem:[%s8209_s1 + $0x260] sm:$0xff]  ;;  %v5636_v47 = vpack.c.bf16 %v1127_v45, %v1126_v44 }
  0x80   : > { %938 = vmatprep.mubr.f32.mxu1 %v548_v49  ;;  %5631 = vmatpush3.bf16.msra.mxu0 %v5630_v48  ;;  %v580_v48 = vld [vmem:[%s8209_s1 + $0x298] sm:$0xff]  ;;  %v579_v49 = vld [vmem:[%s8209_s1 + $0x290] sm:$0xff] }
  0x81   : > { %5635 = vmatpush3.bf16.msra.mxu1 %v5632_v40 }
  0x82   : > { %794 = vmatmul.mubr.f32.gmra.mrb[16].mxu0 %v545_v50  ;;  %5637 = vmatprep.subr.bf16.mxu1 %v5636_v47  ;;  %v586_v50 = vld [vmem:[%s8209_s1 + $0x2c8] sm:$0xff] }
  0x83   : > { %939 = vmatmul.mubr.f32.gmra.mrb[16].mxu1 %v547_v51  ;;  %798 = vmatprep.mubr.f32.mxu0 %v552_v52  ;;  %v1128_v51 = vld [vmem:[%s8210_s2 + $0x20] sm:$0xff]  ;;  %v1129_v52 = vld [vmem:[%s8210_s2 + $0x28] sm:$0xff] }
  0x84   : > { %943 = vmatprep.mubr.f32.mxu1 %v554_v53  ;;  %v585_v53 = vld [vmem:[%s8209_s1 + $0x2c0] sm:$0xff] }
  0x85   : > { %5639 = vmatpush3.bf16.msra.mxu1 %v5636_v47 }
  0x86   : > { %799 = vmatmul.mubr.f32.gmra.mrb[18].mxu0 %v551_v54  ;;  %v5640_v54 = vpack.c.bf16 %v1129_v52, %v1128_v51 }
  0x87   : > { %944 = vmatmul.mubr.f32.gmra.mrb[18].mxu1 %v553_v55  ;;  %803 = vmatprep.mubr.f32.mxu0 %v558_v56  ;;  %v592_v55 = vld [vmem:[%s8209_s1 + $0x2f8] sm:$0xff]  ;;  %v591_v56 = vld [vmem:[%s8209_s1 + $0x2f0] sm:$0xff] }
  0x88   : > { %948 = vmatprep.mubr.f32.mxu1 %v560_v57  ;;  %5641 = vmatprep.subr.bf16.mxu1 %v5640_v54  ;;  %v1130_v57 = vld [vmem:[%s8210_s2 + $0x30] sm:$0xff] }
  0x89   : > { %5643 = vmatpush3.bf16.msra.mxu1 %v5640_v54 }
  0x8a   : > { %804 = vmatmul.mubr.f32.gmra.mrb[20].mxu0 %v557_v58  ;;  %v1131_v58 = vld [vmem:[%s8210_s2 + $0x38] sm:$0xff] }
  0x8b   : > { %949 = vmatmul.mubr.f32.gmra.mrb[20].mxu1 %v559_v59  ;;  %808 = vmatprep.mubr.f32.mxu0 %v564_v60  ;;  %v5644_v59 = vpack.c.bf16 %v1131_v58, %v1130_v57  ;;  %v1132_v60 = vld [vmem:[%s8210_s2 + $0x40] sm:$0xff] }
  0x8c   : > { %953 = vmatprep.mubr.f32.mxu1 %v566_v61  ;;  %v1133_v61 = vld [vmem:[%s8210_s2 + $0x48] sm:$0xff] }
  0x8d   : > { %5645 = vmatprep.subr.bf16.mxu1 %v5644_v59 }
  0x8e   : > { %809 = vmatmul.mubr.f32.gmra.mrb[22].mxu0 %v563_v62  ;;  %5647 = vmatpush3.bf16.msra.mxu1 %v5644_v59  ;;  %v5648_v62 = vpack.c.bf16 %v1133_v61, %v1132_v60 }
  0x8f   : > { %954 = vmatmul.mubr.f32.gmra.mrb[22].mxu1 %v565_v63  ;;  %813 = vmatprep.mubr.f32.mxu0 %v570_v0  ;;  %v4238_v63 = vld [vmem:[%s8210_s2 + $0x100] sm:$0xff]  ;;  %v4239_v0 = vld [vmem:[%s8210_s2 + $0x108] sm:$0xff] }
  0x90   : > { %958 = vmatprep.mubr.f32.mxu1 %v572_v1  ;;  %5649 = vmatprep.subr.bf16.mxu1 %v5648_v62  ;;  %v5696_v1 = vpack.c.bf16 %v4239_v0, %v4238_v63 }
  0x92   : > { %814 = vmatmul.mubr.f32.gmra.mrb[24].mxu0 %v569_v2  ;;  %5651 = vmatpush3.bf16.msra.mxu1 %v5648_v62  ;;  %v1134_v2 = vld [vmem:[%s8210_s2 + $0x50] sm:$0xff] }
  0x93   : > { %959 = vmatmul.mubr.f32.gmra.mrb[24].mxu1 %v571_v3  ;;  %818 = vmatprep.mubr.f32.mxu0 %v576_v4  ;;  %v1135_v3 = vld [vmem:[%s8210_s2 + $0x58] sm:$0xff] }
  0x94   : > { %963 = vmatprep.mubr.f32.mxu1 %v578_v5  ;;  %v5652_v4 = vpack.c.bf16 %v1135_v3, %v1134_v2  ;;  %5697 = vmatprep.subr.bf16.mxu0 %v5696_v1  ;;  %v4240_v5 = vld [vmem:[%s8210_s2 + $0x110] sm:$0xff] }
  0x96   : > { %819 = vmatmul.mubr.f32.gmra.mrb[26].mxu0 %v575_v6  ;;  %v4241_v6 = vld [vmem:[%s8210_s2 + $0x118] sm:$0xff]  ;;  %5653 = vmatprep.subr.bf16.mxu1 %v5652_v4 }
  0x97   : > { %964 = vmatmul.mubr.f32.gmra.mrb[26].mxu1 %v577_v7  ;;  %823 = vmatprep.mubr.f32.mxu0 %v582_v8  ;;  %v5700_v7 = vpack.c.bf16 %v4241_v6, %v4240_v5  ;;  %v1136_v8 = vld [vmem:[%s8210_s2 + $0x60] sm:$0xff] }
  0x98   : > { %968 = vmatprep.mubr.f32.mxu1 %v584_v9  ;;  %5655 = vmatpush3.bf16.msra.mxu1 %v5652_v4  ;;  %v1137_v9 = vld [vmem:[%s8210_s2 + $0x68] sm:$0xff] }
  0x9a   : > { %824 = vmatmul.mubr.f32.gmra.mrb[28].mxu0 %v581_v10  ;;  %v4242_v10 = vld [vmem:[%s8210_s2 + $0x120] sm:$0xff] }
  0x9b   : > { %969 = vmatmul.mubr.f32.gmra.mrb[28].mxu1 %v583_v11  ;;  %828 = vmatprep.mubr.f32.mxu0 %v588_v12  ;;  %v5656_v11 = vpack.c.bf16 %v1137_v9, %v1136_v8  ;;  %v4243_v12 = vld [vmem:[%s8210_s2 + $0x128] sm:$0xff] }
  0x9c   : > { %973 = vmatprep.mubr.f32.mxu1 %v590_v13  ;;  %v5704_v13 = vpack.c.bf16 %v4243_v12, %v4242_v10 }
  0x9d   : > { %5657 = vmatprep.subr.bf16.mxu1 %v5656_v11 }
  0x9e   : > { %829 = vmatmul.mubr.f32.gmra.mrb[30].mxu0 %v587_v14  ;;  %5659 = vmatpush3.bf16.msra.mxu1 %v5656_v11  ;;  %v1138_v14 = vld [vmem:[%s8210_s2 + $0x70] sm:$0xff] }
  0x9f   : > { %974 = vmatmul.mubr.f32.gmra.mrb[30].mxu1 %v589_v15  ;;  %1043 = vmatprep.mubr.f32.mxu0 %v502_v16  ;;  %v1139_v15 = vld [vmem:[%s8210_s2 + $0x78] sm:$0xff]  ;;  %v4244_v16 = vld [vmem:[%s8210_s2 + $0x130] sm:$0xff] }
  0xa2   : > { %1044 = vmatmul.mubr.f32.vlgmr.msra.gmra.mrb[32].mxu0 %v501_v17  ;;  %v5660_v17 = vpack.c.bf16 %v1139_v15, %v1138_v14 }
  0xa3   : > { %1048 = vmatprep.mubr.f32.mxu0 %v508_v18  ;;  %5699 = vmatpush3.bf16.msra.mxu0 %v5696_v1  ;;  %v4245_v18 = vld [vmem:[%s8210_s2 + $0x138] sm:$0xff] }
  0xa4   : > { %5701 = vmatprep.subr.bf16.mxu0 %v5700_v7  ;;  %5661 = vmatprep.subr.bf16.mxu1 %v5660_v17 }
  0xa5   : > { %5663 = vmatpush3.bf16.msra.mxu1 %v5660_v17 }
  0xa6   : > { %1049 = vmatmul.mubr.f32.gmra.mrb[34].mxu0 %v507_v19  ;;  %v5708_v19 = vpack.c.bf16 %v4245_v18, %v4244_v16 }
  0xa7   : > { %1053 = vmatprep.mubr.f32.mxu0 %v514_v20  ;;  %5703 = vmatpush3.bf16.msra.mxu0 %v5700_v7  ;;  %v4222_v20 = vld [vmem:[%s8210_s2 + $0x80] sm:$0xff] }
  0xa8   : > { %5705 = vmatprep.subr.bf16.mxu0 %v5704_v13 }
  0xaa   : > { %1054 = vmatmul.mubr.f32.gmra.mrb[36].mxu0 %v513_v21  ;;  %v4223_v21 = vld [vmem:[%s8210_s2 + $0x88] sm:$0xff] }
  0xab   : > { %1058 = vmatprep.mubr.f32.mxu0 %v520_v22  ;;  %5707 = vmatpush3.bf16.msra.mxu0 %v5704_v13  ;;  %v4246_v22 = vld [vmem:[%s8210_s2 + $0x140] sm:$0xff] }
  0xac   : > { %5709 = vmatprep.subr.bf16.mxu0 %v5708_v19 }
  0xae   : > { %1059 = vmatmul.mubr.f32.gmra.mrb[38].mxu0 %v519_v23  ;;  %v6989_v23 = vpack.c.bf16 %v4223_v21, %v4222_v20 }
  0xaf   : > { %1063 = vmatprep.mubr.f32.mxu0 %v526_v24  ;;  %5711 = vmatpush3.bf16.msra.mxu0 %v5708_v19  ;;  %v4247_v24 = vld [vmem:[%s8210_s2 + $0x148] sm:$0xff] }
  0xb0   : > { %5665 = vmatprep.subr.bf16.mxu1 %v6989_v23 }
  0xb2   : > { %1064 = vmatmul.mubr.f32.gmra.mrb[40].mxu0 %v525_v25  ;;  %v5712_v25 = vpack.c.bf16 %v4247_v24, %v4246_v22 }
  0xb3   : > { %1068 = vmatprep.mubr.f32.mxu0 %v532_v26  ;;  %v4248_v26 = vld [vmem:[%s8210_s2 + $0x150] sm:$0xff] }
  0xb4   : > { %5713 = vmatprep.subr.bf16.mxu0 %v5712_v25 }
  0xb5   : > { %5715 = vmatpush3.bf16.msra.mxu0 %v5712_v25 }
  0xb6   : > { %1069 = vmatmul.mubr.f32.gmra.mrb[42].mxu0 %v531_v27  ;;  %v4249_v27 = vld [vmem:[%s8210_s2 + $0x158] sm:$0xff] }
  0xb7   : > { %1073 = vmatprep.mubr.f32.mxu0 %v538_v28  ;;  %v5716_v28 = vpack.c.bf16 %v4249_v27, %v4248_v26 }
  0xb9   : > { %5717 = vmatprep.subr.bf16.mxu0 %v5716_v28 }
  0xba   : > { %1074 = vmatmul.mubr.f32.gmra.mrb[44].mxu0 %v537_v29  ;;  %v4250_v29 = vld [vmem:[%s8210_s2 + $0x160] sm:$0xff] }
  0xbb   : > { %1078 = vmatprep.mubr.f32.mxu0 %v544_v30  ;;  %5719 = vmatpush3.bf16.msra.mxu0 %v5716_v28  ;;  %v4251_v30 = vld [vmem:[%s8210_s2 + $0x168] sm:$0xff] }
  0xbe   : > { %1079 = vmatmul.mubr.f32.gmra.mrb[46].mxu0 %v543_v31  ;;  %v5720_v31 = vpack.c.bf16 %v4251_v30, %v4250_v29 }
  0xbf   : > { %1083 = vmatprep.mubr.f32.mxu0 %v550_v32  ;;  %v4252_v32 = vld [vmem:[%s8210_s2 + $0x170] sm:$0xff] }
  0xc0   : > { %5721 = vmatprep.subr.bf16.mxu0 %v5720_v31 }
  0xc1   : > { %5723 = vmatpush3.bf16.msra.mxu0 %v5720_v31  ;;  %v6354_v31 = vmov 0  }
  0xc2   : > { %1084 = vmatmul.mubr.f32.gmra.mrb[48].mxu0 %v549_v33  ;;  %v4253_v33 = vld [vmem:[%s8210_s2 + $0x178] sm:$0xff]  ;;  %6189 = vset.pattern.permute.xlu0 %v6354_v31 }
  0xc3   : > { %1088 = vmatprep.mubr.f32.mxu0 %v556_v34  ;;  %v5724_v34 = vpack.c.bf16 %v4253_v33, %v4252_v32  ;;  %v1892_v32 = vld [vmem:[%s8211_s3] sm:$0xff]  ;;  %6190 = vset.pattern.permute.xlu1 %v6354_v31 }
  0xc4   : > { %1910 = vperm.xlu0 %6189, %v1892_v32  }
  0xc5   : > { %5725 = vmatprep.subr.bf16.mxu0 %v5724_v34 }
  0xc6   : > { %1089 = vmatmul.mubr.f32.gmra.mrb[50].mxu0 %v555_v35  ;;  %v4270_v35 = vld [vmem:[%s8210_s2 + $0x200] sm:$0xff] }
  0xc7   : > { %1093 = vmatprep.mubr.f32.mxu0 %v562_v36  ;;  %5727 = vmatpush3.bf16.msra.mxu0 %v5724_v34  ;;  %v4271_v36 = vld [vmem:[%s8210_s2 + $0x208] sm:$0xff] }
  0xc8   : > { %v7019_v37 = vpack.c.bf16 %v4271_v36, %v4270_v35 }
  0xca   : > { %1094 = vmatmul.mubr.f32.gmra.mrb[52].mxu0 %v561_v39  ;;  %5761 = vmatprep.subr.bf16.mxu0 %v7019_v37 }
  0xcb   : > { %1098 = vmatprep.mubr.f32.mxu0 %v568_v41 }
  0xce   : > { %1099 = vmatmul.mubr.f32.gmra.mrb[54].mxu0 %v567_v42 }
  0xcf   : > { %1103 = vmatprep.mubr.f32.mxu0 %v574_v43 }
  0xd2   : > { %1104 = vmatmul.mubr.f32.gmra.mrb[56].mxu0 %v573_v46 }
  0xd3   : > { %1108 = vmatprep.mubr.f32.mxu0 %v580_v48 }
  0xd6   : > { %1109 = vmatmul.mubr.f32.gmra.mrb[58].mxu0 %v579_v49 }
  0xd7   : > { %1113 = vmatprep.mubr.f32.mxu0 %v586_v50 }
  0xda   : > { %1114 = vmatmul.mubr.f32.gmra.mrb[60].mxu0 %v585_v53 }
  0xdb   : > { %1118 = vmatprep.mubr.f32.mxu0 %v592_v55 }
  0xde   : > { %1119 = vmatmul.mubr.f32.gmra.mrb[62].mxu0 %v591_v56 }
 0x135   : > { %v4489_v38 = vpop.f32.mrb[0].mxu0 }
 0x136   : > { %v4569_v39 = vpop.f32.mrb[0].mxu1  ;;  %v4490_v40 = vpop.f32.mrb[1].mxu0 }
 0x137   : > { %v4491_v41 = vadd.f32 %v4490_v40, %v4489_v38  ;;  %v4570_v42 = vpop.f32.mrb[1].mxu1 }
 0x138   : > { %v4571_v43 = vadd.f32 %v4570_v42, %v4569_v39 }
 0x139   : > { %v4492_v44 = vpop.f32.mrb[2].mxu0 }
 0x13a   : > { %v7022_v45 = vadd.f32 %v4571_v43, %v4491_v41  ;;  %v4572_v46 = vpop.f32.mrb[2].mxu1  ;;  %v4493_v47 = vpop.f32.mrb[3].mxu0  ;;  %v1893_v41 = vld [vmem:[%s8211_s3 + $0x8] sm:$0xff] }
 0x13b   : > { %v4494_v48 = vadd.f32 %v4493_v47, %v4492_v44  ;;  %v4573_v49 = vpop.f32.mrb[3].mxu1  ;;  %1915 = vperm.xlu0 %6189, %v1893_v41  }
 0x13c   : > { %v4574_v50 = vadd.f32 %v4573_v49, %v4572_v46 }
 0x13d   : > { %v4495_v51 = vpop.f32.mrb[4].mxu0 }
 0x13e   : > { %v7024_v52 = vadd.f32 %v4574_v50, %v4494_v48  ;;  %v4575_v53 = vpop.f32.mrb[4].mxu1  ;;  %v4496_v54 = vpop.f32.mrb[5].mxu0 }
 0x13f   : > { %v4497_v55 = vadd.f32 %v4496_v54, %v4495_v51  ;;  %v4576_v56 = vpop.f32.mrb[5].mxu1 }
 0x140   : > { %v4577_v57 = vadd.f32 %v4576_v56, %v4575_v53 }
 0x141   : > { %v4498_v58 = vpop.f32.mrb[6].mxu0 }
 0x142   : > { %v7026_v59 = vadd.f32 %v4577_v57, %v4497_v55  ;;  %v4578_v60 = vpop.f32.mrb[6].mxu1  ;;  %v4499_v61 = vpop.f32.mrb[7].mxu0 }
 0x143   : > { %v4500_v62 = vadd.f32 %v4499_v61, %v4498_v58  ;;  %v4579_v63 = vpop.f32.mrb[7].mxu1  ;;  %v1894_v58 = vld [vmem:[%s8211_s3 + $0x10] sm:$0xff] }
 0x144   : > { %v4580_v0 = vadd.f32 %v4579_v63, %v4578_v60  ;;  %1920 = vperm.xlu1 %6190, %v1894_v58   ;;  %v4227_v58 = vld [vmem:[%s8210_s2 + $0xa8] sm:$0xff] }
 0x145   : > { %v4501_v1 = vpop.f32.mrb[8].mxu0 }
 0x146   : > { %v7028_v2 = vadd.f32 %v4580_v0, %v4500_v62  ;;  %v4581_v3 = vpop.f32.mrb[8].mxu1  ;;  %v4502_v4 = vpop.f32.mrb[9].mxu0 }
 0x147   : > { %v4503_v5 = vadd.f32 %v4502_v4, %v4501_v1  ;;  %v4582_v6 = vpop.f32.mrb[9].mxu1  ;;  %v1895_v4 = vld [vmem:[%s8211_s3 + $0x18] sm:$0xff] }
 0x148   : > { %v4583_v7 = vadd.f32 %v4582_v6, %v4581_v3  ;;  %1925 = vperm.xlu1 %6190, %v1895_v4  }
 0x149   : > { %v4504_v8 = vpop.f32.mrb[10].mxu0 }
 0x14a   : > { %v7030_v9 = vadd.f32 %v4583_v7, %v4503_v5  ;;  %v4584_v10 = vpop.f32.mrb[10].mxu1  ;;  %v4505_v11 = vpop.f32.mrb[11].mxu0 }
 0x14b   : > { %v4506_v12 = vadd.f32 %v4505_v11, %v4504_v8  ;;  %v4585_v13 = vpop.f32.mrb[11].mxu1 }
 0x14c   : > { %v4586_v14 = vadd.f32 %v4585_v13, %v4584_v10  ;;  %v1897_v13 = vld [vmem:[%s8211_s3 + $0x28] sm:$0xff] }
 0x14d   : > { %v4507_v15 = vpop.f32.mrb[12].mxu0  ;;  %1935 = vperm.xlu1 %6190, %v1897_v13  }
 0x14e   : > { %v7032_v16 = vadd.f32 %v4586_v14, %v4506_v12  ;;  %v4587_v17 = vpop.f32.mrb[12].mxu1  ;;  %v4508_v18 = vpop.f32.mrb[13].mxu0 }
 0x14f   : > { %v4509_v19 = vadd.f32 %v4508_v18, %v4507_v15  ;;  %v4588_v20 = vpop.f32.mrb[13].mxu1 }
 0x150   : > { %v4589_v21 = vadd.f32 %v4588_v20, %v4587_v17 }
 0x151   : > { %v4510_v22 = vpop.f32.mrb[14].mxu0 }
 0x152   : > { %v7034_v24 = vadd.f32 %v4589_v21, %v4509_v19  ;;  %v4590_v25 = vpop.f32.mrb[14].mxu1  ;;  %v4511_v26 = vpop.f32.mrb[15].mxu0  ;;  %v1896_v21 = vld [vmem:[%s8211_s3 + $0x20] sm:$0xff] }
 0x153   : > { %v4512_v27 = vadd.f32 %v4511_v26, %v4510_v22  ;;  %v4591_v28 = vpop.f32.mrb[15].mxu1  ;;  %1930 = vperm.xlu0 %6189, %v1896_v21  }
 0x154   : > { %v4592_v29 = vadd.f32 %v4591_v28, %v4590_v25 }
 0x155   : > { %v4513_v30 = vpop.f32.mrb[16].mxu0 }
 0x156   : > { %v7039_v33 = vadd.f32 %v4592_v29, %v4512_v27  ;;  %v4593_v34 = vpop.f32.mrb[16].mxu1  ;;  %v4514_v35 = vpop.f32.mrb[17].mxu0 }
 0x157   : > { %v4515_v36 = vadd.f32 %v4514_v35, %v4513_v30  ;;  %v4594_v38 = vpop.f32.mrb[17].mxu1 }
 0x158   : > { %v4595_v39 = vadd.f32 %v4594_v38, %v4593_v34 }
 0x159   : > { %v4516_v40 = vpop.f32.mrb[18].mxu0 }
 0x15a   : > { %v7044_v42 = vadd.f32 %v4595_v39, %v4515_v36  ;;  %v4596_v43 = vpop.f32.mrb[18].mxu1  ;;  %v4517_v44 = vpop.f32.mrb[19].mxu0 }
 0x15b   : > { %v4518_v46 = vadd.f32 %v4517_v44, %v4516_v40  ;;  %v4597_v47 = vpop.f32.mrb[19].mxu1 }
 0x15c   : > { %v4598_v48 = vadd.f32 %v4597_v47, %v4596_v43 }
 0x15d   : > { %v4519_v49 = vpop.f32.mrb[20].mxu0 }
 0x15e   : > { %v7046_v50 = vadd.f32 %v4598_v48, %v4518_v46  ;;  %v4599_v51 = vpop.f32.mrb[20].mxu1  ;;  %v4520_v53 = vpop.f32.mrb[21].mxu0 }
 0x15f   : > { %v4521_v54 = vadd.f32 %v4520_v53, %v4519_v49  ;;  %v4600_v55 = vpop.f32.mrb[21].mxu1  ;;  %v4224_v49 = vld [vmem:[%s8210_s2 + $0x90] sm:$0xff] }
 0x160   : > { %v4601_v56 = vadd.f32 %v4600_v55, %v4599_v51  ;;  %v4225_v51 = vld [vmem:[%s8210_s2 + $0x98] sm:$0xff] }
 0x161   : > { %v4522_v57 = vpop.f32.mrb[22].mxu0 }
 0x162   : > { %v7051_v60 = vadd.f32 %v4601_v56, %v4521_v54  ;;  %v4602_v61 = vpop.f32.mrb[22].mxu1  ;;  %v4523_v62 = vpop.f32.mrb[23].mxu0  ;;  %v5668_v56 = vpack.c.bf16 %v4225_v51, %v4224_v49 }
 0x163   : > { %v4524_v63 = vadd.f32 %v4523_v62, %v4522_v57  ;;  %v4603_v0 = vpop.f32.mrb[23].mxu1  ;;  %v1899_v62 = vld [vmem:[%s8211_s3 + $0x38] sm:$0xff] }
 0x164   : > { %v4604_v1 = vadd.f32 %v4603_v0, %v4602_v61  ;;  %1945 = vperm.xlu1 %6190, %v1899_v62  }
 0x165   : > { %v4525_v3 = vpop.f32.mrb[24].mxu0 }
 0x166   : > { %v7056_v5 = vadd.f32 %v4604_v1, %v4524_v63  ;;  %v4605_v6 = vpop.f32.mrb[24].mxu1  ;;  %v4526_v7 = vpop.f32.mrb[25].mxu0 }
 0x167   : > { %v4527_v8 = vadd.f32 %v4526_v7, %v4525_v3  ;;  %v4606_v10 = vpop.f32.mrb[25].mxu1  ;;  %v1901_v3 = vld [vmem:[%s8211_s3 + $0x48] sm:$0xff] }
 0x168   : > { %v4607_v11 = vadd.f32 %v4606_v10, %v4605_v6  ;;  %v4228_v6 = vld [vmem:[%s8210_s2 + $0xb0] sm:$0xff]  ;;  %1955 = vperm.xlu1 %6190, %v1901_v3  }
 0x169   : > { %v4528_v12 = vpop.f32.mrb[26].mxu0 }
 0x16a   : > { %v7061_v14 = vadd.f32 %v4607_v11, %v4527_v8  ;;  %v4608_v15 = vpop.f32.mrb[26].mxu1  ;;  %v4529_v17 = vpop.f32.mrb[27].mxu0 }
 0x16b   : > { %v4530_v18 = vadd.f32 %v4529_v17, %v4528_v12  ;;  %v4609_v19 = vpop.f32.mrb[27].mxu1  ;;  %v1903_v12 = vld [vmem:[%s8211_s3 + $0x58] sm:$0xff]  ;;  %v4231_v17 = vld [vmem:[%s8210_s2 + $0xc8] sm:$0xff] }
 0x16c   : > { %v4610_v20 = vadd.f32 %v4609_v19, %v4608_v15  ;;  %v4230_v15 = vld [vmem:[%s8210_s2 + $0xc0] sm:$0xff]  ;;  %1965 = vperm.xlu1 %6190, %v1903_v12  }
 0x16d   : > { %v4531_v22 = vpop.f32.mrb[28].mxu0  ;;  %v5680_v21 = vpack.c.bf16 %v4231_v17, %v4230_v15  ;;  %v4256_v17 = vld [vmem:[%s8210_s2 + $0x190] sm:$0xff] }
 0x16e   : > { %v7066_v25 = vadd.f32 %v4610_v20, %v4530_v18  ;;  %v4611_v26 = vpop.f32.mrb[28].mxu1  ;;  %v4532_v27 = vpop.f32.mrb[29].mxu0 }
 0x16f   : > { %v4533_v28 = vadd.f32 %v4532_v27, %v4531_v22  ;;  %v4612_v29 = vpop.f32.mrb[29].mxu1  ;;  %v4232_v22 = vld [vmem:[%s8210_s2 + $0xd0] sm:$0xff]  ;;  %v1905_v27 = vld [vmem:[%s8211_s3 + $0x68] sm:$0xff] }
 0x170   : > { %v4613_v30 = vadd.f32 %v4612_v29, %v4611_v26  ;;  %v4233_v26 = vld [vmem:[%s8210_s2 + $0xd8] sm:$0xff]  ;;  %1975 = vperm.xlu1 %6190, %v1905_v27  }
 0x171   : > { %v4534_v31 = vpop.f32.mrb[30].mxu0  ;;  %v4273_v29 = vld [vmem:[%s8210_s2 + $0x218] sm:$0xff] }
 0x172   : > { %v7068_v32 = vadd.f32 %v4613_v30, %v4533_v28  ;;  %v4614_v34 = vpop.f32.mrb[30].mxu1  ;;  %v4535_v35 = vpop.f32.mrb[31].mxu0  ;;  %v1904_v30 = vld [vmem:[%s8211_s3 + $0x60] sm:$0xff] }
 0x173   : > { %v4536_v36 = vadd.f32 %v4535_v35, %v4534_v31  ;;  %v4615_v38 = vpop.f32.mrb[31].mxu1 }
 0x174   : > { %v4616_v39 = vadd.f32 %v4615_v38, %v4614_v34 }
 0x175   : > { %v4649_v40 = vpop.f32.mrb[32].mxu0 }
 0x176   : > { %v7070_v41 = vadd.f32 %v4616_v39, %v4536_v36  ;;  %v4650_v43 = vpop.f32.mrb[33].mxu0  ;;  %v5684_v36 = vpack.c.bf16 %v4233_v26, %v4232_v22  ;;  %v4234_v39 = vld [vmem:[%s8210_s2 + $0xe0] sm:$0xff] }
 0x177   : > { %v4651_v44 = vadd.f32 %v4650_v43, %v4649_v40  ;;  %v4235_v43 = vld [vmem:[%s8210_s2 + $0xe8] sm:$0xff] }
 0x179   : > { %v1046_v46 = vadd.f32 %v4651_v44, %v7022_v45  ;;  %v4652_v47 = vpop.f32.mrb[34].mxu0  ;;  %v4226_v45 = vld [vmem:[%s8210_s2 + $0xa0] sm:$0xff] }
 0x17a   : > { %v4653_v48 = vpop.f32.mrb[35].mxu0  ;;  %v5672_v1 = vpack.c.bf16 %v4227_v58, %v4226_v45  ;;  %v4274_v44 = vld [vmem:[%s8210_s2 + $0x220] sm:$0xff] }
 0x17b   : > { %v4654_v53 = vadd.f32 %v4653_v48, %v4652_v47  ;;  %5068 = vmatprep.mubr.f32.mxu1 %v1046_v46  ;;  %v1906_v47 = vld [vmem:[%s8211_s3 + $0x70] sm:$0xff]  ;;  %v1907_v48 = vld [vmem:[%s8211_s3 + $0x78] sm:$0xff]  ;;  %v2317_v58 = vld [vmem:[%s8214_s6] sm:$0xff] }
 0x17c   : > { %1985 = vperm.xlu1 %6190, %v1907_v48   ;;  %v2325_v48 = vld [vmem:[%s8214_s6 + $0x40] sm:$0xff] }
 0x17d   : > { %v1051_v54 = vadd.f32 %v4654_v53, %v7024_v52  ;;  %v4655_v55 = vpop.f32.mrb[36].mxu0  ;;  %v1898_v52 = vld [vmem:[%s8211_s3 + $0x30] sm:$0xff]  ;;  %v5688_v53 = vpack.c.bf16 %v4235_v43, %v4234_v39 }
 0x17e   : > { %v4656_v57 = vpop.f32.mrb[37].mxu0  ;;  %1940 = vperm.xlu0 %6189, %v1898_v52  }
 0x17f   : > { %v4657_v61 = vadd.f32 %v4656_v57, %v4655_v55  ;;  %5069 = vmatmul.mubr.f32.vlgmr.msra.gmra.mrb[32].mxu1 %v1051_v54  ;;  %v4236_v55 = vld [vmem:[%s8210_s2 + $0xf0] sm:$0xff]  ;;  %v4237_v57 = vld [vmem:[%s8210_s2 + $0xf8] sm:$0xff] }
 0x180   : > { %5667 = vmatpush3.bf16.msra.mxu1 %v6989_v23  ;;  %v4229_v23 = vld [vmem:[%s8210_s2 + $0xb8] sm:$0xff] }
 0x181   : > { %v1056_v63 = vadd.f32 %v4657_v61, %v7026_v59  ;;  %v4658_v0 = vpop.f32.mrb[38].mxu0  ;;  %5669 = vmatprep.subr.bf16.mxu1 %v5668_v56  ;;  %v1900_v59 = vld [vmem:[%s8211_s3 + $0x40] sm:$0xff]  ;;  %v5676_v11 = vpack.c.bf16 %v4229_v23, %v4228_v6  ;;  %v2318_v61 = vld [vmem:[%s8214_s6 + $0x8] sm:$0xff] }
 0x182   : > { %v4659_v4 = vpop.f32.mrb[39].mxu0  ;;  %1950 = vperm.xlu0 %6189, %v1900_v59   ;;  %v4278_v6 = vld [vmem:[%s8210_s2 + $0x240] sm:$0xff]  ;;  %2340 = vperm.xlu1 %6190, %v2318_v61   ;;  %v2319_v59 = vld [vmem:[%s8214_s6 + $0x10] sm:$0xff]  ;;  %v2328_v61 = vld [vmem:[%s8214_s6 + $0x58] sm:$0xff] }
 0x183   : > { %v4660_v7 = vadd.f32 %v4659_v4, %v4658_v0  ;;  %5103 = vmatprep.mubr.f32.mxu1 %v1056_v63  ;;  %v5692_v63 = vpack.c.bf16 %v4237_v57, %v4236_v55  ;;  %v4255_v4 = vld [vmem:[%s8210_s2 + $0x188] sm:$0xff]  ;;  %v4262_v57 = vld [vmem:[%s8210_s2 + $0x1c0] sm:$0xff] }
 0x184   : > { %5671 = vmatpush3.bf16.msra.mxu1 %v5668_v56 }
 0x185   : > { %v7107_v8 = vadd.f32 %v4660_v7, %v7028_v2  ;;  %v4661_v10 = vpop.f32.mrb[40].mxu0  ;;  %5673 = vmatprep.subr.bf16.mxu1 %v5672_v1  ;;  %v1902_v2 = vld [vmem:[%s8211_s3 + $0x50] sm:$0xff]  ;;  %v2320_v7 = vld [vmem:[%s8214_s6 + $0x18] sm:$0xff] }
 0x186   : > { %v4662_v13 = vpop.f32.mrb[41].mxu0  ;;  %1960 = vperm.xlu0 %6189, %v1902_v2   ;;  %v4257_v2 = vld [vmem:[%s8210_s2 + $0x198] sm:$0xff]  ;;  %2350 = vperm.xlu1 %6190, %v2320_v7   ;;  %v2330_v7 = vld [vmem:[%s8214_s6 + $0x68] sm:$0xff] }
 0x187   : > { %v4663_v18 = vadd.f32 %v4662_v13, %v4661_v10  ;;  %v5732_v27 = vpack.c.bf16 %v4257_v2, %v4256_v17  ;;  %v4266_v17 = vld [vmem:[%s8210_s2 + $0x1e0] sm:$0xff]  ;;  %v4267_v2 = vld [vmem:[%s8210_s2 + $0x1e8] sm:$0xff] }
 0x188   : > { %5675 = vmatpush3.bf16.msra.mxu1 %v5672_v1  ;;  %v4254_v1 = vld [vmem:[%s8210_s2 + $0x180] sm:$0xff] }
 0x189   : > { %v1066_v19 = vadd.f32 %v4663_v18, %v7030_v9  ;;  %v4664_v20 = vpop.f32.mrb[42].mxu0  ;;  %5677 = vmatprep.subr.bf16.mxu1 %v5676_v11  ;;  %v4272_v9 = vld [vmem:[%s8210_s2 + $0x210] sm:$0xff]  ;;  %v5728_v12 = vpack.c.bf16 %v4255_v4, %v4254_v1 }
 0x18a   : > { %v4665_v28 = vpop.f32.mrb[43].mxu0  ;;  %v5764_v38 = vpack.c.bf16 %v4273_v29, %v4272_v9  ;;  %1970 = vperm.xlu0 %6189, %v1904_v30   ;;  %v4280_v18 = vld [vmem:[%s8210_s2 + $0x250] sm:$0xff]  ;;  %v4258_v29 = vld [vmem:[%s8210_s2 + $0x1a0] sm:$0xff]  ;;  %v4259_v30 = vld [vmem:[%s8210_s2 + $0x1a8] sm:$0xff] }
 0x18b   : > { %v4666_v31 = vadd.f32 %v4665_v28, %v4664_v20  ;;  %5138 = vmatprep.mubr.f32.mxu0 %v1066_v19  ;;  %v4281_v19 = vld [vmem:[%s8210_s2 + $0x258] sm:$0xff]  ;;  %v2321_v20 = vld [vmem:[%s8214_s6 + $0x20] sm:$0xff]  ;;  %v5736_v39 = vpack.c.bf16 %v4259_v30, %v4258_v29  ;;  %v4264_v4 = vld [vmem:[%s8210_s2 + $0x1d0] sm:$0xff] }
 0x18c   : > { %5679 = vmatpush3.bf16.msra.mxu1 %v5676_v11  ;;  %v5780_v9 = vpack.c.bf16 %v4281_v19, %v4280_v18  ;;  %v2331_v19 = vld [vmem:[%s8214_s6 + $0x70] sm:$0xff]  ;;  %v4269_v29 = vld [vmem:[%s8210_s2 + $0x1f8] sm:$0xff] }
 0x18d   : > { %v1071_v34 = vadd.f32 %v4666_v31, %v7032_v16  ;;  %v4667_v35 = vpop.f32.mrb[44].mxu0  ;;  %5681 = vmatprep.subr.bf16.mxu1 %v5680_v21  ;;  %v4275_v16 = vld [vmem:[%s8210_s2 + $0x228] sm:$0xff] }
 0x18e   : > { %v4668_v40 = vpop.f32.mrb[45].mxu0  ;;  %v5768_v54 = vpack.c.bf16 %v4275_v16, %v4274_v44  ;;  %1980 = vperm.xlu0 %6189, %v1906_v47   ;;  %v4260_v44 = vld [vmem:[%s8210_s2 + $0x1b0] sm:$0xff]  ;;  %v4261_v16 = vld [vmem:[%s8210_s2 + $0x1b8] sm:$0xff] }
 0x18f   : > { %v4669_v46 = vadd.f32 %v4668_v40, %v4667_v35  ;;  %5139 = vmatmul.mubr.f32.vlgmr.msra.gmra.mrb[64].mxu0 %v1071_v34  ;;  %v4283_v34 = vld [vmem:[%s8210_s2 + $0x268] sm:$0xff]  ;;  %v2323_v35 = vld [vmem:[%s8214_s6 + $0x30] sm:$0xff]  ;;  %v4285_v47 = vld [vmem:[%s8210_s2 + $0x278] sm:$0xff] }
 0x190   : > { %5683 = vmatpush3.bf16.msra.mxu1 %v5680_v21  ;;  %5763 = vmatpush3.bf16.msra.mxu0 %v7019_v37  ;;  %v4276_v37 = vld [vmem:[%s8210_s2 + $0x230] sm:$0xff]  ;;  %v2322_v21 = vld [vmem:[%s8214_s6 + $0x28] sm:$0xff] }
 0x191   : > { %v7161_v49 = vadd.f32 %v4669_v46, %v7034_v24  ;;  %v4670_v51 = vpop.f32.mrb[46].mxu0  ;;  %5685 = vmatprep.subr.bf16.mxu1 %v5684_v36  ;;  %5765 = vmatprep.subr.bf16.mxu0 %v5764_v38  ;;  %v4277_v24 = vld [vmem:[%s8210_s2 + $0x238] sm:$0xff] }
 0x192   : > { %v4671_v56 = vpop.f32.mrb[47].mxu0  ;;  %v5772_v0 = vpack.c.bf16 %v4277_v24, %v4276_v37  ;;  %2335 = vperm.xlu0 %6189, %v2317_v58   ;;  %2360 = vperm.xlu1 %6190, %v2322_v21   ;;  %v4263_v37 = vld [vmem:[%s8210_s2 + $0x1c8] sm:$0xff]  ;;  %v2327_v58 = vld [vmem:[%s8214_s6 + $0x50] sm:$0xff] }
 0x193   : > { %v4672_v45 = vadd.f32 %v4671_v56, %v4670_v51 }
 0x194   : > { %5687 = vmatpush3.bf16.msra.mxu1 %v5684_v36  ;;  %5767 = vmatpush3.bf16.msra.mxu0 %v5764_v38  ;;  %v2324_v36 = vld [vmem:[%s8214_s6 + $0x38] sm:$0xff] }
 0x195   : > { %v7182_v62 = vadd.f32 %v4672_v45, %v7039_v33  ;;  %v4673_v52 = vpop.f32.mrb[48].mxu0  ;;  %5689 = vmatprep.subr.bf16.mxu1 %v5688_v53  ;;  %5769 = vmatprep.subr.bf16.mxu0 %v5768_v54  ;;  %v4279_v33 = vld [vmem:[%s8210_s2 + $0x248] sm:$0xff] }
 0x196   : > { %v4674_v3 = vpop.f32.mrb[49].mxu0  ;;  %v5776_v13 = vpack.c.bf16 %v4279_v33, %v4278_v6  ;;  %2345 = vperm.xlu0 %6189, %v2319_v59   ;;  %2370 = vperm.xlu1 %6190, %v2324_v36   ;;  %v4303_v45 = vld [vmem:[%s8210_s2 + $0x308] sm:$0xff]  ;;  %v4265_v6 = vld [vmem:[%s8210_s2 + $0x1d8] sm:$0xff]  ;;  %v2329_v59 = vld [vmem:[%s8214_s6 + $0x60] sm:$0xff] }
 0x197   : > { %v4675_v23 = vadd.f32 %v4674_v3, %v4673_v52  ;;  %v4286_v36 = vld [vmem:[%s8210_s2 + $0x280] sm:$0xff] }
 0x198   : > { %5691 = vmatpush3.bf16.msra.mxu1 %v5688_v53  ;;  %5771 = vmatpush3.bf16.msra.mxu0 %v5768_v54  ;;  %v5740_v54 = vpack.c.bf16 %v4261_v16, %v4260_v44  ;;  %v4288_v44 = vld [vmem:[%s8210_s2 + $0x290] sm:$0xff]  ;;  %v4289_v16 = vld [vmem:[%s8210_s2 + $0x298] sm:$0xff] }
 0x199   : > { %v1086_v10 = vadd.f32 %v4675_v23, %v7044_v42  ;;  %v4676_v11 = vpop.f32.mrb[50].mxu0  ;;  %5693 = vmatprep.subr.bf16.mxu1 %v5692_v63  ;;  %5773 = vmatprep.subr.bf16.mxu0 %v5772_v0  ;;  %v4305_v23 = vld [vmem:[%s8210_s2 + $0x318] sm:$0xff] }
 0x19a   : > { %v4677_v15 = vpop.f32.mrb[51].mxu0  ;;  %2355 = vperm.xlu0 %6189, %v2321_v20   ;;  %v2332_v20 = vld [vmem:[%s8214_s6 + $0x78] sm:$0xff] }
 0x19b   : > { %v4678_v42 = vadd.f32 %v4677_v15, %v4676_v11  ;;  %5208 = vmatprep.mubr.f32.mxu0 %v1086_v10 }
 0x19c   : > { %5695 = vmatpush3.bf16.msra.mxu1 %v5692_v63  ;;  %5775 = vmatpush3.bf16.msra.mxu0 %v5772_v0  ;;  %v5744_v0 = vpack.c.bf16 %v4263_v37, %v4262_v57  ;;  %v4293_v37 = vld [vmem:[%s8210_s2 + $0x2b8] sm:$0xff] }
 0x19d   : > { %v7222_v22 = vadd.f32 %v4678_v42, %v7046_v50  ;;  %v4679_v26 = vpop.f32.mrb[52].mxu0  ;;  %5729 = vmatprep.subr.bf16.mxu1 %v5728_v12  ;;  %5777 = vmatprep.subr.bf16.mxu0 %v5776_v13  ;;  %v4282_v50 = vld [vmem:[%s8210_s2 + $0x260] sm:$0xff]  ;;  %v4307_v42 = vld [vmem:[%s8210_s2 + $0x328] sm:$0xff] }
 0x19e   : > { %v4680_v28 = vpop.f32.mrb[53].mxu0  ;;  %v5784_v43 = vpack.c.bf16 %v4283_v34, %v4282_v50  ;;  %2365 = vperm.xlu0 %6189, %v2323_v35  }
 0x19f   : > { %v4681_v31 = vadd.f32 %v4680_v28, %v4679_v26  ;;  %5104 = vmatmul.mubr.f32.vlgmr.msra.gmra.mrb[34].mxu1 %v7107_v8 }
 0x1a0   : > { %5731 = vmatpush3.bf16.msra.mxu1 %v5728_v12  ;;  %5173 = vmatprep.mubr.f32.mxu1 %v7161_v49  ;;  %v2326_v49 = vld [vmem:[%s8214_s6 + $0x48] sm:$0xff] }
 0x1a1   : > { %v7245_v8 = vadd.f32 %v4681_v31, %v7051_v60  ;;  %5779 = vmatpush3.bf16.msra.mxu0 %v5776_v13  ;;  %v4682_v38 = vpop.f32.mrb[54].mxu0  ;;  %5733 = vmatprep.subr.bf16.mxu1 %v5732_v27  ;;  %v4284_v60 = vld [vmem:[%s8210_s2 + $0x270] sm:$0xff]  ;;  %v5748_v13 = vpack.c.bf16 %v4265_v6, %v4264_v4  ;;  %v4309_v31 = vld [vmem:[%s8210_s2 + $0x338] sm:$0xff]  ;;  %v4299_v4 = vld [vmem:[%s8210_s2 + $0x2e8] sm:$0xff] }
 0x1a2   : > { %v4683_v40 = vpop.f32.mrb[55].mxu0  ;;  %5781 = vmatprep.subr.bf16.mxu0 %v5780_v9  ;;  %v5788_v56 = vpack.c.bf16 %v4285_v47, %v4284_v60  ;;  %2375 = vperm.xlu0 %6189, %v2325_v48   ;;  %v4313_v60 = vld [vmem:[%s8210_s2 + $0x358] sm:$0xff]  ;;  %v5796_v47 = vpack.c.bf16 %v4289_v16, %v4288_v44  ;;  %v4332_v44 = vld [vmem:[%s8210_s2 + $0x3f0] sm:$0xff] }
 0x1a3   : > { %v4684_v46 = vadd.f32 %v4683_v40, %v4682_v38  ;;  %2380 = vperm.xlu1 %6190, %v2326_v49   ;;  %v4287_v38 = vld [vmem:[%s8210_s2 + $0x288] sm:$0xff]  ;;  %v4290_v49 = vld [vmem:[%s8210_s2 + $0x2a0] sm:$0xff]  ;;  %v4333_v16 = vld [vmem:[%s8210_s2 + $0x3f8] sm:$0xff] }
 0x1a4   : > { %5735 = vmatpush3.bf16.msra.mxu1 %v5732_v27  ;;  %v5752_v27 = vpack.c.bf16 %v4267_v2, %v4266_v17  ;;  %v5792_v40 = vpack.c.bf16 %v4287_v38, %v4286_v36  ;;  %v4323_v17 = vld [vmem:[%s8210_s2 + $0x3a8] sm:$0xff]  ;;  %v2100_v2 = vld [vmem:[%s8212_s4] sm:$0xff]  ;;  %v2107_v36 = vld [vmem:[%s8212_s4 + $0x38] sm:$0xff] }
 0x1a5   : > { %v7266_v51 = vadd.f32 %v4684_v46, %v7056_v5  ;;  %5783 = vmatpush3.bf16.msra.mxu0 %v5780_v9  ;;  %v4685_v53 = vpop.f32.mrb[56].mxu0  ;;  %5737 = vmatprep.subr.bf16.mxu1 %v5736_v39  ;;  %v4302_v5 = vld [vmem:[%s8210_s2 + $0x300] sm:$0xff]  ;;  %v4268_v9 = vld [vmem:[%s8210_s2 + $0x1f0] sm:$0xff] }
 0x1a6   : > { %v4686_v55 = vpop.f32.mrb[57].mxu0  ;;  %5785 = vmatprep.subr.bf16.mxu0 %v5784_v43  ;;  %v5824_v3 = vpack.c.bf16 %v4303_v45, %v4302_v5  ;;  %2385 = vperm.xlu0 %6189, %v2327_v58   ;;  %v5756_v34 = vpack.c.bf16 %v4269_v29, %v4268_v9  ;;  %v4312_v46 = vld [vmem:[%s8210_s2 + $0x350] sm:$0xff]  ;;  %v4294_v58 = vld [vmem:[%s8210_s2 + $0x2c0] sm:$0xff]  ;;  %v2105_v29 = vld [vmem:[%s8212_s4 + $0x28] sm:$0xff] }
 0x1a7   : > { %v4687_v24 = vadd.f32 %v4686_v55, %v4685_v53  ;;  %2390 = vperm.xlu1 %6190, %v2328_v61   ;;  %v5844_v48 = vpack.c.bf16 %v4313_v60, %v4312_v46  ;;  %v4291_v53 = vld [vmem:[%s8210_s2 + $0x2a8] sm:$0xff]  ;;  %v2104_v9 = vld [vmem:[%s8212_s4 + $0x20] sm:$0xff]  ;;  %v5884_v46 = vpack.c.bf16 %v4333_v16, %v4332_v44 }
 0x1a8   : > { %5739 = vmatpush3.bf16.msra.mxu1 %v5736_v39  ;;  %v4310_v39 = vld [vmem:[%s8210_s2 + $0x340] sm:$0xff]  ;;  %v4315_v55 = vld [vmem:[%s8210_s2 + $0x368] sm:$0xff] }
 0x1a9   : > { %v1106_v52 = vadd.f32 %v4687_v24, %v7061_v14  ;;  %5787 = vmatpush3.bf16.msra.mxu0 %v5784_v43  ;;  %v4688_v63 = vpop.f32.mrb[58].mxu0  ;;  %5741 = vmatprep.subr.bf16.mxu1 %v5740_v54  ;;  %v4304_v14 = vld [vmem:[%s8210_s2 + $0x310] sm:$0xff]  ;;  %v4295_v61 = vld [vmem:[%s8210_s2 + $0x2c8] sm:$0xff] }
 0x1aa   : > { %v4689_v1 = vpop.f32.mrb[59].mxu0  ;;  %5789 = vmatprep.subr.bf16.mxu0 %v5788_v56  ;;  %v5828_v15 = vpack.c.bf16 %v4305_v23, %v4304_v14  ;;  %2395 = vperm.xlu0 %6189, %v2329_v59   ;;  %v4316_v24 = vld [vmem:[%s8210_s2 + $0x370] sm:$0xff]  ;;  %v4301_v14 = vld [vmem:[%s8210_s2 + $0x2f8] sm:$0xff]  ;;  %v4318_v59 = vld [vmem:[%s8210_s2 + $0x380] sm:$0xff] }
 0x1ab   : > { %v4690_v33 = vadd.f32 %v4689_v1, %v4688_v63  ;;  %2400 = vperm.xlu1 %6190, %v2330_v7   ;;  %v4296_v63 = vld [vmem:[%s8210_s2 + $0x2d0] sm:$0xff]  ;;  %v4319_v7 = vld [vmem:[%s8210_s2 + $0x388] sm:$0xff] }
 0x1ac   : > { %5743 = vmatpush3.bf16.msra.mxu1 %v5740_v54  ;;  %v4314_v54 = vld [vmem:[%s8210_s2 + $0x360] sm:$0xff] }
 0x1ad   : > { %v7306_v10 = vadd.f32 %v4690_v33, %v7066_v25  ;;  %5791 = vmatpush3.bf16.msra.mxu0 %v5788_v56  ;;  %v4691_v11 = vpop.f32.mrb[60].mxu0  ;;  %5745 = vmatprep.subr.bf16.mxu1 %v5744_v0  ;;  %v4306_v25 = vld [vmem:[%s8210_s2 + $0x320] sm:$0xff]  ;;  %v5800_v56 = vpack.c.bf16 %v4291_v53, %v4290_v49  ;;  %v5848_v57 = vpack.c.bf16 %v4315_v55, %v4314_v54  ;;  %v4300_v33 = vld [vmem:[%s8210_s2 + $0x2f0] sm:$0xff] }
 0x1ae   : > { %v4692_v12 = vpop.f32.mrb[61].mxu0  ;;  %5825 = vmatprep.subr.bf16.mxu0 %v5824_v3  ;;  %2405 = vperm.xlu0 %6189, %v2331_v19   ;;  %v5820_v23 = vpack.c.bf16 %v4301_v14, %v4300_v33  ;;  %v4324_v19 = vld [vmem:[%s8210_s2 + $0x3b0] sm:$0xff] }
 0x1af   : > { %v4693_v18 = vadd.f32 %v4692_v12, %v4691_v11  ;;  %2410 = vperm.xlu1 %6190, %v2332_v20   ;;  %v4320_v11 = vld [vmem:[%s8210_s2 + $0x390] sm:$0xff]  ;;  %v4321_v12 = vld [vmem:[%s8210_s2 + $0x398] sm:$0xff] }
 0x1b0   : > { %5209 = vmatmul.mubr.f32.vlgmr.msra.gmra.mrb[66].mxu0 %v7222_v22  ;;  %5747 = vmatpush3.bf16.msra.mxu1 %v5744_v0  ;;  %v5832_v22 = vpack.c.bf16 %v4307_v42, %v4306_v25  ;;  %v4297_v0 = vld [vmem:[%s8210_s2 + $0x2d8] sm:$0xff]  ;;  %v2102_v20 = vld [vmem:[%s8212_s4 + $0x10] sm:$0xff] }
 0x1b1   : > { %v7328_v21 = vadd.f32 %v4693_v18, %v7068_v32  ;;  %5827 = vmatpush3.bf16.msra.mxu0 %v5824_v3  ;;  %5278 = vmatprep.mubr.f32.mxu0 %v1106_v52  ;;  %v4694_v26 = vpop.f32.mrb[62].mxu0  ;;  %v4308_v32 = vld [vmem:[%s8210_s2 + $0x330] sm:$0xff]  ;;  %v5808_v52 = vpack.c.bf16 %v4295_v61, %v4294_v58  ;;  %v5812_v1 = vpack.c.bf16 %v4297_v0, %v4296_v63  ;;  %v4298_v3 = vld [vmem:[%s8210_s2 + $0x2e0] sm:$0xff]  ;;  %v2101_v18 = vld [vmem:[%s8212_s4 + $0x8] sm:$0xff] }
 0x1b2   : > { %v4695_v28 = vpop.f32.mrb[63].mxu0  ;;  %5749 = vmatprep.subr.bf16.mxu1 %v5748_v13  ;;  %5829 = vmatprep.subr.bf16.mxu0 %v5828_v15  ;;  %v5836_v35 = vpack.c.bf16 %v4309_v31, %v4308_v32  ;;  %v5816_v6 = vpack.c.bf16 %v4299_v4, %v4298_v3  ;;  %v5888_v42 = vpack.c.bf16 %v2101_v18, %v2100_v2  ;;  %v4328_v31 = vld [vmem:[%s8210_s2 + $0x3d0] sm:$0xff] }
 0x1b3   : > { %v4696_v30 = vadd.f32 %v4695_v28, %v4694_v26  ;;  %v4326_v28 = vld [vmem:[%s8210_s2 + $0x3c0] sm:$0xff]  ;;  %v5896_v32 = vpack.c.bf16 %v2105_v29, %v2104_v9 }
 0x1b4   : > { %5751 = vmatpush3.bf16.msra.mxu1 %v5748_v13  ;;  %v5860_v13 = vpack.c.bf16 %v4321_v12, %v4320_v11 }
 0x1b5   : > { %v7343_v50 = vadd.f32 %v4696_v30, %v7070_v41  ;;  %5831 = vmatpush3.bf16.msra.mxu0 %v5828_v15  ;;  %5753 = vmatprep.subr.bf16.mxu1 %v5752_v27  ;;  %v4311_v41 = vld [vmem:[%s8210_s2 + $0x348] sm:$0xff]  ;;  %v4322_v15 = vld [vmem:[%s8210_s2 + $0x3a0] sm:$0xff] }
 0x1b6   : > { %5833 = vmatprep.subr.bf16.mxu0 %v5832_v22  ;;  %v5840_v43 = vpack.c.bf16 %v4311_v41, %v4310_v39  ;;  %v5864_v25 = vpack.c.bf16 %v4323_v17, %v4322_v15  ;;  %v4330_v41 = vld [vmem:[%s8210_s2 + $0x3e0] sm:$0xff] }
 0x1b8   : > { %5755 = vmatpush3.bf16.msra.mxu1 %v5752_v27 }
 0x1b9   : > { %5835 = vmatpush3.bf16.msra.mxu0 %v5832_v22  ;;  %5757 = vmatprep.subr.bf16.mxu1 %v5756_v34  ;;  %v4327_v22 = vld [vmem:[%s8210_s2 + $0x3c8] sm:$0xff] }
 0x1ba   : > { %5837 = vmatprep.subr.bf16.mxu0 %v5836_v35  ;;  %v5872_v30 = vpack.c.bf16 %v4327_v22, %v4326_v28 }
 0x1bc   : > { %5759 = vmatpush3.bf16.msra.mxu1 %v5756_v34  ;;  %v4329_v34 = vld [vmem:[%s8210_s2 + $0x3d8] sm:$0xff] }
 0x1bd   : > { %5839 = vmatpush3.bf16.msra.mxu0 %v5836_v35  ;;  %5793 = vmatprep.subr.bf16.mxu1 %v5792_v40  ;;  %v2106_v35 = vld [vmem:[%s8212_s4 + $0x30] sm:$0xff]  ;;  %v5876_v38 = vpack.c.bf16 %v4329_v34, %v4328_v31 }
 0x1be   : > { %5841 = vmatprep.subr.bf16.mxu0 %v5840_v43  ;;  %v5900_v39 = vpack.c.bf16 %v2107_v36, %v2106_v35 }
 0x1bf   : > { %5174 = vmatmul.mubr.f32.vlgmr.msra.gmra.mrb[36].mxu1 %v7182_v62  ;;  %v4292_v62 = vld [vmem:[%s8210_s2 + $0x2b0] sm:$0xff] }
 0x1c0   : > { %5795 = vmatpush3.bf16.msra.mxu1 %v5792_v40  ;;  %5243 = vmatprep.mubr.f32.mxu1 %v7245_v8  ;;  %v4317_v8 = vld [vmem:[%s8210_s2 + $0x378] sm:$0xff]  ;;  %v5804_v5 = vpack.c.bf16 %v4293_v37, %v4292_v62  ;;  %v4331_v40 = vld [vmem:[%s8210_s2 + $0x3e8] sm:$0xff] }
 0x1c1   : > { %5843 = vmatpush3.bf16.msra.mxu0 %v5840_v43  ;;  %5797 = vmatprep.subr.bf16.mxu1 %v5796_v47  ;;  %v5852_v45 = vpack.c.bf16 %v4317_v8, %v4316_v24  ;;  %v5880_v43 = vpack.c.bf16 %v4331_v40, %v4330_v41 }
 0x1c2   : > { %5845 = vmatprep.subr.bf16.mxu0 %v5844_v48 }
 0x1c4   : > { %5799 = vmatpush3.bf16.msra.mxu1 %v5796_v47  ;;  %v1911_v47 = vpop.permute.xlu0 %1910 }
 0x1c5   : > { %5847 = vmatpush3.bf16.msra.mxu0 %v5844_v48  ;;  %5801 = vmatprep.subr.bf16.mxu1 %v5800_v56 }
 0x1c6   : > { %5849 = vmatprep.subr.bf16.mxu0 %v5848_v57 }
 0x1c8   : > { %5803 = vmatpush3.bf16.msra.mxu1 %v5800_v56  ;;  %v1916_v49 = vpop.permute.xlu0 %1915 }
 0x1c9   : > { %5851 = vmatpush3.bf16.msra.mxu0 %v5848_v57  ;;  %5805 = vmatprep.subr.bf16.mxu1 %v5804_v5 }
 0x1ca   : > { %5853 = vmatprep.subr.bf16.mxu0 %v5852_v45 }
 0x1cc   : > { %5807 = vmatpush3.bf16.msra.mxu1 %v5804_v5  ;;  %v1921_v5 = vpop.permute.xlu1 %1920 }
 0x1cd   : > { %5855 = vmatpush3.bf16.msra.mxu0 %v5852_v45  ;;  %5809 = vmatprep.subr.bf16.mxu1 %v5808_v52 }
 0x1ce   : > { %5889 = vmatprep.subr.bf16.mxu0 %v5888_v42 }
 0x1d0   : > { %5279 = vmatmul.mubr.f32.vlgmr.msra.gmra.mrb[68].mxu0 %v7306_v10  ;;  %5811 = vmatpush3.bf16.msra.mxu1 %v5808_v52  ;;  %v5856_v10 = vpack.c.bf16 %v4319_v7, %v4318_v59  ;;  %v1926_v63 = vpop.permute.xlu1 %1925 }
 0x1d1   : > { %5813 = vmatprep.subr.bf16.mxu1 %v5812_v1  ;;  %5891 = vmatpush3.bf16.msra.mxu0 %v5888_v42 }
 0x1d2   : > { %v1931_v3 = vpop.permute.xlu0 %1930 }
 0x1d4   : > { %5815 = vmatpush3.bf16.msra.mxu1 %v5812_v1  ;;  %v1936_v14 = vpop.permute.xlu1 %1935 }
 0x1d5   : > { %5817 = vmatprep.subr.bf16.mxu1 %v5816_v6 }
 0x1d8   : > { %5819 = vmatpush3.bf16.msra.mxu1 %v5816_v6 }
 0x1d9   : > { %5821 = vmatprep.subr.bf16.mxu1 %v5820_v23 }
 0x1dc   : > { %5823 = vmatpush3.bf16.msra.mxu1 %v5820_v23 }
 0x1dd   : > { %5857 = vmatprep.subr.bf16.mxu1 %v5856_v10 }
 0x1df   : > { %5244 = vmatmul.mubr.f32.vlgmr.msra.gmra.mrb[38].mxu1 %v7266_v51  ;;  %v4325_v51 = vld [vmem:[%s8210_s2 + $0x3b8] sm:$0xff] }
 0x1e0   : > { %5859 = vmatpush3.bf16.msra.mxu1 %v5856_v10  ;;  %5313 = vmatprep.mubr.f32.mxu1 %v7328_v21  ;;  %v2103_v21 = vld [vmem:[%s8212_s4 + $0x18] sm:$0xff]  ;;  %v5868_v26 = vpack.c.bf16 %v4325_v51, %v4324_v19 }
 0x1e1   : > { %5861 = vmatprep.subr.bf16.mxu1 %v5860_v13  ;;  %v5892_v27 = vpack.c.bf16 %v2103_v21, %v2102_v20 }
 0x1e3   : > { %5893 = vmatprep.subr.bf16.mxu0 %v5892_v27  ;;  %v1946_v31 = vpop.permute.xlu1 %1945 }
 0x1e4   : > { %5863 = vmatpush3.bf16.msra.mxu1 %v5860_v13  ;;  %5895 = vmatpush3.bf16.msra.mxu0 %v5892_v27 }
 0x1e5   : > { %5865 = vmatprep.subr.bf16.mxu1 %v5864_v25  ;;  %5897 = vmatprep.subr.bf16.mxu0 %v5896_v32 }
 0x1e7   : > { %v1956_v44 = vpop.permute.xlu1 %1955 }
 0x1e8   : > { %5867 = vmatpush3.bf16.msra.mxu1 %v5864_v25  ;;  %5899 = vmatpush3.bf16.msra.mxu0 %v5896_v32 }
 0x1e9   : > { %5869 = vmatprep.subr.bf16.mxu1 %v5868_v26  ;;  %5901 = vmatprep.subr.bf16.mxu0 %v5900_v39 }
 0x1ec   : > { %5871 = vmatpush3.bf16.msra.mxu1 %v5868_v26  ;;  %5903 = vmatpush3.bf16.msra.mxu0 %v5900_v39 }
 0x1ed   : > { %5873 = vmatprep.subr.bf16.mxu1 %v5872_v30 }
 0x1f0   : > { %5875 = vmatpush3.bf16.msra.mxu1 %v5872_v30 }
 0x1f1   : > { %5877 = vmatprep.subr.bf16.mxu1 %v5876_v38 }
 0x1f4   : > { %5879 = vmatpush3.bf16.msra.mxu1 %v5876_v38 }
 0x1f5   : > { %5881 = vmatprep.subr.bf16.mxu1 %v5880_v43 }
 0x1f8   : > { %5883 = vmatpush3.bf16.msra.mxu1 %v5880_v43 }
 0x1f9   : > { %5885 = vmatprep.subr.bf16.mxu1 %v5884_v46 }
 0x1fc   : > { %5887 = vmatpush3.bf16.msra.mxu1 %v5884_v46 }
 0x1fd   : > { %v1941_v28 = vpop.permute.xlu0 %1940 }
 0x1ff   : > { %5314 = vmatmul.mubr.f32.vlgmr.msra.gmra.mrb[40].mxu1 %v7343_v50 }
 0x201   : > { %v1951_v38 = vpop.permute.xlu0 %1950 }
 0x252   : > { %v5070_v60 = vpop.f32.mrb[32].mxu1 }
 0x253   : > { %1217 = vst.msk [vmem:[#allocation2 + $0x8] sm:$0xff] %vm1215_vm0, %v5070_v60  ;;  %v1206_v48 = vpop.f32.mrb[33].mxu1 }
 0x254   : > { %1216 = vst.msk [vmem:[#allocation2] sm:$0xff] %vm1215_vm0, %v1206_v48 }
 0x25a   : > { %v1877_v53 = vld [vmem:[#allocation2 + $0x8] sm:$0xff] }
 0x25b   : > { %v1876_v54 = vld [vmem:[#allocation2] sm:$0xff]  ;;  %v1989_v55 = vadd.f32 %v1916_v49, %v1877_v53 }
 0x25c   : > { %v1988_v56 = vadd.f32 %v1911_v47, %v1876_v54 }
 0x25d   : > { %v2021_v57 = vmin.f32 %v1989_v55, 0.0  ;;  %vm2005_vm2 = vcmp.gt.f32.partialorder %v1989_v55, 0.0 }
 0x25e   : > { %v2020_v62 = vmin.f32 %v1988_v56, 0.0  ;;  %vm2004_vm1 = vcmp.gt.f32.partialorder %v1988_v56, 0.0 }
 0x25f   : > { %v2038_v37 = vmul.f32 1.442695, %v2021_v57 }
 0x260   : > { %v2036_v24 = vmul.f32 1.442695, %v2020_v62 }
 0x261   : > { %6191 = vpow2.f32 %v2038_v37 }
 0x262   : > { %6193 = vpow2.f32 %v2036_v24  ;;  %v5140_v50 = vpop.f32.mrb[64].mxu0 }
 0x263   : > { %1405 = vst.msk [vmem:[#allocation2 + $0x28] sm:$0xff] %vm1215_vm0, %v5140_v50  ;;  %v1395_v8 = vpop.f32.mrb[65].mxu0 }
 0x264   : > { %1404 = vst.msk [vmem:[#allocation2 + $0x20] sm:$0xff] %vm1215_vm0, %v1395_v8 }
 0x26a   : > { %v1881_v23 = vld [vmem:[#allocation2 + $0x28] sm:$0xff] }
 0x26b   : > { %v6192_v45 = vpop.eup %6191  ;;  %v1880_v4 = vld [vmem:[#allocation2 + $0x20] sm:$0xff]  ;;  %v1993_v7 = vadd.f32 %v1936_v14, %v1881_v23 }
 0x26c   : > { %v6194_v58 = vpop.eup %6193  ;;  %v4335_v61 = vadd.f32 -1.0, %v6192_v45  ;;  %v1992_v59 = vadd.f32 %v1931_v3, %v1880_v4 }
 0x26d   : > { %v4334_v52 = vadd.f32 -1.0, %v6194_v58  ;;  %v2025_v12 = vmin.f32 %v1993_v7, 0.0  ;;  %vm2009_vm6 = vcmp.gt.f32.partialorder %v1993_v7, 0.0 }
 0x26e   : > { %v2085_v1 = vsel %vm2005_vm2, %v1989_v55, %v4335_v61  ;;  %v2024_v10 = vmin.f32 %v1992_v59, 0.0  ;;  %vm2008_vm5 = vcmp.gt.f32.partialorder %v1992_v59, 0.0 }
 0x26f   : > { %v2084_v0 = vsel %vm2004_vm1, %v1988_v56, %v4334_v52  ;;  %v2046_v42 = vmul.f32 1.442695, %v2025_v12 }
 0x270   : > { %5332 = vmatprep.mubr.msk.f32.mxu0 %vm1215_vm0, %v2084_v0  ;;  %v2044_v17 = vmul.f32 1.442695, %v2024_v10 }
 0x271   : > { %5333 = vmatmul.mubr.msk.f32.vlgmr.msra.gmra.mrb[70].mxu0 %vm1215_vm0, %v2085_v1  ;;  %v1961_v1 = vpop.permute.xlu0 %1960 }
 0x272   : > { %v5105_v6 = vpop.f32.mrb[34].mxu1  ;;  %6195 = vpow2.f32 %v2044_v17 }
 0x273   : > { %1311 = vst.msk [vmem:[#allocation2 + $0x18] sm:$0xff] %vm1215_vm0, %v5105_v6  ;;  %v1301_v33 = vpop.f32.mrb[35].mxu1 }
 0x274   : > { %1310 = vst.msk [vmem:[#allocation2 + $0x10] sm:$0xff] %vm1215_vm0, %v1301_v33  ;;  %v1966_v33 = vpop.permute.xlu1 %1965 }
 0x27a   : > { %v1879_v11 = vld [vmem:[#allocation2 + $0x18] sm:$0xff] }
 0x27b   : > { %v1878_v13 = vld [vmem:[#allocation2 + $0x10] sm:$0xff]  ;;  %v1991_v15 = vadd.f32 %v1926_v63, %v1879_v11  ;;  %v1971_v11 = vpop.permute.xlu0 %1970 }
 0x27c   : > { %v1990_v2 = vadd.f32 %v1921_v5, %v1878_v13  ;;  %v6196_v26 = vpop.eup %6195 }
 0x27d   : > { %v2023_v18 = vmin.f32 %v1991_v15, 0.0  ;;  %v4338_v32 = vadd.f32 -1.0, %v6196_v26  ;;  %vm2007_vm4 = vcmp.gt.f32.partialorder %v1991_v15, 0.0 }
 0x27e   : > { %v2022_v25 = vmin.f32 %v1990_v2, 0.0  ;;  %vm2006_vm3 = vcmp.gt.f32.partialorder %v1990_v2, 0.0 }
 0x27f   : > { %v2042_v19 = vmul.f32 1.442695, %v2023_v18  ;;  %v2088_v41 = vsel %vm2008_vm5, %v1992_v59, %v4338_v32 }
 0x280   : > { %v2040_v51 = vmul.f32 1.442695, %v2022_v25 }
 0x281   : > { %6197 = vpow2.f32 %v2042_v19 }
 0x282   : > { %6199 = vpow2.f32 %v2040_v51 }
 0x283   : > { %6201 = vpow2.f32 %v2046_v42  ;;  %v5210_v20 = vpop.f32.mrb[66].mxu0 }
 0x284   : > { %1593 = vst.msk [vmem:[#allocation2 + $0x48] sm:$0xff] %vm1215_vm0, %v5210_v20  ;;  %v1583_v21 = vpop.f32.mrb[67].mxu0 }
 0x285   : > { %1592 = vst.msk [vmem:[#allocation2 + $0x40] sm:$0xff] %vm1215_vm0, %v1583_v21 }
 0x28b   : > { %v6198_v27 = vpop.eup %6197  ;;  %v1885_v16 = vld [vmem:[#allocation2 + $0x48] sm:$0xff] }
 0x28c   : > { %v6200_v22 = vpop.eup %6199  ;;  %v4337_v9 = vadd.f32 -1.0, %v6198_v27  ;;  %v1884_v39 = vld [vmem:[#allocation2 + $0x40] sm:$0xff]  ;;  %v1997_v47 = vadd.f32 %v1956_v44, %v1885_v16 }
 0x28d   : > { %v6202_v29 = vpop.eup %6201  ;;  %v4336_v30 = vadd.f32 -1.0, %v6200_v22  ;;  %v1996_v46 = vadd.f32 %v1951_v38, %v1884_v39 }
 0x28e   : > { %v2087_v35 = vsel %vm2007_vm4, %v1991_v15, %v4337_v9  ;;  %v4339_v36 = vadd.f32 -1.0, %v6202_v29  ;;  %v2029_v53 = vmin.f32 %v1997_v47, 0.0  ;;  %vm2013_vm10 = vcmp.gt.f32.partialorder %v1997_v47, 0.0 }
 0x28f   : > { %v2086_v34 = vsel %vm2006_vm3, %v1990_v2, %v4336_v30  ;;  %v2028_v48 = vmin.f32 %v1996_v46, 0.0  ;;  %vm2012_vm9 = vcmp.gt.f32.partialorder %v1996_v46, 0.0  ;;  %v1976_v2 = vpop.permute.xlu1 %1975  ;;  %vm2656_vm4 = vcmask 130048  }
 0x290   : > { %5335 = vmatprep.mubr.msk.f32.mxu0 %vm1215_vm0, %v2086_v34  ;;  %v2089_v60 = vsel %vm2009_vm6, %v1993_v7, %v4339_v36  ;;  %v2054_v24 = vmul.f32 1.442695, %v2029_v53 }
 0x291   : > { %5336 = vmatmul.mubr.msk.f32.gmra.mrb[72].mxu0 %vm1215_vm0, %v2087_v35  ;;  %v2052_v56 = vmul.f32 1.442695, %v2028_v48  ;;  %v1981_v48 = vpop.permute.xlu0 %1980 }
 0x292   : > { %v5175_v40 = vpop.f32.mrb[36].mxu1  ;;  %5338 = vmatprep.mubr.msk.f32.mxu0 %vm1215_vm0, %v2088_v41 }
 0x293   : > { %1499 = vst.msk [vmem:[#allocation2 + $0x38] sm:$0xff] %vm1215_vm0, %v5175_v40  ;;  %v1489_v43 = vpop.f32.mrb[37].mxu1  ;;  %6203 = vpow2.f32 %v2052_v56 }
 0x294   : > { %1498 = vst.msk [vmem:[#allocation2 + $0x30] sm:$0xff] %vm1215_vm0, %v1489_v43 }
 0x295   : > { %5339 = vmatmul.mubr.msk.f32.gmra.mrb[74].mxu0 %vm1215_vm0, %v2089_v60  ;;  %v1986_v60 = vpop.permute.xlu1 %1985 }
 0x29a   : > { %v1883_v49 = vld [vmem:[#allocation2 + $0x38] sm:$0xff] }
 0x29b   : > { %v1882_v54 = vld [vmem:[#allocation2 + $0x30] sm:$0xff]  ;;  %v1995_v55 = vadd.f32 %v1946_v31, %v1883_v49 }
 0x29c   : > { %v1994_v57 = vadd.f32 %v1941_v28, %v1882_v54 }
 0x29d   : > { %v2027_v62 = vmin.f32 %v1995_v55, 0.0  ;;  %v6204_v58 = vpop.eup %6203  ;;  %vm2011_vm8 = vcmp.gt.f32.partialorder %v1995_v55, 0.0 }
 0x29e   : > { %v2026_v37 = vmin.f32 %v1994_v57, 0.0  ;;  %v4342_v4 = vadd.f32 -1.0, %v6204_v58  ;;  %vm2010_vm7 = vcmp.gt.f32.partialorder %v1994_v57, 0.0 }
 0x29f   : > { %v2050_v50 = vmul.f32 1.442695, %v2027_v62 }
 0x2a0   : > { %v2048_v8 = vmul.f32 1.442695, %v2026_v37  ;;  %v2092_v59 = vsel %vm2012_vm9, %v1996_v46, %v4342_v4 }
 0x2a1   : > { %6205 = vpow2.f32 %v2050_v50 }
 0x2a2   : > { %6207 = vpow2.f32 %v2048_v8 }
 0x2a3   : > { %6209 = vpow2.f32 %v2054_v24  ;;  %v5280_v5 = vpop.f32.mrb[68].mxu0 }
 0x2a4   : > { %1781 = vst.msk [vmem:[#allocation2 + $0x68] sm:$0xff] %vm1215_vm0, %v5280_v5  ;;  %v1771_v45 = vpop.f32.mrb[69].mxu0 }
 0x2a5   : > { %1780 = vst.msk [vmem:[#allocation2 + $0x60] sm:$0xff] %vm1215_vm0, %v1771_v45 }
 0x2ab   : > { %v6206_v61 = vpop.eup %6205  ;;  %v1889_v17 = vld [vmem:[#allocation2 + $0x68] sm:$0xff] }
 0x2ac   : > { %v6208_v52 = vpop.eup %6207  ;;  %v4341_v63 = vadd.f32 -1.0, %v6206_v61  ;;  %v1888_v7 = vld [vmem:[#allocation2 + $0x60] sm:$0xff]  ;;  %v2001_v18 = vadd.f32 %v1976_v2, %v1889_v17 }
 0x2ad   : > { %v6210_v0 = vpop.eup %6209  ;;  %v4340_v3 = vadd.f32 -1.0, %v6208_v52  ;;  %v2000_v15 = vadd.f32 %v1971_v11, %v1888_v7 }
 0x2ae   : > { %v2091_v14 = vsel %vm2011_vm8, %v1995_v55, %v4341_v63  ;;  %v4343_v23 = vadd.f32 -1.0, %v6210_v0  ;;  %v2033_v20 = vmin.f32 %v2001_v18, 0.0  ;;  %vm2017_vm14 = vcmp.gt.f32.partialorder %v2001_v18, 0.0  ;;  %v2301_v63 = vld [vmem:[%s8213_s5] sm:$0xff] }
 0x2af   : > { %v2090_v6 = vsel %vm2010_vm7, %v1994_v57, %v4340_v3  ;;  %v2032_v25 = vmin.f32 %v2000_v15, 0.0  ;;  %vm2016_vm13 = vcmp.gt.f32.partialorder %v2000_v15, 0.0  ;;  %v2305_v0 = vld [vmem:[%s8213_s5 + $0x20] sm:$0xff] }
 0x2b0   : > { %5341 = vmatprep.mubr.msk.f32.mxu0 %vm1215_vm0, %v2090_v6  ;;  %v2093_v13 = vsel %vm2013_vm10, %v1997_v47, %v4343_v23  ;;  %v2062_v9 = vmul.f32 1.442695, %v2033_v20  ;;  %5394 = vmatprep.mubr.f32.mxu1 %v2305_v0  ;;  %v2302_v20 = vld [vmem:[%s8213_s5 + $0x8] sm:$0xff] }
 0x2b1   : > { %5342 = vmatmul.mubr.msk.f32.gmra.mrb[76].mxu0 %vm1215_vm0, %v2091_v14  ;;  %v2060_v26 = vmul.f32 1.442695, %v2032_v25 }
 0x2b2   : > { %v5245_v10 = vpop.f32.mrb[38].mxu1  ;;  %5344 = vmatprep.mubr.msk.f32.mxu0 %vm1215_vm0, %v2092_v59 }
 0x2b3   : > { %1687 = vst.msk [vmem:[#allocation2 + $0x58] sm:$0xff] %vm1215_vm0, %v5245_v10  ;;  %v1677_v12 = vpop.f32.mrb[39].mxu1  ;;  %6211 = vpow2.f32 %v2060_v26  ;;  %v2303_v26 = vld [vmem:[%s8213_s5 + $0x10] sm:$0xff] }
 0x2b4   : > { %1686 = vst.msk [vmem:[#allocation2 + $0x50] sm:$0xff] %vm1215_vm0, %v1677_v12 }
 0x2b5   : > { %5345 = vmatmul.mubr.msk.f32.gmra.mrb[78].mxu0 %vm1215_vm0, %v2093_v13 }
 0x2ba   : > { %v1887_v42 = vld [vmem:[#allocation2 + $0x58] sm:$0xff] }
 0x2bb   : > { %v1886_v19 = vld [vmem:[#allocation2 + $0x50] sm:$0xff]  ;;  %v1999_v51 = vadd.f32 %v1966_v33, %v1887_v42 }
 0x2bc   : > { %v1998_v21 = vadd.f32 %v1961_v1, %v1886_v19 }
 0x2bd   : > { %v2031_v27 = vmin.f32 %v1999_v51, 0.0  ;;  %v6212_v30 = vpop.eup %6211  ;;  %vm2015_vm12 = vcmp.gt.f32.partialorder %v1999_v51, 0.0 }
 0x2be   : > { %v2030_v28 = vmin.f32 %v1998_v21, 0.0  ;;  %v4346_v38 = vadd.f32 -1.0, %v6212_v30  ;;  %vm2014_vm11 = vcmp.gt.f32.partialorder %v1998_v21, 0.0  ;;  %v2311_v30 = vld [vmem:[%s8213_s5 + $0x50] sm:$0xff] }
 0x2bf   : > { %v2058_v22 = vmul.f32 1.442695, %v2031_v27  ;;  %v2307_v27 = vld [vmem:[%s8213_s5 + $0x30] sm:$0xff] }
 0x2c0   : > { %v2056_v29 = vmul.f32 1.442695, %v2030_v28  ;;  %v2096_v43 = vsel %vm2016_vm13, %v2000_v15, %v4346_v38  ;;  %v2304_v28 = vld [vmem:[%s8213_s5 + $0x18] sm:$0xff]  ;;  %v2654_v38 = vld [vmem:[%s8215_s7] sm:$0xff] }
 0x2c1   : > { %6213 = vpow2.f32 %v2058_v22  ;;  %v2308_v22 = vld [vmem:[%s8213_s5 + $0x38] sm:$0xff] }
 0x2c2   : > { %6215 = vpow2.f32 %v2056_v29  ;;  %v2310_v29 = vld [vmem:[%s8213_s5 + $0x48] sm:$0xff] }
 0x2c3   : > { %6217 = vpow2.f32 %v2062_v9  ;;  %v2309_v9 = vld [vmem:[%s8213_s5 + $0x40] sm:$0xff] }
 0x2cb   : > { %v6214_v32 = vpop.eup %6213 }
 0x2cc   : > { %v6216_v31 = vpop.eup %6215  ;;  %v4345_v34 = vadd.f32 -1.0, %v6214_v32  ;;  %v2312_v32 = vld [vmem:[%s8213_s5 + $0x58] sm:$0xff] }
 0x2cd   : > { %v6218_v35 = vpop.eup %6217  ;;  %v4344_v36 = vadd.f32 -1.0, %v6216_v31  ;;  %v2313_v31 = vld [vmem:[%s8213_s5 + $0x60] sm:$0xff] }
 0x2ce   : > { %v2095_v41 = vsel %vm2015_vm12, %v1999_v51, %v4345_v34  ;;  %v4347_v40 = vadd.f32 -1.0, %v6218_v35  ;;  %v2314_v34 = vld [vmem:[%s8213_s5 + $0x68] sm:$0xff]  ;;  %v2315_v35 = vld [vmem:[%s8213_s5 + $0x70] sm:$0xff] }
 0x2cf   : > { %v2094_v39 = vsel %vm2014_vm11, %v1998_v21, %v4344_v36  ;;  %v2306_v21 = vld [vmem:[%s8213_s5 + $0x28] sm:$0xff]  ;;  %v2316_v36 = vld [vmem:[%s8213_s5 + $0x78] sm:$0xff] }
 0x2d0   : > { %5347 = vmatprep.mubr.msk.f32.mxu0 %vm1215_vm0, %v2094_v39  ;;  %v2097_v46 = vsel %vm2017_vm14, %v2001_v18, %v4347_v40  ;;  %v2655_v39 = vld [vmem:[%s8215_s7 + $0x8] sm:$0xff]  ;;  %v2875_v40 = vlaneseq }
 0x2d1   : > { %5348 = vmatmul.mubr.msk.f32.gmra.mrb[80].mxu0 %vm1215_vm0, %v2095_v41  ;;  %v5936_v41 = vpack.c.bf16 %v2655_v39, %v2654_v38 }
 0x2d2   : > { %v5315_v44 = vpop.f32.mrb[40].mxu1  ;;  %5350 = vmatprep.mubr.msk.f32.mxu0 %vm1215_vm0, %v2096_v43  ;;  %v6355_v43 = vmov 1983009808  }
 0x2d3   : > { %1875 = vst.msk [vmem:[#allocation2 + $0x78] sm:$0xff] %vm1215_vm0, %v5315_v44  ;;  %v1865_v16 = vpop.f32.mrb[41].mxu1  ;;  %v2873_v44 = vunpack.c.l.s4 %v6355_v43 }
 0x2d4   : > { %1874 = vst.msk [vmem:[#allocation2 + $0x70] sm:$0xff] %vm1215_vm0, %v1865_v16  ;;  %v2876_v16 = vshrl.u32 %v2875_v40, 7 }
 0x2d5   : > { %5351 = vmatmul.mubr.msk.f32.gmra.mrb[82].mxu0 %vm1215_vm0, %v2097_v46  ;;  %v2874_v46 = vunpack.c.0.s8 %v2873_v44 }
 0x2da   : > { %v1891_v47 = vld [vmem:[#allocation2 + $0x78] sm:$0xff] }
 0x2db   : > { %v1890_v49 = vld [vmem:[#allocation2 + $0x70] sm:$0xff]  ;;  %v2003_v53 = vadd.f32 %v1986_v60, %v1891_v47  ;;  %v7581_v60 = vsub.s32 %v2874_v46, %v2876_v16  ;;  %v7586_v47 = vld [vmem:[%s8216_s8] sm:$0xff] }
 0x2dc   : > { %v2002_v54 = vadd.f32 %v1981_v48, %v1890_v49 }
 0x2dd   : > { %v2035_v55 = vmin.f32 %v2003_v53, 0.0  ;;  %vm2019_vm1 = vcmp.gt.f32.partialorder %v2003_v53, 0.0  ;;  %v2878_v48 = vrot.slane %v7586_v47, %v7581_v60 }
 0x2de   : > { %v2034_v56 = vmin.f32 %v2002_v54, 0.0  ;;  %vm2018_vm15 = vcmp.gt.f32.partialorder %v2002_v54, 0.0 }
 0x2df   : > { %v2066_v57 = vmul.f32 1.442695, %v2035_v55  ;;  %v2886_v49 = vcombine.high %v2878_v48, %v2878_v48 }
 0x2e0   : > { %v2064_v62 = vmul.f32 1.442695, %v2034_v56 }
 0x2e1   : > { %6219 = vpow2.f32 %v2066_v57 }
 0x2e2   : > { %6221 = vpow2.f32 %v2064_v62 }
 0x2eb   : > { %v6220_v37 = vpop.eup %6219 }
 0x2ec   : > { %v6222_v24 = vpop.eup %6221  ;;  %v4349_v50 = vadd.f32 -1.0, %v6220_v37 }
 0x2ed   : > { %v4348_v8 = vadd.f32 -1.0, %v6222_v24 }
 0x2ee   : > { %v2099_v45 = vsel %vm2019_vm1, %v2003_v53, %v4349_v50  ;;  %v2336_v53 = vpop.permute.xlu0 %2335 }
 0x2ef   : > { %v2098_v5 = vsel %vm2018_vm15, %v2002_v54, %v4348_v8  ;;  %v2341_v54 = vpop.permute.xlu1 %2340 }
 0x2f0   : > { %5353 = vmatprep.mubr.msk.f32.mxu0 %vm1215_vm0, %v2098_v5 }
 0x2f1   : > { %5354 = vmatmul.mubr.msk.f32.gmra.mrb[84].mxu0 %vm1215_vm0, %v2099_v45  ;;  %vm2943_vm0 = vcmask 1041408  }
 0x2f2   : > { %5388 = vmatprep.mubr.f32.mxu0 %v2301_v63  ;;  %v2346_v55 = vpop.permute.xlu0 %2345 }
 0x2f3   : > { %v2351_v56 = vpop.permute.xlu1 %2350 }
 0x2f6   : > { %v2356_v57 = vpop.permute.xlu0 %2355 }
 0x2f7   : > { %v2361_v62 = vpop.permute.xlu1 %2360 }
 0x2fa   : > { %v2366_v37 = vpop.permute.xlu0 %2365 }
 0x2fb   : > { %v2371_v24 = vpop.permute.xlu1 %2370 }
 0x2fe   : > { %v2376_v63 = vpop.permute.xlu0 %2375 }
 0x2ff   : > { %v2381_v0 = vpop.permute.xlu1 %2380 }
 0x344   : > { %v5334_v58 = vpop.f32.mrb[70].mxu0 }
 0x345   : > { %v2222_v61 = vpop.f32.mrb[71].mxu0 }
 0x346   : > { %v5904_v52 = vpack.c.bf16 %v5334_v58, %v2222_v61 }
 0x348   : > { %5905 = vmatprep.subr.bf16.mxu0 %v5904_v52  ;;  %6116 = vmatprep.subr.bf16.mxu1 %v5904_v52 }
 0x349   : > { %5907 = vmatpush3.bf16.msra.mxu0 %v5904_v52  ;;  %6124 = vmatpush3.bf16.msra.mxu1 %v5904_v52 }
 0x364   : > { %v5337_v1 = vpop.f32.mrb[72].mxu0 }
 0x365   : > { %v2232_v3 = vpop.f32.mrb[73].mxu0 }
 0x366   : > { %v5908_v4 = vpack.c.bf16 %v5337_v1, %v2232_v3 }
 0x368   : > { %v5340_v6 = vpop.f32.mrb[74].mxu0  ;;  %5909 = vmatprep.subr.bf16.mxu0 %v5908_v4  ;;  %6117 = vmatprep.subr.bf16.mxu1 %v5908_v4 }
 0x369   : > { %v2242_v33 = vpop.f32.mrb[75].mxu0  ;;  %5911 = vmatpush3.bf16.msra.mxu0 %v5908_v4  ;;  %6125 = vmatpush3.bf16.msra.mxu1 %v5908_v4 }
 0x36a   : > { %v5912_v14 = vpack.c.bf16 %v5340_v6, %v2242_v33 }
 0x36c   : > { %5913 = vmatprep.subr.bf16.mxu0 %v5912_v14  ;;  %6118 = vmatprep.subr.bf16.mxu1 %v5912_v14 }
 0x36d   : > { %5915 = vmatpush3.bf16.msra.mxu0 %v5912_v14  ;;  %6126 = vmatpush3.bf16.msra.mxu1 %v5912_v14 }
 0x384   : > { %v5343_v23 = vpop.f32.mrb[76].mxu0 }
 0x385   : > { %v2252_v59 = vpop.f32.mrb[77].mxu0 }
 0x386   : > { %v5916_v7 = vpack.c.bf16 %v5343_v23, %v2252_v59 }
 0x388   : > { %v5346_v10 = vpop.f32.mrb[78].mxu0  ;;  %5917 = vmatprep.subr.bf16.mxu0 %v5916_v7  ;;  %6119 = vmatprep.subr.bf16.mxu1 %v5916_v7 }
 0x389   : > { %v2262_v11 = vpop.f32.mrb[79].mxu0  ;;  %5919 = vmatpush3.bf16.msra.mxu0 %v5916_v7  ;;  %6127 = vmatpush3.bf16.msra.mxu1 %v5916_v7 }
 0x38a   : > { %v5920_v12 = vpack.c.bf16 %v5346_v10, %v2262_v11 }
 0x38c   : > { %5921 = vmatprep.subr.bf16.mxu0 %v5920_v12  ;;  %6120 = vmatprep.subr.bf16.mxu1 %v5920_v12 }
 0x38d   : > { %5923 = vmatpush3.bf16.msra.mxu0 %v5920_v12  ;;  %6128 = vmatpush3.bf16.msra.mxu1 %v5920_v12 }
 0x3a4   : > { %v5349_v13 = vpop.f32.mrb[80].mxu0 }
 0x3a5   : > { %v2272_v15 = vpop.f32.mrb[81].mxu0 }
 0x3a6   : > { %v5924_v17 = vpack.c.bf16 %v5349_v13, %v2272_v15 }
 0x3a8   : > { %v5352_v2 = vpop.f32.mrb[82].mxu0  ;;  %5925 = vmatprep.subr.bf16.mxu0 %v5924_v17  ;;  %6121 = vmatprep.subr.bf16.mxu1 %v5924_v17 }
 0x3a9   : > { %v2282_v18 = vpop.f32.mrb[83].mxu0  ;;  %5927 = vmatpush3.bf16.msra.mxu0 %v5924_v17  ;;  %6129 = vmatpush3.bf16.msra.mxu1 %v5924_v17 }
 0x3aa   : > { %v5928_v25 = vpack.c.bf16 %v5352_v2, %v2282_v18 }
 0x3ac   : > { %5929 = vmatprep.subr.bf16.mxu0 %v5928_v25  ;;  %6122 = vmatprep.subr.bf16.mxu1 %v5928_v25 }
 0x3ad   : > { %5931 = vmatpush3.bf16.msra.mxu0 %v5928_v25  ;;  %6130 = vmatpush3.bf16.msra.mxu1 %v5928_v25 }
 0x3c4   : > { %v5355_v42 = vpop.f32.mrb[84].mxu0 }
 0x3c5   : > { %v2292_v19 = vpop.f32.mrb[85].mxu0 }
 0x3c6   : > { %v5932_v51 = vpack.c.bf16 %v5355_v42, %v2292_v19  ;;  %v2386_v19 = vpop.permute.xlu0 %2385 }
 0x3c8   : > { %5933 = vmatprep.subr.bf16.mxu0 %v5932_v51  ;;  %6123 = vmatprep.subr.bf16.mxu1 %v5932_v51 }
 0x3c9   : > { %5935 = vmatpush3.bf16.msra.mxu0 %v5932_v51  ;;  %6131 = vmatpush3.bf16.msra.mxu1 %v5932_v51 }
 0x3ca   : > { %5937 = vmatprep.subr.bf16.mxu0 %v5936_v41  ;;  %4399 = vmatprep.subr.msk.mxu1 %vm2943_vm0, %v2886_v49  ;;  %v2396_v39 = vpop.permute.xlu0 %2395 }
 0x3cc   : > { %5389 = vmatmul.mubr.f32.vlgmr.msra.gmra.mrb[86].mxu0 %v2302_v20  ;;  %5395 = vmatmul.mubr.f32.vlgmr.msra.gmra.mrb[42].mxu1 %v2306_v21 }
 0x3cd   : > { %5391 = vmatprep.mubr.f32.mxu0 %v2303_v26  ;;  %5397 = vmatprep.mubr.f32.mxu1 %v2307_v27  ;;  %v2391_v26 = vpop.permute.xlu1 %2390 }
 0x3ce   : > { %5939 = vmatpush3.bf16.msra.mxu0 %v5936_v41  ;;  %4400 = vmatpush1.msk.msra.mxu1 %vm2943_vm0, %v2878_v48 }
 0x3d0   : > { %5392 = vmatmul.mubr.f32.gmra.mrb[88].mxu0 %v2304_v28  ;;  %5398 = vmatmul.mubr.f32.gmra.mrb[44].mxu1 %v2308_v22 }
 0x3d1   : > { %5400 = vmatprep.mubr.f32.mxu1 %v2309_v9  ;;  %v2401_v40 = vpop.permute.xlu1 %2400 }
 0x3d4   : > { %5401 = vmatmul.mubr.f32.gmra.mrb[46].mxu1 %v2310_v29 }
 0x3d5   : > { %5403 = vmatprep.mubr.f32.mxu1 %v2311_v30 }
 0x3d8   : > { %5404 = vmatmul.mubr.f32.gmra.mrb[48].mxu1 %v2312_v32 }
 0x3d9   : > { %5406 = vmatprep.mubr.f32.mxu1 %v2313_v31 }
 0x3dc   : > { %5407 = vmatmul.mubr.f32.gmra.mrb[50].mxu1 %v2314_v34 }
 0x3dd   : > { %5409 = vmatprep.mubr.f32.mxu1 %v2315_v35 }
 0x3e0   : > { %5410 = vmatmul.mubr.f32.gmra.mrb[52].mxu1 %v2316_v36 }
 0x49f   : > { %v5390_v50 = vpop.f32.mrb[86].mxu0  ;;  %v5396_v8 = vpop.f32.mrb[42].mxu1 }
 0x4a0   : > { %v7592_v5 = vadd.f32 %v5390_v50, %v2341_v54  ;;  %v2479_v45 = vpop.f32.mrb[87].mxu0  ;;  %v2499_v58 = vpop.f32.mrb[43].mxu1  ;;  %v7599_v3 = vadd.f32 %v5396_v8, %v2361_v62 }
 0x4a1   : > { %v7594_v61 = vadd.f32 %v2479_v45, %v2336_v53  ;;  %v7596_v52 = vadd.f32 %v2499_v58, %v2356_v57  ;;  %v2406_v8 = vpop.permute.xlu0 %2405 }
 0x4a2   : > { %v2575_v1 = vmin.f32 %v7592_v5, 0.0  ;;  %v2579_v15 = vmin.f32 %v7599_v3, 0.0  ;;  %vm2559_vm2 = vcmp.gt.f32.partialorder %v7592_v5, 0.0  ;;  %vm2563_vm8 = vcmp.gt.f32.partialorder %v7599_v3, 0.0 }
 0x4a3   : > { %v2574_v4 = vmin.f32 %v7594_v61, 0.0  ;;  %v2578_v6 = vmin.f32 %v7596_v52, 0.0  ;;  %v5393_v33 = vpop.f32.mrb[88].mxu0  ;;  %v5399_v14 = vpop.f32.mrb[44].mxu1  ;;  %vm2558_vm3 = vcmp.gt.f32.partialorder %v7594_v61, 0.0  ;;  %vm2562_vm6 = vcmp.gt.f32.partialorder %v7596_v52, 0.0 }
 0x4a4   : > { %v2592_v23 = vmul.f32 1.442695, %v2575_v1  ;;  %v7603_v59 = vadd.f32 %v5393_v33, %v2351_v56  ;;  %v2489_v7 = vpop.f32.mrb[89].mxu0  ;;  %v2509_v10 = vpop.f32.mrb[45].mxu1  ;;  %v7611_v2 = vadd.f32 %v5399_v14, %v2371_v24  ;;  %v2600_v22 = vmul.f32 1.442695, %v2579_v15 }
 0x4a5   : > { %v2590_v11 = vmul.f32 1.442695, %v2574_v4  ;;  %v7605_v12 = vadd.f32 %v2489_v7, %v2346_v55  ;;  %v7607_v13 = vadd.f32 %v2509_v10, %v2366_v37  ;;  %v2598_v18 = vmul.f32 1.442695, %v2578_v6 }
 0x4a6   : > { %6223 = vpow2.f32 %v2592_v23  ;;  %v2577_v17 = vmin.f32 %v7603_v59, 0.0  ;;  %v2581_v9 = vmin.f32 %v7611_v2, 0.0  ;;  %vm2561_vm7 = vcmp.gt.f32.partialorder %v7603_v59, 0.0 }
 0x4a7   : > { %v2576_v25 = vmin.f32 %v7605_v12, 0.0  ;;  %v5402_v42 = vpop.f32.mrb[46].mxu1  ;;  %6225 = vpow2.f32 %v2590_v11  ;;  %v2580_v20 = vmin.f32 %v7607_v13, 0.0  ;;  %vm2560_vm5 = vcmp.gt.f32.partialorder %v7605_v12, 0.0 }
 0x4a8   : > { %v2596_v51 = vmul.f32 1.442695, %v2577_v17  ;;  %v2519_v21 = vpop.f32.mrb[47].mxu1  ;;  %v7615_v28 = vadd.f32 %v5402_v42, %v2381_v0  ;;  %v2604_v41 = vmul.f32 1.442695, %v2581_v9  ;;  %v2411_v0 = vpop.permute.xlu1 %2410  ;;  %vm2564_vm9 = vcmp.gt.f32.partialorder %v7607_v13, 0.0 }
 0x4a9   : > { %v2594_v27 = vmul.f32 1.442695, %v2576_v25  ;;  %v7618_v29 = vadd.f32 %v2519_v21, %v2376_v63  ;;  %v2602_v30 = vmul.f32 1.442695, %v2580_v20  ;;  %vm2565_vm10 = vcmp.gt.f32.partialorder %v7611_v2, 0.0 }
 0x4aa   : > { %6227 = vpow2.f32 %v2596_v51  ;;  %v2583_v35 = vmin.f32 %v7615_v28, 0.0  ;;  %vm2567_vm12 = vcmp.gt.f32.partialorder %v7615_v28, 0.0 }
 0x4ab   : > { %6229 = vpow2.f32 %v2598_v18  ;;  %v5405_v32 = vpop.f32.mrb[48].mxu1  ;;  %v2582_v31 = vmin.f32 %v7618_v29, 0.0  ;;  %vm2566_vm11 = vcmp.gt.f32.partialorder %v7618_v29, 0.0 }
 0x4ac   : > { %6231 = vpow2.f32 %v2594_v27  ;;  %v2529_v34 = vpop.f32.mrb[49].mxu1  ;;  %v7622_v36 = vadd.f32 %v5405_v32, %v2391_v26  ;;  %v2608_v49 = vmul.f32 1.442695, %v2583_v35 }
 0x4ad   : > { %v7624_v38 = vadd.f32 %v2529_v34, %v2386_v19  ;;  %6233 = vpow2.f32 %v2600_v22  ;;  %v2606_v43 = vmul.f32 1.442695, %v2582_v31 }
 0x4ae   : > { %6235 = vpow2.f32 %v2602_v30  ;;  %v2585_v53 = vmin.f32 %v7622_v36, 0.0  ;;  %vm2569_vm14 = vcmp.gt.f32.partialorder %v7622_v36, 0.0 }
 0x4af   : > { %v2584_v44 = vmin.f32 %v7624_v38, 0.0  ;;  %v5408_v16 = vpop.f32.mrb[50].mxu1  ;;  %6237 = vpow2.f32 %v2604_v41  ;;  %vm2568_vm13 = vcmp.gt.f32.partialorder %v7624_v38, 0.0 }
 0x4b0   : > { %v6224_v46 = vpop.eup %6223  ;;  %v2539_v48 = vpop.f32.mrb[51].mxu1  ;;  %v7628_v54 = vadd.f32 %v5408_v16, %v2401_v40  ;;  %6239 = vpow2.f32 %v2606_v43  ;;  %v2612_v1 = vmul.f32 1.442695, %v2585_v53 }
 0x4b1   : > { %v7630_v55 = vadd.f32 %v2539_v48, %v2396_v39  ;;  %v6226_v56 = vpop.eup %6225  ;;  %v4367_v57 = vadd.f32 -1.0, %v6224_v46  ;;  %v2610_v62 = vmul.f32 1.442695, %v2584_v44  ;;  %6241 = vpow2.f32 %v2608_v49 }
 0x4b2   : > { %v4366_v58 = vadd.f32 -1.0, %v6226_v56  ;;  %v2587_v4 = vmin.f32 %v7628_v54, 0.0  ;;  %vm2571_vm1 = vcmp.gt.f32.partialorder %v7628_v54, 0.0 }
 0x4b3   : > { %v2586_v37 = vmin.f32 %v7630_v55, 0.0  ;;  %v5411_v24 = vpop.f32.mrb[52].mxu1  ;;  %v2639_v14 = vsel %vm2559_vm2, %v7592_v5, %v4367_v57  ;;  %6243 = vpow2.f32 %v2610_v62  ;;  %vm2570_vm15 = vcmp.gt.f32.partialorder %v7630_v55, 0.0 }
 0x4b4   : > { %v6228_v50 = vpop.eup %6227  ;;  %v2549_v45 = vpop.f32.mrb[53].mxu1  ;;  %v7639_v23 = vadd.f32 %v5411_v24, %v2411_v0  ;;  %v2638_v7 = vsel %vm2558_vm3, %v7594_v61, %v4366_v58  ;;  %6245 = vpow2.f32 %v2612_v1  ;;  %v2616_v61 = vmul.f32 1.442695, %v2587_v4 }
 0x4b5   : > { %v6230_v63 = vpop.eup %6229  ;;  %v7636_v6 = vadd.f32 %v2549_v45, %v2406_v8  ;;  %v2614_v10 = vmul.f32 1.442695, %v2586_v37  ;;  %5416 = vmatprep.mubr.msk.f32.mxu0 %vm2656_vm4, %v2638_v7  ;;  %v4369_v17 = vadd.f32 -1.0, %v6228_v50  ;;  %v2871_v62 = vcombine.high %v7586_v47, %v7586_v47 }
 0x4b6   : > { %v6232_v33 = vpop.eup %6231  ;;  %5417 = vmatmul.mubr.msk.f32.vlgmr.msra.gmra.mrb[90].mxu0 %vm2656_vm4, %v2639_v14  ;;  %v4370_v25 = vadd.f32 -1.0, %v6230_v63  ;;  %v2589_v19 = vmin.f32 %v7639_v23, 0.0  ;;  %vm2573_vm3 = vcmp.gt.f32.partialorder %v7639_v23, 0.0  ;;  %v6356_v24 = vmov 0.0  }
 0x4b7   : > { %v2588_v11 = vmin.f32 %v7636_v6, 0.0  ;;  %v4368_v15 = vadd.f32 -1.0, %v6232_v33  ;;  %v6234_v18 = vpop.eup %6233  ;;  %6247 = vpow2.f32 %v2614_v10  ;;  %v2641_v20 = vsel %vm2561_vm7, %v7603_v59, %v4369_v17  ;;  %3018 = vmatprep.mubr.f32.mxu1 %v6356_v24  ;;  %v4398_v50 = vld.sshfl [vmem:[%s8216_s8 + $0x8] sm:$0x3 pattern:$0x76325410] }
 0x4b8   : > { %v6236_v42 = vpop.eup %6235  ;;  %v4371_v21 = vadd.f32 -1.0, %v6234_v18  ;;  %v2642_v27 = vsel %vm2562_vm6, %v7596_v52, %v4370_v25  ;;  %6249 = vpow2.f32 %v2616_v61  ;;  %v2620_v9 = vmul.f32 1.442695, %v2589_v19  ;;  %5440 = vmatprep.subr.msk.mxu1 %vm2943_vm0, %v4398_v50  ;;  %v3421_v18 = vld [vmem:[#allocation3] sm:$0xff]  ;;  %v3423_v25 = vld [vmem:[#allocation3 + $0x10] sm:$0xff]  ;;  %v3422_v61 = vld [vmem:[#allocation3 + $0x8] sm:$0xff] }
 0x4b9   : > { %v2640_v5 = vsel %vm2560_vm5, %v7605_v12, %v4368_v15  ;;  %v2618_v51 = vmul.f32 1.442695, %v2588_v11  ;;  %v6238_v26 = vpop.eup %6237  ;;  %v4372_v22 = vadd.f32 -1.0, %v6236_v42  ;;  %vm2572_vm2 = vcmp.gt.f32.partialorder %v7636_v6, 0.0  ;;  %v3426_v19 = vld [vmem:[#allocation3 + $0x28] sm:$0xff] }
 0x4ba   : > { %5419 = vmatprep.mubr.msk.f32.mxu0 %vm2656_vm4, %v2640_v5  ;;  %v6240_v12 = vpop.eup %6239  ;;  %v2643_v59 = vsel %vm2563_vm8, %v7599_v3, %v4371_v21  ;;  %v4373_v32 = vadd.f32 -1.0, %v6238_v26  ;;  %v2885_v37 = vrot.slane %v2871_v62, %v7581_v60  ;;  %v3427_v21 = vld [vmem:[#allocation3 + $0x30] sm:$0xff]  ;;  %v3429_v26 = vld [vmem:[#allocation3 + $0x40] sm:$0xff]  ;;  %vm4091_vm5 = vcmask 326656  }
 0x4bb   : > { %5420 = vmatmul.mubr.msk.f32.gmra.mrb[92].mxu0 %vm2656_vm4, %v2641_v20  ;;  %v6242_v30 = vpop.eup %6241  ;;  %6251 = vpow2.f32 %v2618_v51  ;;  %v2644_v52 = vsel %vm2564_vm9, %v7607_v13, %v4372_v22  ;;  %v4374_v34 = vadd.f32 -1.0, %v6240_v12  ;;  %v3428_v51 = vld [vmem:[#allocation3 + $0x38] sm:$0xff] }
 0x4bc   : > { %5422 = vmatprep.mubr.msk.f32.mxu0 %vm2656_vm4, %v2642_v27  ;;  %6253 = vpow2.f32 %v2620_v9  ;;  %v2645_v35 = vsel %vm2565_vm10, %v7611_v2, %v4373_v32  ;;  %v4375_v39 = vadd.f32 -1.0, %v6242_v30  ;;  %v3424_v20 = vld [vmem:[#allocation3 + $0x18] sm:$0xff] }
 0x4bd   : > { %v6244_v31 = vpop.eup %6243  ;;  %v2646_v3 = vsel %vm2566_vm11, %v7618_v29, %v4374_v34 }
 0x4be   : > { %v6246_v41 = vpop.eup %6245  ;;  %v4376_v40 = vadd.f32 -1.0, %v6244_v31  ;;  %v2647_v13 = vsel %vm2567_vm12, %v7615_v28, %v4375_v39 }
 0x4bf   : > { %5423 = vmatmul.mubr.msk.f32.gmra.mrb[94].mxu0 %vm2656_vm4, %v2643_v59  ;;  %v4377_v44 = vadd.f32 -1.0, %v6246_v41 }
 0x4c0   : > { %5425 = vmatprep.mubr.msk.f32.mxu0 %vm2656_vm4, %v2644_v52  ;;  %v2648_v2 = vsel %vm2568_vm13, %v7624_v38, %v4376_v40 }
 0x4c1   : > { %v6248_v43 = vpop.eup %6247  ;;  %v2649_v29 = vsel %vm2569_vm14, %v7622_v36, %v4377_v44 }
 0x4c2   : > { %v6250_v16 = vpop.eup %6249  ;;  %v4378_v46 = vadd.f32 -1.0, %v6248_v43 }
 0x4c3   : > { %5426 = vmatmul.mubr.msk.f32.gmra.mrb[96].mxu0 %vm2656_vm4, %v2645_v35  ;;  %v4379_v49 = vadd.f32 -1.0, %v6250_v16  ;;  %v3431_v16 = vld [vmem:[#allocation3 + $0x50] sm:$0xff] }
 0x4c4   : > { %5428 = vmatprep.mubr.msk.f32.mxu0 %vm2656_vm4, %v2646_v3  ;;  %v2650_v28 = vsel %vm2570_vm15, %v7630_v55, %v4378_v46 }
 0x4c5   : > { %v6252_v48 = vpop.eup %6251  ;;  %v2651_v38 = vsel %vm2571_vm1, %v7628_v54, %v4379_v49  ;;  %v2887_v54 = vcombine.high %v2885_v37, %v2885_v37  ;;  %v3436_v49 = vld [vmem:[#allocation3 + $0x78] sm:$0xff] }
 0x4c6   : > { %v6254_v53 = vpop.eup %6253  ;;  %v4380_v56 = vadd.f32 -1.0, %v6252_v48 }
 0x4c7   : > { %5429 = vmatmul.mubr.msk.f32.gmra.mrb[98].mxu0 %vm2656_vm4, %v2647_v13  ;;  %v4381_v57 = vadd.f32 -1.0, %v6254_v53  ;;  %4417 = vmatprep.subr.msk.mxu0 %vm2943_vm0, %v2887_v54  ;;  %v3438_v53 = vld [vmem:[#allocation3 + $0x88] sm:$0xff] }
 0x4c8   : > { %5431 = vmatprep.mubr.msk.f32.mxu0 %vm2656_vm4, %v2648_v2  ;;  %v2652_v36 = vsel %vm2572_vm2, %v7636_v6, %v4380_v56  ;;  %4418 = vmatpush1.msk.msra.mxu0 %vm2943_vm0, %v2885_v37  ;;  %v3433_v2 = vld [vmem:[#allocation3 + $0x60] sm:$0xff] }
 0x4c9   : > { %v2653_v55 = vsel %vm2573_vm3, %v7639_v23, %v4381_v57  ;;  %v3437_v56 = vld [vmem:[#allocation3 + $0x80] sm:$0xff] }
 0x4cb   : > { %5432 = vmatmul.mubr.msk.f32.gmra.mrb[100].mxu0 %vm2656_vm4, %v2649_v29  ;;  %v3432_v29 = vld [vmem:[#allocation3 + $0x58] sm:$0xff] }
 0x4cc   : > { %5434 = vmatprep.mubr.msk.f32.mxu0 %vm2656_vm4, %v2650_v28  ;;  %v3434_v28 = vld [vmem:[#allocation3 + $0x68] sm:$0xff] }
 0x4cf   : > { %5435 = vmatmul.mubr.msk.f32.gmra.mrb[102].mxu0 %vm2656_vm4, %v2651_v38  ;;  %v3439_v38 = vld [vmem:[#allocation3 + $0x90] sm:$0xff] }
 0x4d0   : > { %5437 = vmatprep.mubr.msk.f32.mxu0 %vm2656_vm4, %v2652_v36 }
 0x4d3   : > { %5438 = vmatmul.mubr.msk.f32.gmra.mrb[104].mxu0 %vm2656_vm4, %v2653_v55  ;;  %vm2850_vm4 = vcmask 15360  }
 0x4d4   : > { %3179 = vmatprep.mubr.f32.mxu0 %v6356_v24 }
 0x589   : > { %v7705_v60 = vpop.f32.mrb[90].mxu0 }
 0x58a   : > { %2852 = vst.msk [vmem:[%s7703_s19 + $0x8] sm:$0xff] %vm2850_vm4, %v7705_v60  ;;  %v7710_v47 = vpop.f32.mrb[91].mxu0 }
 0x58b   : > { %2851 = vst.msk [vmem:[%s7703_s19] sm:$0xff] %vm2850_vm4, %v7710_v47  ;;  %4401 = vmatmul.mubr.msk.f32.vlgmr.msra.gmra.mrb[54].mxu1 %vm2850_vm4, %v7710_v47  ;;  %4419 = vmatmul.mubr.msk.f32.vlgmr.msra.gmra.mrb[106].mxu0 %vm2850_vm4, %v7710_v47 }
 0x58c   : > { %3024 = vmatprep.mubr.f32.mxu1 %v6356_v24  ;;  %3185 = vmatprep.mubr.f32.mxu0 %v6356_v24 }
 0x58d   : > { %5441 = vmatpush3.msk.msra.mxu1 %vm2943_vm0, %v4398_v50  ;;  %vm6358_vm0 = vmmov 0  }
 0x58e   : > { %v7721_v8 = vpop.f32.mrb[92].mxu0 }
 0x58f   : > { %2854 = vst.msk [vmem:[%s7703_s19 + $0x18] sm:$0xff] %vm2850_vm4, %v7721_v8  ;;  %v7727_v45 = vpop.f32.mrb[93].mxu0  ;;  %4402 = vmatmul.mubr.msk.f32.gmra.mrb[56].mxu1 %vm2850_vm4, %v7705_v60  ;;  %4420 = vmatmul.mubr.msk.f32.gmra.mrb[108].mxu0 %vm2850_vm4, %v7705_v60 }
 0x590   : > { %2853 = vst.msk [vmem:[%s7703_s19 + $0x10] sm:$0xff] %vm2850_vm4, %v7727_v45  ;;  %3030 = vmatprep.mubr.f32.mxu1 %v6356_v24  ;;  %3191 = vmatprep.mubr.f32.mxu0 %v6356_v24 }
 0x592   : > { %v7738_v58 = vpop.f32.mrb[94].mxu0 }
 0x593   : > { %2856 = vst.msk [vmem:[%s7703_s19 + $0x28] sm:$0xff] %vm2850_vm4, %v7738_v58  ;;  %v7743_v63 = vpop.f32.mrb[95].mxu0  ;;  %4403 = vmatmul.mubr.msk.f32.gmra.mrb[58].mxu1 %vm2850_vm4, %v7727_v45  ;;  %4421 = vmatmul.mubr.msk.f32.gmra.mrb[110].mxu0 %vm2850_vm4, %v7727_v45 }
 0x594   : > { %2855 = vst.msk [vmem:[%s7703_s19 + $0x20] sm:$0xff] %vm2850_vm4, %v7743_v63  ;;  %3036 = vmatprep.mubr.f32.mxu1 %v6356_v24  ;;  %3197 = vmatprep.mubr.f32.mxu0 %v6356_v24 }
 0x596   : > { %v7754_v0 = vpop.f32.mrb[96].mxu0 }
 0x597   : > { %2858 = vst.msk [vmem:[%s7703_s19 + $0x38] sm:$0xff] %vm2850_vm4, %v7754_v0  ;;  %v7759_v1 = vpop.f32.mrb[97].mxu0  ;;  %4404 = vmatmul.mubr.msk.f32.gmra.mrb[60].mxu1 %vm2850_vm4, %v7721_v8  ;;  %4422 = vmatmul.mubr.msk.f32.gmra.mrb[112].mxu0 %vm2850_vm4, %v7721_v8 }
 0x598   : > { %2857 = vst.msk [vmem:[%s7703_s19 + $0x30] sm:$0xff] %vm2850_vm4, %v7759_v1  ;;  %3042 = vmatprep.mubr.f32.mxu1 %v6356_v24  ;;  %3203 = vmatprep.mubr.f32.mxu0 %v6356_v24 }
 0x59a   : > { %v7770_v4 = vpop.f32.mrb[98].mxu0 }
 0x59b   : > { %2860 = vst.msk [vmem:[%s7703_s19 + $0x48] sm:$0xff] %vm2850_vm4, %v7770_v4  ;;  %v7775_v6 = vpop.f32.mrb[99].mxu0  ;;  %4405 = vmatmul.mubr.msk.f32.gmra.mrb[62].mxu1 %vm2850_vm4, %v7743_v63  ;;  %4423 = vmatmul.mubr.msk.f32.gmra.mrb[114].mxu0 %vm2850_vm4, %v7743_v63 }
 0x59c   : > { %2859 = vst.msk [vmem:[%s7703_s19 + $0x40] sm:$0xff] %vm2850_vm4, %v7775_v6  ;;  %3048 = vmatprep.mubr.f32.mxu1 %v6356_v24  ;;  %3209 = vmatprep.mubr.f32.mxu0 %v6356_v24 }
 0x59e   : > { %v7786_v33 = vpop.f32.mrb[100].mxu0 }
 0x59f   : > { %2862 = vst.msk [vmem:[%s7703_s19 + $0x58] sm:$0xff] %vm2850_vm4, %v7786_v33  ;;  %v7791_v14 = vpop.f32.mrb[101].mxu0  ;;  %4406 = vmatmul.mubr.msk.f32.gmra.mrb[64].mxu1 %vm2850_vm4, %v7738_v58  ;;  %4424 = vmatmul.mubr.msk.f32.gmra.mrb[116].mxu0 %vm2850_vm4, %v7738_v58 }
 0x5a0   : > { %2861 = vst.msk [vmem:[%s7703_s19 + $0x50] sm:$0xff] %vm2850_vm4, %v7791_v14  ;;  %3054 = vmatprep.mubr.f32.mxu1 %v6356_v24  ;;  %3215 = vmatprep.mubr.f32.mxu0 %v6356_v24 }
 0x5a2   : > { %v5436_v23 = vpop.f32.mrb[102].mxu0 }
 0x5a3   : > { %2864 = vst.msk [vmem:[%s7703_s19 + $0x68] sm:$0xff] %vm2850_vm4, %v5436_v23  ;;  %v2831_v7 = vpop.f32.mrb[103].mxu0  ;;  %4407 = vmatmul.mubr.msk.f32.gmra.mrb[66].mxu1 %vm2850_vm4, %v7759_v1  ;;  %4425 = vmatmul.mubr.msk.f32.gmra.mrb[118].mxu0 %vm2850_vm4, %v7759_v1 }
 0x5a4   : > { %2863 = vst.msk [vmem:[%s7703_s19 + $0x60] sm:$0xff] %vm2850_vm4, %v2831_v7  ;;  %3060 = vmatprep.mubr.f32.mxu1 %v6356_v24  ;;  %3221 = vmatprep.mubr.f32.mxu0 %v6356_v24 }
 0x5a6   : > { %v5439_v10 = vpop.f32.mrb[104].mxu0 }
 0x5a7   : > { %2866 = vst.msk [vmem:[%s7703_s19 + $0x78] sm:$0xff] %vm2850_vm4, %v5439_v10  ;;  %v2841_v11 = vpop.f32.mrb[105].mxu0  ;;  %4408 = vmatmul.mubr.msk.f32.gmra.mrb[68].mxu1 %vm2850_vm4, %v7754_v0  ;;  %4426 = vmatmul.mubr.msk.f32.gmra.mrb[120].mxu0 %vm2850_vm4, %v7754_v0 }
 0x5a8   : > { %2865 = vst.msk [vmem:[%s7703_s19 + $0x70] sm:$0xff] %vm2850_vm4, %v2841_v11  ;;  %3066 = vmatprep.mubr.f32.mxu1 %v6356_v24  ;;  %3227 = vmatprep.mubr.f32.mxu0 %v6356_v24  ;;  %s475_s19 = sand.u32 1, %s6341_s30  }
 0x5a9   : > { %s4218_s26 = sshll.u32 %s475_s19, 3  ;;  %s4094_s22 = scalar_lea.sflag [#allocation5], %s475_s19 }
 0x5aa   : > { %s477_s21 = scalar_lea.vmem [#allocation6], %s4218_s26  ;;  %s6289_s26 = scalar_lea.vmem %s6288_s20, 256 }
 0x5ab   : > { %4409 = vmatmul.mubr.msk.f32.gmra.mrb[70].mxu1 %vm2850_vm4, %v7775_v6  ;;  %4427 = vmatmul.mubr.msk.f32.gmra.mrb[122].mxu0 %vm2850_vm4, %v7775_v6  ;;  %s4112_s28 = sshll.u32 %s477_s21, 4  ;;  %s8168_s28 = int_to_ptr.vmem [resolvable:$true] %s4112_s28 }
 0x5ac   : > { %3072 = vmatprep.mubr.f32.mxu1 %v6356_v24  ;;  %3233 = vmatprep.mubr.f32.mxu0 %v6356_v24  ;;  %s6283_s18 = scalar_lea.vmem %s8168_s28, 128  ;;  %p6290_p3 = scmp.lt.s32.totalorder %s8168_s28, %s6288_s20 }
 0x5ad   : > { %p6284_p9 = scmp.ne.s32.totalorder %s8168_s28, %s6283_s18  ;;  %p6291_p4 = scmp.lt.s32.totalorder %s6289_s26, %s6283_s18 }
 0x5af   : > { %4410 = vmatmul.mubr.msk.f32.gmra.mrb[72].mxu1 %vm2850_vm4, %v7770_v4  ;;  %4428 = vmatmul.mubr.msk.f32.gmra.mrb[124].mxu0 %vm2850_vm4, %v7770_v4  ;;  %p6285_p12 = pnand %p6284_p9, %p8241_p10  ;;  %p6292_p7 = por %p6291_p4, %p6290_p3 }
 0x5b0   : > { %3078 = vmatprep.mubr.f32.mxu1 %v6356_v24  ;;  %3239 = vmatprep.mubr.f32.mxu0 %v6356_v24 }
 0x5b1   : > { %p6286_p2 = pneg %p6285_p12 }
 0x5b3   : > { %4411 = vmatmul.mubr.msk.f32.gmra.mrb[74].mxu1 %vm2850_vm4, %v7791_v14  ;;  %4429 = vmatmul.mubr.msk.f32.gmra.mrb[126].mxu0 %vm2850_vm4, %v7791_v14  ;;  %p6293_p8 = pnand %p6292_p7, %p6286_p2 }
 0x5b4   : > { %3084 = vmatprep.mubr.f32.mxu1 %v6356_v24  ;;  %3245 = vmatprep.mubr.f32.mxu0 %v6356_v24 }
 0x5b7   : > { %4412 = vmatmul.mubr.msk.f32.gmra.mrb[76].mxu1 %vm2850_vm4, %v7786_v33  ;;  %4430 = vmatmul.mubr.msk.f32.gmra.mrb[128].mxu0 %vm2850_vm4, %v7786_v33 }
 0x5b8   : > { %3090 = vmatprep.mubr.f32.mxu1 %v6356_v24  ;;  %3251 = vmatprep.mubr.f32.mxu0 %v6356_v24 }
 0x5bb   : > { %4413 = vmatmul.mubr.msk.f32.gmra.mrb[78].mxu1 %vm2850_vm4, %v2831_v7  ;;  %4431 = vmatmul.mubr.msk.f32.gmra.mrb[130].mxu0 %vm2850_vm4, %v2831_v7 }
 0x5bc   : > { %3096 = vmatprep.mubr.f32.mxu1 %v6356_v24  ;;  %3257 = vmatprep.mubr.f32.mxu0 %v6356_v24 }
 0x5bf   : > { %4414 = vmatmul.mubr.msk.f32.gmra.mrb[80].mxu1 %vm2850_vm4, %v5436_v23  ;;  %4432 = vmatmul.mubr.msk.f32.gmra.mrb[132].mxu0 %vm2850_vm4, %v5436_v23 }
 0x5c0   : > { %3102 = vmatprep.mubr.f32.mxu1 %v6356_v24  ;;  %3263 = vmatprep.mubr.f32.mxu0 %v6356_v24 }
 0x5c3   : > { %4415 = vmatmul.mubr.msk.f32.gmra.mrb[82].mxu1 %vm2850_vm4, %v2841_v11  ;;  %4433 = vmatmul.mubr.msk.f32.gmra.mrb[134].mxu0 %vm2850_vm4, %v2841_v11 }
 0x5c4   : > { %3108 = vmatprep.mubr.f32.mxu1 %v6356_v24  ;;  %3269 = vmatprep.mubr.f32.mxu0 %v6356_v24 }
 0x5c7   : > { %4416 = vmatmul.mubr.msk.f32.gmra.mrb[84].mxu1 %vm2850_vm4, %v5439_v10  ;;  %4434 = vmatmul.mubr.msk.f32.gmra.mrb[136].mxu0 %vm2850_vm4, %v5439_v10 }
 0x5c8   : > { %5442 = vmatprep.mubr.msk.f32.mxu1 %vm2850_vm4, %v7710_v47  ;;  %3646 = vmatprep.mubr.f32.mxu0 %v6356_v24 }
 0x5cb   : > { %5443 = vmatmul.mubr.msk.f32.vlgmr.msra.gmra.mrb[86].mxu1 %vm2850_vm4, %v7705_v60 }
 0x5cc   : > { %5445 = vmatprep.mubr.msk.f32.mxu1 %vm2850_vm4, %v7727_v45 }
 0x5cf   : > { %5446 = vmatmul.mubr.msk.f32.gmra.mrb[88].mxu1 %vm2850_vm4, %v7721_v8 }
 0x5d0   : > { %5448 = vmatprep.mubr.msk.f32.mxu1 %vm2850_vm4, %v7743_v63 }
 0x5d3   : > { %5449 = vmatmul.mubr.msk.f32.gmra.mrb[90].mxu1 %vm2850_vm4, %v7738_v58 }
 0x5d4   : > { %5451 = vmatprep.mubr.msk.f32.mxu1 %vm2850_vm4, %v7759_v1 }
 0x5d7   : > { %5452 = vmatmul.mubr.msk.f32.gmra.mrb[92].mxu1 %vm2850_vm4, %v7754_v0 }
 0x5d8   : > { %5454 = vmatprep.mubr.msk.f32.mxu1 %vm2850_vm4, %v7775_v6 }
 0x5db   : > { %5455 = vmatmul.mubr.msk.f32.gmra.mrb[94].mxu1 %vm2850_vm4, %v7770_v4 }
 0x5dc   : > { %5457 = vmatprep.mubr.msk.f32.mxu1 %vm2850_vm4, %v7791_v14  ;;  %v3441_v14 = vld [vmem:[#allocation3 + $0xa0] sm:$0xff] }
 0x5df   : > { %5458 = vmatmul.mubr.msk.f32.gmra.mrb[96].mxu1 %vm2850_vm4, %v7786_v33 }
 0x5e0   : > { %5460 = vmatprep.mubr.msk.f32.mxu1 %vm2850_vm4, %v2831_v7 }
 0x5e3   : > { %5461 = vmatmul.mubr.msk.f32.gmra.mrb[98].mxu1 %vm2850_vm4, %v5436_v23  ;;  %v3443_v23 = vld [vmem:[#allocation3 + $0xb0] sm:$0xff] }
 0x5e4   : > { %5463 = vmatprep.mubr.msk.f32.mxu1 %vm2850_vm4, %v2841_v11  ;;  %v3442_v11 = vld [vmem:[#allocation3 + $0xa8] sm:$0xff] }
 0x5e7   : > { %5464 = vmatmul.mubr.msk.f32.gmra.mrb[100].mxu1 %vm2850_vm4, %v5439_v10 }
 0x5e8   : > { %3717 = vmatprep.mubr.f32.mxu1 %v6356_v24 }
 0x65e   : > { %v3020_v15 = vpop.f32.mrb[54].mxu1  ;;  %v3181_v17 = vpop.f32.mrb[106].mxu0 }
 0x65f   : > { %v3022_v42 = vpop.f32.mrb[55].mxu1  ;;  %v3183_v5 = vpop.f32.mrb[107].mxu0  ;;  %v3501_v12 = vmul.f32 %v3421_v18, %v3020_v15  ;;  %v3503_v9 = vmul.f32 %v3423_v25, %v3181_v17  ;;  %v3446_v15 = vld [vmem:[#allocation3 + $0xc8] sm:$0xff]  ;;  %v3448_v17 = vld [vmem:[#allocation3 + $0xd8] sm:$0xff]  ;;  %v3447_v25 = vld [vmem:[#allocation3 + $0xd0] sm:$0xff] }
 0x660   : > { %v3502_v52 = vmul.f32 %v3422_v61, %v3022_v42  ;;  %v3504_v34 = vmul.f32 %v3424_v20, %v3183_v5  ;;  %v3444_v18 = vld [vmem:[#allocation3 + $0xb8] sm:$0xff]  ;;  %v3449_v42 = vld [vmem:[#allocation3 + $0xe0] sm:$0xff] }
 0x662   : > { %v3026_v27 = vpop.f32.mrb[56].mxu1  ;;  %v3187_v22 = vpop.f32.mrb[108].mxu0 }
 0x663   : > { %v3506_v30 = vmul.f32 %v3426_v19, %v3026_v27  ;;  %v3508_v59 = vmul.f32 %v3428_v51, %v3187_v22  ;;  %v3028_v32 = vpop.f32.mrb[57].mxu1  ;;  %v3189_v31 = vpop.f32.mrb[109].mxu0 }
 0x664   : > { %v3507_v35 = vmul.f32 %v3427_v21, %v3028_v32  ;;  %v3509_v39 = vmul.f32 %v3429_v26, %v3189_v31 }
 0x665   : > { %v5942_v41 = vpack.c.bf16 %v3506_v30, %v3501_v12  ;;  %v5974_v3 = vpack.c.bf16 %v3508_v59, %v3503_v9 }
 0x666   : > { %v5940_v40 = vpack.c.bf16 %v3507_v35, %v3502_v52  ;;  %v5972_v43 = vpack.c.bf16 %v3509_v39, %v3504_v34  ;;  %v3032_v13 = vpop.f32.mrb[58].mxu1  ;;  %v3193_v44 = vpop.f32.mrb[110].mxu0  ;;  %v3451_v39 = vld [vmem:[#allocation3 + $0xf0] sm:$0xff] }
 0x667   : > { %v3034_v46 = vpop.f32.mrb[59].mxu1  ;;  %v3195_v48 = vpop.f32.mrb[111].mxu0  ;;  %v3511_v55 = vmul.f32 %v3431_v16, %v3032_v13  ;;  %v3513_v62 = vmul.f32 %v3433_v2, %v3193_v44  ;;  %v3456_v13 = vld [vmem:[#allocation3 + $0x118] sm:$0xff]  ;;  %v3458_v44 = vld [vmem:[#allocation3 + $0x128] sm:$0xff]  ;;  %v3457_v2 = vld [vmem:[#allocation3 + $0x120] sm:$0xff] }
 0x668   : > { %5941 = vmatprep.subr.bf16.mxu0 %v5940_v40  ;;  %5973 = vmatprep.subr.bf16.mxu1 %v5972_v43  ;;  %v3512_v47 = vmul.f32 %v3432_v29, %v3034_v46  ;;  %v3514_v8 = vmul.f32 %v3434_v28, %v3195_v48  ;;  %v3452_v43 = vld [vmem:[#allocation3 + $0xf8] sm:$0xff]  ;;  %v3454_v16 = vld [vmem:[#allocation3 + $0x108] sm:$0xff]  ;;  %v3459_v46 = vld [vmem:[#allocation3 + $0x130] sm:$0xff] }
 0x669   : > { %5943 = vmatpush1.bf16.msra.mxu0 %v5942_v41  ;;  %5975 = vmatpush1.bf16.msra.mxu1 %v5974_v3  ;;  %v3453_v41 = vld [vmem:[#allocation3 + $0x100] sm:$0xff] }
 0x66a   : > { %v3038_v57 = vpop.f32.mrb[60].mxu1  ;;  %v3199_v36 = vpop.f32.mrb[112].mxu0 }
 0x66b   : > { %v3516_v37 = vmul.f32 %v3436_v49, %v3038_v57  ;;  %v3518_v54 = vmul.f32 %v3438_v53, %v3199_v36  ;;  %v3040_v50 = vpop.f32.mrb[61].mxu1  ;;  %v3201_v60 = vpop.f32.mrb[113].mxu0 }
 0x66c   : > { %v3517_v45 = vmul.f32 %v3437_v56, %v3040_v50  ;;  %v3519_v58 = vmul.f32 %v3439_v38, %v3201_v60 }
 0x66d   : > { %v5946_v63 = vpack.c.bf16 %v3516_v37, %v3511_v55  ;;  %v5978_v0 = vpack.c.bf16 %v3518_v54, %v3513_v62 }
 0x66e   : > { %v5944_v1 = vpack.c.bf16 %v3517_v45, %v3512_v47  ;;  %v5976_v4 = vpack.c.bf16 %v3519_v58, %v3514_v8  ;;  %v3044_v6 = vpop.f32.mrb[62].mxu1  ;;  %v3205_v33 = vpop.f32.mrb[114].mxu0  ;;  %v3461_v58 = vld [vmem:[#allocation3 + $0x140] sm:$0xff] }
 0x66f   : > { %v3046_v7 = vpop.f32.mrb[63].mxu1  ;;  %v3207_v10 = vpop.f32.mrb[115].mxu0  ;;  %v3521_v19 = vmul.f32 %v3441_v14, %v3044_v6  ;;  %v3523_v51 = vmul.f32 %v3443_v23, %v3205_v33  ;;  %v3466_v6 = vld [vmem:[#allocation3 + $0x168] sm:$0xff]  ;;  %v3468_v33 = vld [vmem:[#allocation3 + $0x178] sm:$0xff]  ;;  %v3467_v23 = vld [vmem:[#allocation3 + $0x170] sm:$0xff] }
 0x670   : > { %5945 = vmatprep.subr.bf16.mxu0 %v5944_v1  ;;  %5977 = vmatprep.subr.bf16.mxu1 %v5976_v4  ;;  %v3522_v22 = vmul.f32 %v3442_v11, %v3046_v7  ;;  %v3524_v12 = vmul.f32 %v3444_v18, %v3207_v10  ;;  %v3462_v4 = vld [vmem:[#allocation3 + $0x148] sm:$0xff]  ;;  %v3464_v14 = vld [vmem:[#allocation3 + $0x158] sm:$0xff]  ;;  %v3469_v7 = vld [vmem:[#allocation3 + $0x180] sm:$0xff] }
 0x671   : > { %5947 = vmatpush1.bf16.msra.mxu0 %v5946_v63  ;;  %5979 = vmatpush1.bf16.msra.mxu1 %v5978_v0  ;;  %v3463_v63 = vld [vmem:[#allocation3 + $0x150] sm:$0xff] }
 0x672   : > { %v3050_v5 = vpop.f32.mrb[64].mxu1  ;;  %v3211_v61 = vpop.f32.mrb[116].mxu0 }
 0x673   : > { %v3526_v20 = vmul.f32 %v3446_v15, %v3050_v5  ;;  %v3528_v21 = vmul.f32 %v3448_v17, %v3211_v61  ;;  %v3052_v26 = vpop.f32.mrb[65].mxu1  ;;  %v3213_v27 = vpop.f32.mrb[117].mxu0 }
 0x674   : > { %v3527_v9 = vmul.f32 %v3447_v25, %v3052_v26  ;;  %v3529_v30 = vmul.f32 %v3449_v42, %v3213_v27 }
 0x675   : > { %v5950_v59 = vpack.c.bf16 %v3526_v20, %v3521_v19  ;;  %v5982_v32 = vpack.c.bf16 %v3528_v21, %v3523_v51 }
 0x676   : > { %v5948_v31 = vpack.c.bf16 %v3527_v9, %v3522_v22  ;;  %v5980_v52 = vpack.c.bf16 %v3529_v30, %v3524_v12  ;;  %v3056_v34 = vpop.f32.mrb[66].mxu1  ;;  %v3217_v35 = vpop.f32.mrb[118].mxu0  ;;  %v3471_v30 = vld [vmem:[#allocation3 + $0x190] sm:$0xff] }
 0x677   : > { %v3058_v3 = vpop.f32.mrb[67].mxu1  ;;  %v3219_v40 = vpop.f32.mrb[119].mxu0  ;;  %v3531_v49 = vmul.f32 %v3451_v39, %v3056_v34  ;;  %v3533_v53 = vmul.f32 %v3453_v41, %v3217_v35  ;;  %v3476_v34 = vld [vmem:[#allocation3 + $0x1b8] sm:$0xff]  ;;  %v3478_v35 = vld [vmem:[#allocation3 + $0x1c8] sm:$0xff]  ;;  %v3477_v41 = vld [vmem:[#allocation3 + $0x1c0] sm:$0xff] }
 0x678   : > { %5949 = vmatprep.subr.bf16.mxu0 %v5948_v31  ;;  %5981 = vmatprep.subr.bf16.mxu1 %v5980_v52  ;;  %v3532_v36 = vmul.f32 %v3452_v43, %v3058_v3  ;;  %v3534_v55 = vmul.f32 %v3454_v16, %v3219_v40  ;;  %v3472_v52 = vld [vmem:[#allocation3 + $0x198] sm:$0xff]  ;;  %v3474_v39 = vld [vmem:[#allocation3 + $0x1a8] sm:$0xff]  ;;  %v3479_v3 = vld [vmem:[#allocation3 + $0x1d0] sm:$0xff] }
 0x679   : > { %5951 = vmatpush1.bf16.msra.mxu0 %v5950_v59  ;;  %5983 = vmatpush1.bf16.msra.mxu1 %v5982_v32  ;;  %v3473_v59 = vld [vmem:[#allocation3 + $0x1a0] sm:$0xff] }
 0x67a   : > { %v3062_v48 = vpop.f32.mrb[68].mxu1  ;;  %v3223_v29 = vpop.f32.mrb[120].mxu0 }
 0x67b   : > { %v3536_v28 = vmul.f32 %v3456_v13, %v3062_v48  ;;  %v3538_v56 = vmul.f32 %v3458_v44, %v3223_v29  ;;  %v3064_v38 = vpop.f32.mrb[69].mxu1  ;;  %v3225_v57 = vpop.f32.mrb[121].mxu0 }
 0x67c   : > { %v3537_v62 = vmul.f32 %v3457_v2, %v3064_v38  ;;  %v3539_v37 = vmul.f32 %v3459_v46, %v3225_v57 }
 0x67d   : > { %v5954_v54 = vpack.c.bf16 %v3536_v28, %v3531_v49  ;;  %v5986_v50 = vpack.c.bf16 %v3538_v56, %v3533_v53 }
 0x67e   : > { %v5952_v60 = vpack.c.bf16 %v3537_v62, %v3532_v36  ;;  %v5984_v47 = vpack.c.bf16 %v3539_v37, %v3534_v55  ;;  %v3068_v8 = vpop.f32.mrb[70].mxu1  ;;  %v3229_v45 = vpop.f32.mrb[122].mxu0  ;;  %v3481_v37 = vld [vmem:[#allocation3 + $0x1e0] sm:$0xff] }
 0x67f   : > { %v3070_v0 = vpop.f32.mrb[71].mxu1  ;;  %v3231_v1 = vpop.f32.mrb[123].mxu0  ;;  %v3541_v15 = vmul.f32 %v3461_v58, %v3068_v8  ;;  %v3543_v17 = vmul.f32 %v3463_v63, %v3229_v45  ;;  %v3486_v8 = vld [vmem:[#allocation3 + $0x208] sm:$0xff]  ;;  %v3488_v45 = vld [vmem:[#allocation3 + $0x218] sm:$0xff]  ;;  %v3487_v63 = vld [vmem:[#allocation3 + $0x210] sm:$0xff] }
 0x680   : > { %5953 = vmatprep.subr.bf16.mxu0 %v5952_v60  ;;  %5985 = vmatprep.subr.bf16.mxu1 %v5984_v47  ;;  %v3542_v61 = vmul.f32 %v3462_v4, %v3070_v0  ;;  %v3544_v19 = vmul.f32 %v3464_v14, %v3231_v1  ;;  %v3482_v47 = vld [vmem:[#allocation3 + $0x1e8] sm:$0xff]  ;;  %v3484_v58 = vld [vmem:[#allocation3 + $0x1f8] sm:$0xff]  ;;  %v3489_v0 = vld [vmem:[#allocation3 + $0x220] sm:$0xff] }
 0x681   : > { %5955 = vmatpush1.bf16.msra.mxu0 %v5954_v54  ;;  %5987 = vmatpush1.bf16.msra.mxu1 %v5986_v50  ;;  %v3483_v54 = vld [vmem:[#allocation3 + $0x1f0] sm:$0xff] }
 0x682   : > { %v3074_v10 = vpop.f32.mrb[72].mxu1  ;;  %v3235_v11 = vpop.f32.mrb[124].mxu0 }
 0x683   : > { %v3546_v18 = vmul.f32 %v3466_v6, %v3074_v10  ;;  %v3548_v25 = vmul.f32 %v3468_v33, %v3235_v11  ;;  %v3076_v42 = vpop.f32.mrb[73].mxu1  ;;  %v3237_v5 = vpop.f32.mrb[125].mxu0 }
 0x684   : > { %v3547_v51 = vmul.f32 %v3467_v23, %v3076_v42  ;;  %v3549_v20 = vmul.f32 %v3469_v7, %v3237_v5 }
 0x685   : > { %v5958_v21 = vpack.c.bf16 %v3546_v18, %v3541_v15  ;;  %v5990_v26 = vpack.c.bf16 %v3548_v25, %v3543_v17 }
 0x686   : > { %v5956_v27 = vpack.c.bf16 %v3547_v51, %v3542_v61  ;;  %v5988_v22 = vpack.c.bf16 %v3549_v20, %v3544_v19  ;;  %v3080_v12 = vpop.f32.mrb[74].mxu1  ;;  %v3241_v9 = vpop.f32.mrb[126].mxu0  ;;  %v3491_v20 = vld [vmem:[#allocation3 + $0x230] sm:$0xff] }
 0x687   : > { %v3082_v32 = vpop.f32.mrb[75].mxu1  ;;  %v3243_v31 = vpop.f32.mrb[127].mxu0  ;;  %v3551_v13 = vmul.f32 %v3471_v30, %v3080_v12  ;;  %v3553_v44 = vmul.f32 %v3473_v59, %v3241_v9  ;;  %v3496_v12 = vld [vmem:[#allocation3 + $0x258] sm:$0xff]  ;;  %v3498_v9 = vld [vmem:[#allocation3 + $0x268] sm:$0xff]  ;;  %v3497_v59 = vld [vmem:[#allocation3 + $0x260] sm:$0xff] }
 0x688   : > { %5957 = vmatprep.subr.bf16.mxu0 %v5956_v27  ;;  %5989 = vmatprep.subr.bf16.mxu1 %v5988_v22  ;;  %v3552_v29 = vmul.f32 %v3472_v52, %v3082_v32  ;;  %v3554_v49 = vmul.f32 %v3474_v39, %v3243_v31  ;;  %v3492_v22 = vld [vmem:[#allocation3 + $0x238] sm:$0xff]  ;;  %v3494_v30 = vld [vmem:[#allocation3 + $0x248] sm:$0xff]  ;;  %v3499_v32 = vld [vmem:[#allocation3 + $0x270] sm:$0xff] }
 0x689   : > { %5959 = vmatpush1.bf16.msra.mxu0 %v5958_v21  ;;  %5991 = vmatpush1.bf16.msra.mxu1 %v5990_v26  ;;  %v3493_v21 = vld [vmem:[#allocation3 + $0x240] sm:$0xff] }
 0x68a   : > { %v3086_v40 = vpop.f32.mrb[76].mxu1  ;;  %v3247_v43 = vpop.f32.mrb[128].mxu0 }
 0x68b   : > { %v3556_v16 = vmul.f32 %v3476_v34, %v3086_v40  ;;  %v3558_v2 = vmul.f32 %v3478_v35, %v3247_v43  ;;  %v3088_v46 = vpop.f32.mrb[77].mxu1  ;;  %v3249_v48 = vpop.f32.mrb[129].mxu0  ;;  %v3810_v43 = vld [vmem:[%s8219_s11 + $0x80] sm:$0xff] }
 0x68c   : > { %v3557_v53 = vmul.f32 %v3477_v41, %v3088_v46  ;;  %v3559_v28 = vmul.f32 %v3479_v3, %v3249_v48  ;;  %v3430_v48 = vld [vmem:[#allocation3 + $0x48] sm:$0xff] }
 0x68d   : > { %v5962_v56 = vpack.c.bf16 %v3556_v16, %v3551_v13  ;;  %v5994_v38 = vpack.c.bf16 %v3558_v2, %v3553_v44  ;;  %v3811_v13 = vld [vmem:[%s8219_s11 + $0x88] sm:$0xff] }
 0x68e   : > { %v5960_v57 = vpack.c.bf16 %v3557_v53, %v3552_v29  ;;  %v5992_v36 = vpack.c.bf16 %v3559_v28, %v3554_v49  ;;  %v3092_v55 = vpop.f32.mrb[78].mxu1  ;;  %v3253_v62 = vpop.f32.mrb[130].mxu0  ;;  %v3425_v53 = vld [vmem:[#allocation3 + $0x20] sm:$0xff] }
 0x68f   : > { %v3094_v50 = vpop.f32.mrb[79].mxu1  ;;  %v3255_v60 = vpop.f32.mrb[131].mxu0  ;;  %v3561_v6 = vmul.f32 %v3481_v37, %v3092_v55  ;;  %v3563_v33 = vmul.f32 %v3483_v54, %v3253_v62  ;;  %v3794_v62 = vld [vmem:[%s8219_s11] sm:$0xff]  ;;  %v3795_v37 = vld [vmem:[%s8219_s11 + $0x8] sm:$0xff] }
 0x690   : > { %5961 = vmatprep.subr.bf16.mxu0 %v5960_v57  ;;  %5993 = vmatprep.subr.bf16.mxu1 %v5992_v36  ;;  %v3562_v11 = vmul.f32 %v3482_v47, %v3094_v50  ;;  %v3564_v15 = vmul.f32 %v3484_v58, %v3255_v60  ;;  %v6028_v57 = vpack.c.bf16 %v3811_v13, %v3810_v43  ;;  %v3440_v50 = vld [vmem:[#allocation3 + $0x98] sm:$0xff]  ;;  %v3812_v60 = vld [vmem:[%s8219_s11 + $0x90] sm:$0xff]  ;;  %v3465_v43 = vld [vmem:[#allocation3 + $0x160] sm:$0xff] }
 0x691   : > { %5963 = vmatpush1.bf16.msra.mxu0 %v5962_v56  ;;  %5995 = vmatpush1.bf16.msra.mxu1 %v5994_v38  ;;  %v3813_v47 = vld [vmem:[%s8219_s11 + $0x98] sm:$0xff] }
 0x692   : > { %v3098_v1 = vpop.f32.mrb[80].mxu1  ;;  %v3259_v4 = vpop.f32.mrb[132].mxu0 }
 0x693   : > { %v3566_v14 = vmul.f32 %v3486_v8, %v3098_v1  ;;  %v3568_v23 = vmul.f32 %v3488_v45, %v3259_v4  ;;  %v3100_v7 = vpop.f32.mrb[81].mxu1  ;;  %v3261_v10 = vpop.f32.mrb[133].mxu0  ;;  %v3435_v8 = vld [vmem:[#allocation3 + $0x70] sm:$0xff]  ;;  %v7911_v45 = vld [vmem:[%s8218_s10] sm:$0xff]  ;;  %v6030_v1 = vpack.c.bf16 %v3795_v37, %v3794_v62 }
 0x694   : > { %v3567_v17 = vmul.f32 %v3487_v63, %v3100_v7  ;;  %v3569_v18 = vmul.f32 %v3489_v0, %v3261_v10  ;;  %v6357_v0 = vmov 0.0|0.0   ;;  %v3450_v10 = vld [vmem:[#allocation3 + $0xe8] sm:$0xff] }
 0x695   : > { %v5966_v25 = vpack.c.bf16 %v3566_v14, %v3561_v6  ;;  %v5998_v42 = vpack.c.bf16 %v3568_v23, %v3563_v33  ;;  %v6032_v33 = vpack.c.bf16 %v3813_v47, %v3812_v60  ;;  %v3796_v14 = vld [vmem:[%s8219_s11 + $0x10] sm:$0xff]  ;;  %v3797_v23 = vld [vmem:[%s8219_s11 + $0x18] sm:$0xff] }
 0x696   : > { %v5964_v5 = vpack.c.bf16 %v3567_v17, %v3562_v11  ;;  %v5996_v61 = vpack.c.bf16 %v3569_v18, %v3564_v15  ;;  %v3104_v19 = vpop.f32.mrb[82].mxu1  ;;  %v3265_v51 = vpop.f32.mrb[134].mxu0  ;;  %v3814_v11 = vld [vmem:[%s8219_s11 + $0xa0] sm:$0xff]  ;;  %v3815_v15 = vld [vmem:[%s8219_s11 + $0xa8] sm:$0xff]  ;;  %v3804_v60 = vld [vmem:[%s8219_s11 + $0x50] sm:$0xff] }
 0x697   : > { %v3106_v26 = vpop.f32.mrb[83].mxu1  ;;  %v3267_v27 = vpop.f32.mrb[135].mxu0  ;;  %v3571_v34 = vmul.f32 %v3491_v20, %v3104_v19  ;;  %v3573_v35 = vmul.f32 %v3493_v21, %v3265_v51  ;;  %v3445_v17 = vld [vmem:[#allocation3 + $0xc0] sm:$0xff]  ;;  %v6036_v19 = vpack.c.bf16 %v3815_v15, %v3814_v11  ;;  %v3799_v20 = vld [vmem:[%s8219_s11 + $0x28] sm:$0xff]  ;;  %v3805_v47 = vld [vmem:[%s8219_s11 + $0x58] sm:$0xff] }
 0x698   : > { %5965 = vmatprep.subr.bf16.mxu0 %v5964_v5  ;;  %5997 = vmatprep.subr.bf16.mxu1 %v5996_v61  ;;  %v3572_v44 = vmul.f32 %v3492_v22, %v3106_v26  ;;  %v3574_v16 = vmul.f32 %v3494_v30, %v3267_v27  ;;  %v3798_v51 = vld [vmem:[%s8219_s11 + $0x20] sm:$0xff]  ;;  %v3460_v26 = vld [vmem:[#allocation3 + $0x138] sm:$0xff]  ;;  %v3816_v27 = vld [vmem:[%s8219_s11 + $0xb0] sm:$0xff] }
 0x699   : > { %5967 = vmatpush1.bf16.msra.mxu0 %v5966_v25  ;;  %5999 = vmatpush1.bf16.msra.mxu1 %v5998_v42  ;;  %v6034_v42 = vpack.c.bf16 %v3797_v23, %v3796_v14  ;;  %v3817_v22 = vld [vmem:[%s8219_s11 + $0xb8] sm:$0xff]  ;;  %v6050_v14 = vpack.c.bf16 %v3805_v47, %v3804_v60  ;;  %v3806_v11 = vld [vmem:[%s8219_s11 + $0x60] sm:$0xff]  ;;  %v3807_v15 = vld [vmem:[%s8219_s11 + $0x68] sm:$0xff] }
 0x69a   : > { %v3110_v31 = vpop.f32.mrb[84].mxu1  ;;  %v3271_v52 = vpop.f32.mrb[136].mxu0 }
 0x69b   : > { %v3576_v39 = vmul.f32 %v3496_v12, %v3110_v31  ;;  %v3578_v41 = vmul.f32 %v3498_v9, %v3271_v52  ;;  %v3112_v3 = vpop.f32.mrb[85].mxu1  ;;  %v3273_v40 = vpop.f32.mrb[137].mxu0  ;;  %v3455_v12 = vld [vmem:[#allocation3 + $0x110] sm:$0xff]  ;;  %v6040_v52 = vpack.c.bf16 %v3817_v22, %v3816_v27  ;;  %v3843_v27 = vld [vmem:[%s8219_s11 + $0x188] sm:$0xff] }
 0x69c   : > { %v3577_v2 = vmul.f32 %v3497_v59, %v3112_v3  ;;  %v3579_v46 = vmul.f32 %v3499_v32, %v3273_v40  ;;  %v6038_v59 = vpack.c.bf16 %v3799_v20, %v3798_v51  ;;  %v3818_v3 = vld [vmem:[%s8219_s11 + $0xc0] sm:$0xff]  ;;  %v3819_v40 = vld [vmem:[%s8219_s11 + $0xc8] sm:$0xff]  ;;  %v6054_v20 = vpack.c.bf16 %v3807_v15, %v3806_v11  ;;  %v3840_v15 = vld [vmem:[%s8219_s11 + $0x170] sm:$0xff] }
 0x69d   : > { %v5970_v29 = vpack.c.bf16 %v3576_v39, %v3571_v34  ;;  %v6002_v49 = vpack.c.bf16 %v3578_v41, %v3573_v35  ;;  %v3800_v34 = vld [vmem:[%s8219_s11 + $0x30] sm:$0xff]  ;;  %v3801_v35 = vld [vmem:[%s8219_s11 + $0x38] sm:$0xff]  ;;  %v3470_v41 = vld [vmem:[#allocation3 + $0x188] sm:$0xff] }
 0x69e   : > { %v5968_v28 = vpack.c.bf16 %v3577_v2, %v3572_v44  ;;  %v6000_v56 = vpack.c.bf16 %v3579_v46, %v3574_v16  ;;  %v5444_v38 = vpop.f32.mrb[86].mxu1  ;;  %v6042_v16 = vpack.c.bf16 %v3801_v35, %v3800_v34  ;;  %v3842_v51 = vld [vmem:[%s8219_s11 + $0x180] sm:$0xff]  ;;  %v3844_v35 = vld [vmem:[%s8219_s11 + $0x190] sm:$0xff] }
 0x69f   : > { %v3510_v36 = vmul.f32 %v5444_v38, %v3430_v48  ;;  %v3342_v55 = vpop.f32.mrb[87].mxu1  ;;  %v6044_v48 = vpack.c.bf16 %v3819_v40, %v3818_v3  ;;  %v3821_v38 = vld [vmem:[%s8219_s11 + $0xd8] sm:$0xff]  ;;  %v3828_v40 = vld [vmem:[%s8219_s11 + $0x110] sm:$0xff] }
 0x6a0   : > { %v3505_v54 = vmul.f32 %v3425_v53, %v3342_v55  ;;  %5969 = vmatprep.subr.bf16.mxu0 %v5968_v28  ;;  %6001 = vmatprep.subr.bf16.mxu1 %v6000_v56  ;;  %v3480_v28 = vld [vmem:[#allocation3 + $0x1d8] sm:$0xff]  ;;  %v3820_v56 = vld [vmem:[%s8219_s11 + $0xd0] sm:$0xff] }
 0x6a1   : > { %5971 = vmatpush1.bf16.msra.mxu0 %v5970_v29  ;;  %6003 = vmatpush1.bf16.msra.mxu1 %v6002_v49  ;;  %v3802_v29 = vld [vmem:[%s8219_s11 + $0x40] sm:$0xff]  ;;  %v3803_v49 = vld [vmem:[%s8219_s11 + $0x48] sm:$0xff] }
 0x6a2   : > { %v6005_v58 = vpack.c.bf16 %v3510_v36, %v3505_v54  ;;  %v5447_v63 = vpop.f32.mrb[88].mxu1  ;;  %6004 = vmatprep.subr.bf16.mxu0 %v6357_v0  ;;  %6029 = vmatprep.subr.bf16.mxu1 %v6028_v57  ;;  %v3475_v57 = vld [vmem:[#allocation3 + $0x1b0] sm:$0xff]  ;;  %v6046_v62 = vpack.c.bf16 %v3803_v49, %v3802_v29 }
 0x6a3   : > { %v3520_v4 = vmul.f32 %v5447_v63, %v3440_v50  ;;  %v3352_v6 = vpop.f32.mrb[89].mxu1  ;;  %v6048_v50 = vpack.c.bf16 %v3821_v38, %v3820_v56  ;;  %v3822_v63 = vld [vmem:[%s8219_s11 + $0xe0] sm:$0xff]  ;;  %v3848_v29 = vld [vmem:[%s8219_s11 + $0x1b0] sm:$0xff]  ;;  %v3833_v56 = vld [vmem:[%s8219_s11 + $0x138] sm:$0xff] }
 0x6a4   : > { %v3515_v7 = vmul.f32 %v3435_v8, %v3352_v6  ;;  %3647 = vmatmul.mubr.f32.vlgmr.msra.gmra.mrb[138].mxu0 %v7911_v45  ;;  %3718 = vmatmul.mubr.f32.vlgmr.msra.gmra.mrb[102].mxu1 %v7911_v45  ;;  %v3850_v38 = vld [vmem:[%s8219_s11 + $0x1c0] sm:$0xff] }
 0x6a5   : > { %6006 = vmatpush3.bf16.msra.mxu0 %v6005_v58  ;;  %5498 = vmatprep.mubr.msk.f32.mxu0 %vm6358_vm0, %v6356_v24  ;;  %v3490_v58 = vld [vmem:[#allocation3 + $0x228] sm:$0xff] }
 0x6a6   : > { %v6008_v18 = vpack.c.bf16 %v3520_v4, %v3515_v7  ;;  %v5450_v25 = vpop.f32.mrb[90].mxu1  ;;  %6007 = vmatprep.subr.bf16.mxu0 %v6357_v0  ;;  %6031 = vmatpush3.bf16.msra.mxu1 %v6030_v1  ;;  %v3823_v1 = vld [vmem:[%s8219_s11 + $0xe8] sm:$0xff]  ;;  %v3485_v4 = vld [vmem:[#allocation3 + $0x200] sm:$0xff] }
 0x6a7   : > { %v3530_v5 = vmul.f32 %v5450_v25, %v3450_v10  ;;  %v3362_v61 = vpop.f32.mrb[91].mxu1  ;;  %6033 = vmatprep.subr.bf16.mxu1 %v6032_v33  ;;  %v6052_v10 = vpack.c.bf16 %v3823_v1, %v3822_v63  ;;  %v3824_v25 = vld [vmem:[%s8219_s11 + $0xf0] sm:$0xff]  ;;  %v3854_v63 = vld [vmem:[%s8219_s11 + $0x1e0] sm:$0xff]  ;;  %v3855_v1 = vld [vmem:[%s8219_s11 + $0x1e8] sm:$0xff] }
 0x6a8   : > { %v3525_v21 = vmul.f32 %v3445_v17, %v3362_v61 }
 0x6a9   : > { %6009 = vmatpush3.bf16.msra.mxu0 %v6008_v18  ;;  %v3500_v18 = vld [vmem:[#allocation3 + $0x278] sm:$0xff] }
 0x6aa   : > { %v6011_v9 = vpack.c.bf16 %v3530_v5, %v3525_v21  ;;  %v5453_v30 = vpop.f32.mrb[92].mxu1  ;;  %6010 = vmatprep.subr.bf16.mxu0 %v6357_v0  ;;  %6035 = vmatpush3.bf16.msra.mxu1 %v6034_v42  ;;  %v3825_v42 = vld [vmem:[%s8219_s11 + $0xf8] sm:$0xff]  ;;  %v3495_v5 = vld [vmem:[#allocation3 + $0x250] sm:$0xff] }
 0x6ab   : > { %v3540_v32 = vmul.f32 %v5453_v30, %v3460_v26  ;;  %v3372_v31 = vpop.f32.mrb[93].mxu1  ;;  %6037 = vmatprep.subr.bf16.mxu1 %v6036_v19  ;;  %v6056_v22 = vpack.c.bf16 %v3825_v42, %v3824_v25  ;;  %v3858_v25 = vld [vmem:[%s8219_s11 + $0x200] sm:$0xff]  ;;  %v3859_v42 = vld [vmem:[%s8219_s11 + $0x208] sm:$0xff] }
 0x6ac   : > { %v3535_v39 = vmul.f32 %v3455_v12, %v3372_v31  ;;  %v3808_v12 = vld [vmem:[%s8219_s11 + $0x70] sm:$0xff]  ;;  %v3826_v31 = vld [vmem:[%s8219_s11 + $0x100] sm:$0xff] }
 0x6ad   : > { %6012 = vmatpush3.bf16.msra.mxu0 %v6011_v9  ;;  %v3809_v9 = vld [vmem:[%s8219_s11 + $0x78] sm:$0xff] }
 0x6ae   : > { %v6014_v13 = vpack.c.bf16 %v3540_v32, %v3535_v39  ;;  %v5456_v44 = vpop.f32.mrb[94].mxu1  ;;  %6013 = vmatprep.subr.bf16.mxu0 %v6357_v0  ;;  %6039 = vmatpush3.bf16.msra.mxu1 %v6038_v59  ;;  %v6060_v32 = vpack.c.bf16 %v3843_v27, %v3842_v51  ;;  %v6058_v34 = vpack.c.bf16 %v3809_v9, %v3808_v12  ;;  %v3845_v39 = vld [vmem:[%s8219_s11 + $0x198] sm:$0xff]  ;;  %v3863_v12 = vld [vmem:[%s8219_s11 + $0x228] sm:$0xff] }
 0x6af   : > { %v3550_v2 = vmul.f32 %v5456_v44, %v3470_v41  ;;  %v3382_v46 = vpop.f32.mrb[95].mxu1  ;;  %6041 = vmatprep.subr.bf16.mxu1 %v6040_v52  ;;  %v3827_v52 = vld [vmem:[%s8219_s11 + $0x108] sm:$0xff]  ;;  %v6064_v3 = vpack.c.bf16 %v3845_v39, %v3844_v35  ;;  %v3869_v35 = vld [vmem:[%s8219_s11 + $0x258] sm:$0xff] }
 0x6b0   : > { %v3545_v53 = vmul.f32 %v3465_v43, %v3382_v46  ;;  %v6062_v41 = vpack.c.bf16 %v3827_v52, %v3826_v31  ;;  %v3829_v43 = vld [vmem:[%s8219_s11 + $0x118] sm:$0xff]  ;;  %v3847_v44 = vld [vmem:[%s8219_s11 + $0x1a8] sm:$0xff]  ;;  %v3830_v46 = vld [vmem:[%s8219_s11 + $0x120] sm:$0xff] }
 0x6b1   : > { %6015 = vmatpush3.bf16.msra.mxu0 %v6014_v13  ;;  %v3846_v13 = vld [vmem:[%s8219_s11 + $0x1a0] sm:$0xff]  ;;  %v3867_v31 = vld [vmem:[%s8219_s11 + $0x248] sm:$0xff] }
 0x6b2   : > { %v6017_v36 = vpack.c.bf16 %v3550_v2, %v3545_v53  ;;  %v5459_v55 = vpop.f32.mrb[96].mxu1  ;;  %6016 = vmatprep.subr.bf16.mxu0 %v6357_v0  ;;  %6043 = vmatpush3.bf16.msra.mxu1 %v6042_v16  ;;  %v6066_v16 = vpack.c.bf16 %v3829_v43, %v3828_v40  ;;  %v6068_v2 = vpack.c.bf16 %v3847_v44, %v3846_v13  ;;  %v3872_v43 = vld [vmem:[%s8219_s11 + $0x270] sm:$0xff]  ;;  %v3873_v13 = vld [vmem:[%s8219_s11 + $0x278] sm:$0xff] }
 0x6b3   : > { %v3560_v37 = vmul.f32 %v5459_v55, %v3480_v28  ;;  %v3392_v54 = vpop.f32.mrb[97].mxu1  ;;  %6045 = vmatprep.subr.bf16.mxu1 %v6044_v48  ;;  %v3831_v48 = vld [vmem:[%s8219_s11 + $0x128] sm:$0xff]  ;;  %v3832_v28 = vld [vmem:[%s8219_s11 + $0x130] sm:$0xff]  ;;  %v6114_v44 = vpack.c.bf16 %v3873_v13, %v3872_v43 }
 0x6b4   : > { %v3555_v8 = vmul.f32 %v3475_v57, %v3392_v54  ;;  %v6070_v49 = vpack.c.bf16 %v3831_v48, %v3830_v46  ;;  %v3851_v57 = vld [vmem:[%s8219_s11 + $0x1c8] sm:$0xff]  ;;  %v3852_v54 = vld [vmem:[%s8219_s11 + $0x1d0] sm:$0xff] }
 0x6b5   : > { %6018 = vmatpush3.bf16.msra.mxu0 %v6017_v36  ;;  %v6074_v36 = vpack.c.bf16 %v3833_v56, %v3832_v28  ;;  %v6076_v55 = vpack.c.bf16 %v3851_v57, %v3850_v38 }
 0x6b6   : > { %v6020_v6 = vpack.c.bf16 %v3560_v37, %v3555_v8  ;;  %v5462_v33 = vpop.f32.mrb[98].mxu1  ;;  %6019 = vmatprep.subr.bf16.mxu0 %v6357_v0  ;;  %6047 = vmatpush3.bf16.msra.mxu1 %v6046_v62  ;;  %v3834_v62 = vld [vmem:[%s8219_s11 + $0x140] sm:$0xff]  ;;  %v3835_v37 = vld [vmem:[%s8219_s11 + $0x148] sm:$0xff]  ;;  %v3836_v8 = vld [vmem:[%s8219_s11 + $0x150] sm:$0xff] }
 0x6b7   : > { %v3570_v23 = vmul.f32 %v5462_v33, %v3490_v58  ;;  %v3402_v7 = vpop.f32.mrb[99].mxu1  ;;  %6049 = vmatprep.subr.bf16.mxu1 %v6048_v50  ;;  %v3853_v50 = vld [vmem:[%s8219_s11 + $0x1d8] sm:$0xff]  ;;  %v6078_v60 = vpack.c.bf16 %v3835_v37, %v3834_v62  ;;  %v3838_v33 = vld [vmem:[%s8219_s11 + $0x160] sm:$0xff] }
 0x6b8   : > { %v3565_v17 = vmul.f32 %v3485_v4, %v3402_v7  ;;  %v6080_v47 = vpack.c.bf16 %v3853_v50, %v3852_v54  ;;  %v3837_v58 = vld [vmem:[%s8219_s11 + $0x158] sm:$0xff]  ;;  %v3856_v7 = vld [vmem:[%s8219_s11 + $0x1f0] sm:$0xff] }
 0x6b9   : > { %6021 = vmatpush3.bf16.msra.mxu0 %v6020_v6  ;;  %v6082_v4 = vpack.c.bf16 %v3837_v58, %v3836_v8  ;;  %v6084_v6 = vpack.c.bf16 %v3855_v1, %v3854_v63 }
 0x6ba   : > { %v6023_v61 = vpack.c.bf16 %v3570_v23, %v3565_v17  ;;  %v5465_v19 = vpop.f32.mrb[100].mxu1  ;;  %6022 = vmatprep.subr.bf16.mxu0 %v6357_v0  ;;  %6051 = vmatpush3.bf16.msra.mxu1 %v6050_v14  ;;  %v3839_v14 = vld [vmem:[%s8219_s11 + $0x168] sm:$0xff]  ;;  %v3841_v17 = vld [vmem:[%s8219_s11 + $0x178] sm:$0xff] }
 0x6bb   : > { %v3580_v21 = vmul.f32 %v5465_v19, %v3500_v18  ;;  %v3412_v26 = vpop.f32.mrb[101].mxu1  ;;  %6053 = vmatprep.subr.bf16.mxu1 %v6052_v10  ;;  %v6086_v23 = vpack.c.bf16 %v3839_v14, %v3838_v33  ;;  %v3857_v10 = vld [vmem:[%s8219_s11 + $0x1f8] sm:$0xff]  ;;  %v6090_v18 = vpack.c.bf16 %v3841_v17, %v3840_v15 }
 0x6bc   : > { %v3575_v30 = vmul.f32 %v3495_v5, %v3412_v26  ;;  %v6088_v11 = vpack.c.bf16 %v3857_v10, %v3856_v7  ;;  %v3861_v26 = vld [vmem:[%s8219_s11 + $0x218] sm:$0xff] }
 0x6bd   : > { %6024 = vmatpush3.bf16.msra.mxu0 %v6023_v61  ;;  %v6093_v61 = vpack.c.bf16 %v3859_v42, %v3858_v25 }
 0x6be   : > { %v6026_v59 = vpack.c.bf16 %v3580_v21, %v3575_v30  ;;  %6025 = vmatprep.subr.bf16.mxu0 %v6357_v0  ;;  %6055 = vmatpush3.bf16.msra.mxu1 %v6054_v20  ;;  %v3860_v21 = vld [vmem:[%s8219_s11 + $0x210] sm:$0xff] }
 0x6bf   : > { %6057 = vmatprep.subr.bf16.mxu1 %v6056_v22  ;;  %v6096_v27 = vpack.c.bf16 %v3861_v26, %v3860_v21  ;;  %v3862_v22 = vld [vmem:[%s8219_s11 + $0x220] sm:$0xff]  ;;  %v3864_v30 = vld [vmem:[%s8219_s11 + $0x230] sm:$0xff] }
 0x6c0   : > { %v6099_v9 = vpack.c.bf16 %v3863_v12, %v3862_v22 }
 0x6c1   : > { %6027 = vmatpush3.bf16.msra.mxu0 %v6026_v59 }
 0x6c2   : > { %6061 = vmatprep.subr.bf16.mxu0 %v6060_v32  ;;  %6059 = vmatpush3.bf16.msra.mxu1 %v6058_v34  ;;  %v3866_v32 = vld [vmem:[%s8219_s11 + $0x240] sm:$0xff]  ;;  %v3868_v34 = vld [vmem:[%s8219_s11 + $0x250] sm:$0xff] }
 0x6c3   : > { %6092 = vmatprep.subr.bf16.mxu1 %v6357_v0  ;;  %v6105_v52 = vpack.c.bf16 %v3867_v31, %v3866_v32  ;;  %v6108_v39 = vpack.c.bf16 %v3869_v35, %v3868_v34 }
 0x6c4   : > { %5499 = vmatmul.mubr.f32.vlgmr.msra.gmra.mrb[140].mxu0 %v7911_v45  ;;  %v3849_v45 = vld [vmem:[%s8219_s11 + $0x1b8] sm:$0xff] }
 0x6c5   : > { %6063 = vmatpush3.bf16.msra.mxu0 %v6062_v41  ;;  %v6072_v53 = vpack.c.bf16 %v3849_v45, %v3848_v29  ;;  %v3870_v41 = vld [vmem:[%s8219_s11 + $0x260] sm:$0xff] }
 0x6c6   : > { %6065 = vmatprep.subr.bf16.mxu0 %v6064_v3  ;;  %v3871_v3 = vld [vmem:[%s8219_s11 + $0x268] sm:$0xff]  ;;  %v4452_v29 = vld [vmem:[%s8220_s12] ss:$0 sm:$0xff] }
 0x6c7   : > { %v6111_v40 = vpack.c.bf16 %v3871_v3, %v3870_v41 }
 0x6c9   : > { %6067 = vmatpush3.bf16.msra.mxu0 %v6066_v16 }
 0x6ca   : > { %6069 = vmatprep.subr.bf16.mxu0 %v6068_v2 }
 0x6cd   : > { %6071 = vmatpush3.bf16.msra.mxu0 %v6070_v49 }
 0x6ce   : > { %6073 = vmatprep.subr.bf16.mxu0 %v6072_v53 }
 0x6d1   : > { %6075 = vmatpush3.bf16.msra.mxu0 %v6074_v36 }
 0x6d2   : > { %6077 = vmatprep.subr.bf16.mxu0 %v6076_v55 }
 0x6d5   : > { %6079 = vmatpush3.bf16.msra.mxu0 %v6078_v60 }
 0x6d6   : > { %6081 = vmatprep.subr.bf16.mxu0 %v6080_v47 }
 0x6d9   : > { %6083 = vmatpush3.bf16.msra.mxu0 %v6082_v4 }
 0x6da   : > { %6085 = vmatprep.subr.bf16.mxu0 %v6084_v6 }
 0x6dd   : > { %6087 = vmatpush3.bf16.msra.mxu0 %v6086_v23 }
 0x6de   : > { %6089 = vmatprep.subr.bf16.mxu0 %v6088_v11 }
 0x6e1   : > { %6091 = vmatpush3.bf16.msra.mxu0 %v6090_v18 }
 0x777   : > { %v3648_v5 = vpop.f32.mrb[138].mxu0  ;;  %v3719_v19 = vpop.f32.mrb[102].mxu1 }
 0x778   : > { %v3650_v51 = vpop.f32.mrb[139].mxu0  ;;  %v3721_v20 = vpop.f32.mrb[103].mxu1 }
 0x779   : > { %3945 = vmatprep.mubr.f32.mxu1 %v3650_v51  ;;  %4015 = vmatprep.mubr.f32.mxu0 %v3721_v20 }
 0x77a   : > { %3946 = vmatmul.mubr.f32.vlgmr.msra.gmra.mrb[104].mxu1 %v3648_v5  ;;  %4016 = vmatmul.mubr.f32.vlgmr.msra.gmra.mrb[142].mxu0 %v3719_v19 }
 0x77b   : > { %6094 = vmatpush3.bf16.msra.mxu1 %v6093_v61  ;;  %5533 = vmatprep.mubr.msk.f32.mxu1 %vm6358_vm0, %v6356_v24  ;;  %v3865_v24 = vld [vmem:[%s8219_s11 + $0x238] sm:$0xff] }
 0x77c   : > { %6095 = vmatprep.subr.bf16.mxu1 %v6357_v0  ;;  %v6102_v59 = vpack.c.bf16 %v3865_v24, %v3864_v30 }
 0x77f   : > { %6097 = vmatpush3.bf16.msra.mxu1 %v6096_v27 }
 0x780   : > { %6098 = vmatprep.subr.bf16.mxu1 %v6357_v0 }
 0x783   : > { %6100 = vmatpush3.bf16.msra.mxu1 %v6099_v9 }
 0x784   : > { %6101 = vmatprep.subr.bf16.mxu1 %v6357_v0 }
 0x787   : > { %6103 = vmatpush3.bf16.msra.mxu1 %v6102_v59 }
 0x788   : > { %6104 = vmatprep.subr.bf16.mxu1 %v6357_v0 }
 0x78b   : > { %6106 = vmatpush3.bf16.msra.mxu1 %v6105_v52 }
 0x78c   : > { %6107 = vmatprep.subr.bf16.mxu1 %v6357_v0 }
 0x78f   : > { %6109 = vmatpush3.bf16.msra.mxu1 %v6108_v39 }
 0x790   : > { %6110 = vmatprep.subr.bf16.mxu1 %v6357_v0 }
 0x793   : > { %6112 = vmatpush3.bf16.msra.mxu1 %v6111_v40 }
 0x794   : > { %6113 = vmatprep.subr.bf16.mxu1 %v6357_v0 }
 0x797   : > { %6115 = vmatpush3.bf16.msra.mxu1 %v6114_v44  ;;  %v3790_v16 = vpop.f32.mrb[140].mxu0 }
 0x798   : > { %v5500_v2 = vpop.f32.mrb[141].mxu0 }
 0x79a   : > { %5534 = vmatmul.mubr.f32.vlgmr.msra.gmra.mrb[106].mxu1 %v3790_v16 }
 0x84d   : > { %v4981_v46 = vpop.f32.mrb[104].mxu1  ;;  %v5016_v48 = vpop.f32.mrb[142].mxu0 }
 0x84e   : > { %v4982_v45 = vpop.f32.mrb[105].mxu1  ;;  %v5017_v49 = vpop.f32.mrb[143].mxu0 }
 0x84f   : > { %v4983_v53 = vadd.f32 %v4982_v45, %v4981_v46  ;;  %v5018_v28 = vadd.f32 %v5017_v49, %v5016_v48 }
 0x851   : > { %v3948_v56 = vadd.f32 %v4983_v53, %v4452_v29 }
 0x853   : > { %v4018_v38 = vadd.f32 %v5018_v28, %v3948_v56 }
 0x86d   : > { %v4087_v0 = vpop.f32.mrb[106].mxu1 }
 0x86e   : > { %v4088_v57 = vadd.f32 %v4087_v0, %v4018_v38  ;;  %v5535_v36 = vpop.f32.mrb[107].mxu1 }
 0x870   : > { %4092 = vst.msk [vmem:[%s477_s21] sm:$0xff] %vm4091_vm5, %v4088_v57 }
 0x871   : > { %6296 = shalt.err (!%p6293_p8)
}
 0x872   : > { %s6297_s19 = scalar_lea.hbm %s8166_s25, 128  ;;  %s6301_s27 = scalar_lea.hbm %s8221_s13, 256 }
 0x873   : > { %p6298_p11 = scmp.ne.s32.totalorder %s8166_s25, %s6297_s19  ;;  %p6302_p0 = scmp.lt.u32.totalorder %s8166_s25, %s8221_s13 }
 0x874   : > { %p6303_p5 = scmp.lt.u32.totalorder %s6301_s27, %s6297_s19  ;;  %p6305_p9 = scmp.lt.u32.totalorder %s6297_s19, %s8166_s25 }
 0x875   : > { %p6299_p13 = pnand %p6298_p11, %p8241_p10 }
 0x876   : > { %p6304_p6 = por %p6303_p5, %p6302_p0 }
 0x877   : > { %p6300_p1 = pneg %p6299_p13 }
 0x878   : > { %p6306_p12 = por %p6305_p9, %p6304_p6 }
 0x87a   : > { %p6307_p2 = pnand %p6306_p12, %p6300_p1 }
 0x87c   : > { %6310 = shalt.err (!%p6307_p2)
}
 0x87d   : > { %6136 = dma.vmem_to_hbm [thread:$0]  (%p8241_p10), %s8168_s28, 128, %s8166_s25, %s4094_s22  }
 0x87e PF: > { %s8242_s18 = sld [smem:[#allocation12_spill]]  ;;  %p6148_p3 = scmp.ge.s32.totalorder %s6349_s16, 2 }
 0x87f   : > { %s4128_s20 = sand.u32 1, %s6337_s29  }
 0x880   : > { %s4129_s26 = scalar_lea.sflag [#allocation5], %s4128_s20 }
 0x884   : > { %p8243_p4 = scmp.ne.s32.totalorder %s8242_s18, 0 }
 0x886   : > { %p6143_p7 = pnand %p6148_p3, %p8243_p4 }
 0x888   : > { %6332 = dma.done.wait (!%p6143_p7), %s4129_s26, 128  }
 0x889   : > { %6334 = vsyncadd (!%p6143_p7), %s4129_s26, 4294967168  ;;  %s8244_s16 = sld [smem:[#allocation10_spill]]  ;;  %s8245_s19 = sld [smem:[#allocation9_spill]] }
 0x88a   : > { %s8246_s15 = sld [smem:[#allocation11_spill]]  ;;  %s8247_s29 = smov %s6341_s30 }
 0x88f   : > { %p26_p8 = scmp.ge.s32.totalorder %s8244_s16, 4   ;;  %s8248_s30 = smov %s8245_s19 }
 0x891   :  { %28 = sbr.rel (!%p26_p8) target bundleno = 4 (0x4), region = 131 }
 0x898   :  { %4142 = vsyncpa [#allocation4], 1 }
 0x899   :  { %4144 = vsyncpa [#allocation4 + $0x1], 1 }
 0x89a   :  { %4145 = vsyncpa [#allocation5], 1 }
 0x89b   :  { %4147 = vsyncpa [#allocation5 + $0x1], 1 }

</bundles_post_ra>
